<compile_context>
chip_gen: v7x
topology: tpu7x:2x2x1
jax: 0.10.0
libtpu: 0.0.40
codegen_flags: <defaults>
</compile_context>

<pallas_src>
import jax
import jax.numpy as jnp
from jax.experimental import pallas as pl
from jax.experimental.pallas import tpu as pltpu

EPS = 1e-5
NEG_SLOPE = 0.2
OUT_DIM = 784
OUT_PAD = 1024           # padded final Dout: two lane-dense 512-wide tiles
TILE_N = 512             # final-layer Dout tile (grid = 2, parallel on v7x)
HIDDEN = (128, 256, 512, 1024)


# ----------------------------------------------------------------------------
# Kernel
# ----------------------------------------------------------------------------
def _bn_leaky_linear(x, w_ref, b_ref, g_ref, be_ref):
    """BatchNorm1d(LeakyReLU(x @ W + b)) with full-batch statistics (f32)."""
    y = jnp.dot(x.astype(jnp.bfloat16), w_ref[...],
                preferred_element_type=jnp.float32) + b_ref[...]
    y = jnp.maximum(y, NEG_SLOPE * y)                   # LeakyReLU(0.2)
    inv_n = 1.0 / y.shape[0]
    mean = jnp.sum(y, axis=0, keepdims=True) * inv_n    # one-pass stats
    ex2 = jnp.sum(y * y, axis=0, keepdims=True) * inv_n
    var = jnp.maximum(ex2 - mean * mean, 0.0)           # clamp f32 cancellation
    inv_std = jax.lax.rsqrt(var + EPS)
    scale = g_ref[...] * inv_std                        # fold gamma
    shift = be_ref[...] - mean * scale
    return y * scale + shift


def _generator_kernel(z_ref,
                      w1, b1, g1, be1,
                      w2, b2, g2, be2,
                      w3, b3, g3, be3,
                      w4, b4, g4, be4,
                      w5_ref, b5_ref,
                      o_ref):
    # Layers 1-4 are recomputed per grid step.  They are tiny (~11 MFLOP) and
    # fully hidden behind the w5-tile DMA; recomputing them keeps the two
    # final-layer tiles independent so they shard across TensorCores on v7x.
    h = _bn_leaky_linear(z_ref[...], w1, b1, g1, be1)
    h = _bn_leaky_linear(h, w2, b2, g2, be2)
    h = _bn_leaky_linear(h, w3, b3, g3, be3)
    h = _bn_leaky_linear(h, w4, b4, g4, be4)

    # Final Linear on one 512-wide output tile.
    y = jnp.dot(h.astype(jnp.bfloat16), w5_ref[...],
                preferred_element_type=jnp.float32) + b5_ref[...]
    o_ref[...] = y.astype(o_ref.dtype)


# ----------------------------------------------------------------------------
# Pallas wrapper (single fused call)
# ----------------------------------------------------------------------------
def _const2d(shape):
    # Whole-array block, constant across the grid (DMA'd once per core).
    return pl.BlockSpec(shape, lambda j: (0, 0))


@jax.jit
def generator_forward(z, params):
    n, latent = z.shape
    flat, in_specs = [z], [_const2d((n, latent))]
    for (w, b, g, be) in params[:4]:
        din, dout = w.shape
        flat += [w, b, g, be]
        in_specs += [_const2d((din, dout)), _const2d((1, dout)),
                     _const2d((1, dout)), _const2d((1, dout))]
    w5, b5 = params[4]
    flat += [w5, b5]
    in_specs += [pl.BlockSpec((w5.shape[0], TILE_N), lambda j: (0, j)),
                 pl.BlockSpec((1, TILE_N), lambda j: (0, j))]

    out = pl.pallas_call(
        _generator_kernel,
        out_shape=jax.ShapeDtypeStruct((n, OUT_PAD), jnp.float32),
        grid=(OUT_PAD // TILE_N,),
        in_specs=in_specs,
        out_specs=pl.BlockSpec((n, TILE_N), lambda j: (0, j)),
        compiler_params=pltpu.CompilerParams(
            dimension_semantics=("parallel",),
            vmem_limit_bytes=32 * 1024 * 1024),
    )(*flat)
    return out[:, :OUT_DIM]


# ----------------------------------------------------------------------------
# Parameter init (deterministic, PyTorch-style uniform(-1/sqrt(fan_in), ...))
# Weights stored in bf16; bias / gamma / beta in f32.  fc5 padded 784 -> 1024
# with zero columns (sliced back to 784 in the wrapper).
# ----------------------------------------------------------------------------
def init_params(key, latent_dims):
    dims = [latent_dims, *HIDDEN]
    params = []
    for i in range(4):
        din, dout = dims[i], dims[i + 1]
        key, kw, kb, kg, kbe = jax.random.split(key, 5)
        bound = 1.0 / (din ** 0.5)
        w = jax.random.uniform(kw, (din, dout), jnp.float32, -bound, bound)
        b = jax.random.uniform(kb, (1, dout), jnp.float32, -bound, bound)
        gamma = 1.0 + 0.1 * jax.random.normal(kg, (1, dout), jnp.float32)
        beta = 0.1 * jax.random.normal(kbe, (1, dout), jnp.float32)
        params.append((w.astype(jnp.bfloat16), b, gamma, beta))

    key, kw, kb = jax.random.split(key, 3)
    din = dims[-1]
    bound = 1.0 / (din ** 0.5)
    w5 = jax.random.uniform(kw, (din, OUT_DIM), jnp.float32, -bound, bound)
    b5 = jax.random.uniform(kb, (1, OUT_DIM), jnp.float32, -bound, bound)
    w5 = jnp.pad(w5.astype(jnp.bfloat16), ((0, 0), (0, OUT_PAD - OUT_DIM)))
    b5 = jnp.pad(b5, ((0, 0), (0, OUT_PAD - OUT_DIM)))
    params.append((w5, b5))
    return params


# ----------------------------------------------------------------------------
# Reference (plain JAX, same dtypes/formulas) for sanity check
# ----------------------------------------------------------------------------
def reference_forward(z, params):
    h = z
    for w, b, g, be in params[:4]:
        y = jnp.dot(h.astype(jnp.bfloat16), w,
                    preferred_element_type=jnp.float32) + b
        y = jnp.maximum(y, NEG_SLOPE * y)
        mean = jnp.mean(y, axis=0, keepdims=True)
        var = jnp.maximum(jnp.mean(y * y, axis=0, keepdims=True) - mean * mean,
                          0.0)
        h = g * ((y - mean) * jax.lax.rsqrt(var + EPS)) + be
    w5, b5 = params[4]
    y = jnp.dot(h.astype(jnp.bfloat16), w5,
                preferred_element_type=jnp.float32) + b5
    return y[:, :OUT_DIM]


if __name__ == "__main__":
    latent_dims = 32
    batch = 8

    key = jax.random.PRNGKey(0)
    key_z, key_p = jax.random.split(key)
    z = jax.random.normal(key_z, (batch, latent_dims), jnp.float32)
    params = init_params(key_p, latent_dims)

    out = generator_forward(z, params)
    jax.block_until_ready(out)

    ref = reference_forward(z, params)
    assert out.shape == (batch, OUT_DIM), out.shape
    max_err = float(jnp.max(jnp.abs(out - ref)))
    assert jnp.allclose(out, ref, atol=2e-3, rtol=2e-3), max_err

    print("KERNEL_OK")
</pallas_src>

<mosaic_0001>
module attributes {stable_mosaic.version = 11 : i64} {
  func.func @_generator_kernel(%arg0: i32, %arg1: memref<8x32xf32, #tpu.memory_space<vmem>>, %arg2: memref<32x128xbf16, #tpu.memory_space<vmem>>, %arg3: memref<1x128xf32, #tpu.memory_space<vmem>>, %arg4: memref<1x128xf32, #tpu.memory_space<vmem>>, %arg5: memref<1x128xf32, #tpu.memory_space<vmem>>, %arg6: memref<128x256xbf16, #tpu.memory_space<vmem>>, %arg7: memref<1x256xf32, #tpu.memory_space<vmem>>, %arg8: memref<1x256xf32, #tpu.memory_space<vmem>>, %arg9: memref<1x256xf32, #tpu.memory_space<vmem>>, %arg10: memref<256x512xbf16, #tpu.memory_space<vmem>>, %arg11: memref<1x512xf32, #tpu.memory_space<vmem>>, %arg12: memref<1x512xf32, #tpu.memory_space<vmem>>, %arg13: memref<1x512xf32, #tpu.memory_space<vmem>>, %arg14: memref<512x1024xbf16, #tpu.memory_space<vmem>>, %arg15: memref<1x1024xf32, #tpu.memory_space<vmem>>, %arg16: memref<1x1024xf32, #tpu.memory_space<vmem>>, %arg17: memref<1x1024xf32, #tpu.memory_space<vmem>>, %arg18: memref<1024x512xbf16, #tpu.memory_space<vmem>>, %arg19: memref<1x512xf32, #tpu.memory_space<vmem>>, %arg20: memref<8x512xf32, #tpu.memory_space<vmem>>) attributes {dimension_semantics = [#tpu.dimension_semantics<parallel>], iteration_bounds = array<i64: 2>, scalar_prefetch = 0 : i64, scratch_operands = 0 : i64, tpu.core_type = #tpu.core_type<tc>, window_params = [{pipeline_mode = #tpu.pipeline_mode<synchronous>, transform_indices = @transform_0, window_bounds = array<i64: 8, 32>}, {pipeline_mode = #tpu.pipeline_mode<synchronous>, transform_indices = @transform_1, window_bounds = array<i64: 32, 128>}, {pipeline_mode = #tpu.pipeline_mode<synchronous>, transform_indices = @transform_2, window_bounds = array<i64: 1, 128>}, {pipeline_mode = #tpu.pipeline_mode<synchronous>, transform_indices = @transform_3, window_bounds = array<i64: 1, 128>}, {pipeline_mode = #tpu.pipeline_mode<synchronous>, transform_indices = @transform_4, window_bounds = array<i64: 1, 128>}, {pipeline_mode = #tpu.pipeline_mode<synchronous>, transform_indices = @transform_5, window_bounds = array<i64: 128, 256>}, {pipeline_mode = #tpu.pipeline_mode<synchronous>, transform_indices = @transform_6, window_bounds = array<i64: 1, 256>}, {pipeline_mode = #tpu.pipeline_mode<synchronous>, transform_indices = @transform_7, window_bounds = array<i64: 1, 256>}, {pipeline_mode = #tpu.pipeline_mode<synchronous>, transform_indices = @transform_8, window_bounds = array<i64: 1, 256>}, {pipeline_mode = #tpu.pipeline_mode<synchronous>, transform_indices = @transform_9, window_bounds = array<i64: 256, 512>}, {pipeline_mode = #tpu.pipeline_mode<synchronous>, transform_indices = @transform_10, window_bounds = array<i64: 1, 512>}, {pipeline_mode = #tpu.pipeline_mode<synchronous>, transform_indices = @transform_11, window_bounds = array<i64: 1, 512>}, {pipeline_mode = #tpu.pipeline_mode<synchronous>, transform_indices = @transform_12, window_bounds = array<i64: 1, 512>}, {pipeline_mode = #tpu.pipeline_mode<synchronous>, transform_indices = @transform_13, window_bounds = array<i64: 512, 1024>}, {pipeline_mode = #tpu.pipeline_mode<synchronous>, transform_indices = @transform_14, window_bounds = array<i64: 1, 1024>}, {pipeline_mode = #tpu.pipeline_mode<synchronous>, transform_indices = @transform_15, window_bounds = array<i64: 1, 1024>}, {pipeline_mode = #tpu.pipeline_mode<synchronous>, transform_indices = @transform_16, window_bounds = array<i64: 1, 1024>}, {transform_indices = @transform_17, window_bounds = array<i64: 1024, 512>}, {transform_indices = @transform_18, window_bounds = array<i64: 1, 512>}, {transform_indices = @transform_19, window_bounds = array<i64: 8, 512>}]} {
    %c0 = arith.constant 0 : index
    %c0_0 = arith.constant 0 : index
    %0 = vector.load %arg1[%c0, %c0_0] : memref<8x32xf32, #tpu.memory_space<vmem>>, vector<8x32xf32>
    %1 = arith.truncf %0 : vector<8x32xf32> to vector<8x32xbf16>
    %c0_1 = arith.constant 0 : index
    %c0_2 = arith.constant 0 : index
    %2 = vector.load %arg2[%c0_1, %c0_2] : memref<32x128xbf16, #tpu.memory_space<vmem>>, vector<32x128xbf16>
    %cst = arith.constant dense<0.000000e+00> : vector<8x128xf32>
    %3 = tpu.matmul %1, %2, %cst {dimension_numbers = #tpu.dot_dimension_numbers<[1], [0], [0], [1], [0, 0, 1, 1], [], []>} : vector<8x32xbf16>, vector<32x128xbf16>, vector<8x128xf32> -> vector<8x128xf32>
    %c0_3 = arith.constant 0 : index
    %c0_4 = arith.constant 0 : index
    %4 = vector.load %arg3[%c0_3, %c0_4] : memref<1x128xf32, #tpu.memory_space<vmem>>, vector<1x128xf32>
    %5 = vector.broadcast %4 : vector<1x128xf32> to vector<8x128xf32>
    %6 = arith.addf %3, %5 : vector<8x128xf32>
    %cst_5 = arith.constant 2.000000e-01 : f32
    %7 = vector.broadcast %cst_5 : f32 to vector<8x128xf32>
    %8 = arith.mulf %7, %6 : vector<8x128xf32>
    %9 = arith.maximumf %6, %8 : vector<8x128xf32>
    %cst_6 = arith.constant dense<0.000000e+00> : vector<128xf32>
    %10 = vector.multi_reduction <add>, %9, %cst_6 [0] : vector<8x128xf32> to vector<128xf32>
    %11 = vector.shape_cast %10 : vector<128xf32> to vector<1x128xf32>
    %cst_7 = arith.constant 1.250000e-01 : f32
    %12 = vector.broadcast %cst_7 : f32 to vector<1x128xf32>
    %13 = arith.mulf %11, %12 : vector<1x128xf32>
    %14 = arith.mulf %9, %9 : vector<8x128xf32>
    %cst_8 = arith.constant dense<0.000000e+00> : vector<128xf32>
    %15 = vector.multi_reduction <add>, %14, %cst_8 [0] : vector<8x128xf32> to vector<128xf32>
    %16 = vector.shape_cast %15 : vector<128xf32> to vector<1x128xf32>
    %cst_9 = arith.constant 1.250000e-01 : f32
    %17 = vector.broadcast %cst_9 : f32 to vector<1x128xf32>
    %18 = arith.mulf %16, %17 : vector<1x128xf32>
    %19 = arith.mulf %13, %13 : vector<1x128xf32>
    %20 = arith.subf %18, %19 : vector<1x128xf32>
    %cst_10 = arith.constant 0.000000e+00 : f32
    %21 = vector.broadcast %cst_10 : f32 to vector<1x128xf32>
    %22 = arith.maximumf %20, %21 : vector<1x128xf32>
    %cst_11 = arith.constant 9.99999974E-6 : f32
    %23 = vector.broadcast %cst_11 : f32 to vector<1x128xf32>
    %24 = arith.addf %22, %23 : vector<1x128xf32>
    %25 = math.rsqrt %24 : vector<1x128xf32>
    %c0_12 = arith.constant 0 : index
    %c0_13 = arith.constant 0 : index
    %26 = vector.load %arg4[%c0_12, %c0_13] : memref<1x128xf32, #tpu.memory_space<vmem>>, vector<1x128xf32>
    %27 = arith.mulf %26, %25 : vector<1x128xf32>
    %c0_14 = arith.constant 0 : index
    %c0_15 = arith.constant 0 : index
    %28 = vector.load %arg5[%c0_14, %c0_15] : memref<1x128xf32, #tpu.memory_space<vmem>>, vector<1x128xf32>
    %29 = arith.mulf %13, %27 : vector<1x128xf32>
    %30 = arith.subf %28, %29 : vector<1x128xf32>
    %31 = vector.broadcast %27 : vector<1x128xf32> to vector<8x128xf32>
    %32 = arith.mulf %9, %31 : vector<8x128xf32>
    %33 = vector.broadcast %30 : vector<1x128xf32> to vector<8x128xf32>
    %34 = arith.addf %32, %33 : vector<8x128xf32>
    %35 = arith.truncf %34 : vector<8x128xf32> to vector<8x128xbf16>
    %c0_16 = arith.constant 0 : index
    %c0_17 = arith.constant 0 : index
    %36 = vector.load %arg6[%c0_16, %c0_17] : memref<128x256xbf16, #tpu.memory_space<vmem>>, vector<128x256xbf16>
    %cst_18 = arith.constant dense<0.000000e+00> : vector<8x256xf32>
    %37 = tpu.matmul %35, %36, %cst_18 {dimension_numbers = #tpu.dot_dimension_numbers<[1], [0], [0], [1], [0, 0, 1, 1], [], []>} : vector<8x128xbf16>, vector<128x256xbf16>, vector<8x256xf32> -> vector<8x256xf32>
    %c0_19 = arith.constant 0 : index
    %c0_20 = arith.constant 0 : index
    %38 = vector.load %arg7[%c0_19, %c0_20] : memref<1x256xf32, #tpu.memory_space<vmem>>, vector<1x256xf32>
    %39 = vector.broadcast %38 : vector<1x256xf32> to vector<8x256xf32>
    %40 = arith.addf %37, %39 : vector<8x256xf32>
    %cst_21 = arith.constant 2.000000e-01 : f32
    %41 = vector.broadcast %cst_21 : f32 to vector<8x256xf32>
    %42 = arith.mulf %41, %40 : vector<8x256xf32>
    %43 = arith.maximumf %40, %42 : vector<8x256xf32>
    %cst_22 = arith.constant dense<0.000000e+00> : vector<256xf32>
    %44 = vector.multi_reduction <add>, %43, %cst_22 [0] : vector<8x256xf32> to vector<256xf32>
    %45 = vector.shape_cast %44 : vector<256xf32> to vector<1x256xf32>
    %cst_23 = arith.constant 1.250000e-01 : f32
    %46 = vector.broadcast %cst_23 : f32 to vector<1x256xf32>
    %47 = arith.mulf %45, %46 : vector<1x256xf32>
    %48 = arith.mulf %43, %43 : vector<8x256xf32>
    %cst_24 = arith.constant dense<0.000000e+00> : vector<256xf32>
    %49 = vector.multi_reduction <add>, %48, %cst_24 [0] : vector<8x256xf32> to vector<256xf32>
    %50 = vector.shape_cast %49 : vector<256xf32> to vector<1x256xf32>
    %cst_25 = arith.constant 1.250000e-01 : f32
    %51 = vector.broadcast %cst_25 : f32 to vector<1x256xf32>
    %52 = arith.mulf %50, %51 : vector<1x256xf32>
    %53 = arith.mulf %47, %47 : vector<1x256xf32>
    %54 = arith.subf %52, %53 : vector<1x256xf32>
    %cst_26 = arith.constant 0.000000e+00 : f32
    %55 = vector.broadcast %cst_26 : f32 to vector<1x256xf32>
    %56 = arith.maximumf %54, %55 : vector<1x256xf32>
    %cst_27 = arith.constant 9.99999974E-6 : f32
    %57 = vector.broadcast %cst_27 : f32 to vector<1x256xf32>
    %58 = arith.addf %56, %57 : vector<1x256xf32>
    %59 = math.rsqrt %58 : vector<1x256xf32>
    %c0_28 = arith.constant 0 : index
    %c0_29 = arith.constant 0 : index
    %60 = vector.load %arg8[%c0_28, %c0_29] : memref<1x256xf32, #tpu.memory_space<vmem>>, vector<1x256xf32>
    %61 = arith.mulf %60, %59 : vector<1x256xf32>
    %c0_30 = arith.constant 0 : index
    %c0_31 = arith.constant 0 : index
    %62 = vector.load %arg9[%c0_30, %c0_31] : memref<1x256xf32, #tpu.memory_space<vmem>>, vector<1x256xf32>
    %63 = arith.mulf %47, %61 : vector<1x256xf32>
    %64 = arith.subf %62, %63 : vector<1x256xf32>
    %65 = vector.broadcast %61 : vector<1x256xf32> to vector<8x256xf32>
    %66 = arith.mulf %43, %65 : vector<8x256xf32>
    %67 = vector.broadcast %64 : vector<1x256xf32> to vector<8x256xf32>
    %68 = arith.addf %66, %67 : vector<8x256xf32>
    %69 = arith.truncf %68 : vector<8x256xf32> to vector<8x256xbf16>
    %c0_32 = arith.constant 0 : index
    %c0_33 = arith.constant 0 : index
    %70 = vector.load %arg10[%c0_32, %c0_33] : memref<256x512xbf16, #tpu.memory_space<vmem>>, vector<256x512xbf16>
    %cst_34 = arith.constant dense<0.000000e+00> : vector<8x512xf32>
    %71 = tpu.matmul %69, %70, %cst_34 {dimension_numbers = #tpu.dot_dimension_numbers<[1], [0], [0], [1], [0, 0, 1, 1], [], []>} : vector<8x256xbf16>, vector<256x512xbf16>, vector<8x512xf32> -> vector<8x512xf32>
    %c0_35 = arith.constant 0 : index
    %c0_36 = arith.constant 0 : index
    %72 = vector.load %arg11[%c0_35, %c0_36] : memref<1x512xf32, #tpu.memory_space<vmem>>, vector<1x512xf32>
    %73 = vector.broadcast %72 : vector<1x512xf32> to vector<8x512xf32>
    %74 = arith.addf %71, %73 : vector<8x512xf32>
    %cst_37 = arith.constant 2.000000e-01 : f32
    %75 = vector.broadcast %cst_37 : f32 to vector<8x512xf32>
    %76 = arith.mulf %75, %74 : vector<8x512xf32>
    %77 = arith.maximumf %74, %76 : vector<8x512xf32>
    %cst_38 = arith.constant dense<0.000000e+00> : vector<512xf32>
    %78 = vector.multi_reduction <add>, %77, %cst_38 [0] : vector<8x512xf32> to vector<512xf32>
    %79 = vector.shape_cast %78 : vector<512xf32> to vector<1x512xf32>
    %cst_39 = arith.constant 1.250000e-01 : f32
    %80 = vector.broadcast %cst_39 : f32 to vector<1x512xf32>
    %81 = arith.mulf %79, %80 : vector<1x512xf32>
    %82 = arith.mulf %77, %77 : vector<8x512xf32>
    %cst_40 = arith.constant dense<0.000000e+00> : vector<512xf32>
    %83 = vector.multi_reduction <add>, %82, %cst_40 [0] : vector<8x512xf32> to vector<512xf32>
    %84 = vector.shape_cast %83 : vector<512xf32> to vector<1x512xf32>
    %cst_41 = arith.constant 1.250000e-01 : f32
    %85 = vector.broadcast %cst_41 : f32 to vector<1x512xf32>
    %86 = arith.mulf %84, %85 : vector<1x512xf32>
    %87 = arith.mulf %81, %81 : vector<1x512xf32>
    %88 = arith.subf %86, %87 : vector<1x512xf32>
    %cst_42 = arith.constant 0.000000e+00 : f32
    %89 = vector.broadcast %cst_42 : f32 to vector<1x512xf32>
    %90 = arith.maximumf %88, %89 : vector<1x512xf32>
    %cst_43 = arith.constant 9.99999974E-6 : f32
    %91 = vector.broadcast %cst_43 : f32 to vector<1x512xf32>
    %92 = arith.addf %90, %91 : vector<1x512xf32>
    %93 = math.rsqrt %92 : vector<1x512xf32>
    %c0_44 = arith.constant 0 : index
    %c0_45 = arith.constant 0 : index
    %94 = vector.load %arg12[%c0_44, %c0_45] : memref<1x512xf32, #tpu.memory_space<vmem>>, vector<1x512xf32>
    %95 = arith.mulf %94, %93 : vector<1x512xf32>
    %c0_46 = arith.constant 0 : index
    %c0_47 = arith.constant 0 : index
    %96 = vector.load %arg13[%c0_46, %c0_47] : memref<1x512xf32, #tpu.memory_space<vmem>>, vector<1x512xf32>
    %97 = arith.mulf %81, %95 : vector<1x512xf32>
    %98 = arith.subf %96, %97 : vector<1x512xf32>
    %99 = vector.broadcast %95 : vector<1x512xf32> to vector<8x512xf32>
    %100 = arith.mulf %77, %99 : vector<8x512xf32>
    %101 = vector.broadcast %98 : vector<1x512xf32> to vector<8x512xf32>
    %102 = arith.addf %100, %101 : vector<8x512xf32>
    %103 = arith.truncf %102 : vector<8x512xf32> to vector<8x512xbf16>
    %c0_48 = arith.constant 0 : index
    %c0_49 = arith.constant 0 : index
    %104 = vector.load %arg14[%c0_48, %c0_49] : memref<512x1024xbf16, #tpu.memory_space<vmem>>, vector<512x1024xbf16>
    %cst_50 = arith.constant dense<0.000000e+00> : vector<8x1024xf32>
    %105 = tpu.matmul %103, %104, %cst_50 {dimension_numbers = #tpu.dot_dimension_numbers<[1], [0], [0], [1], [0, 0, 1, 1], [], []>} : vector<8x512xbf16>, vector<512x1024xbf16>, vector<8x1024xf32> -> vector<8x1024xf32>
    %c0_51 = arith.constant 0 : index
    %c0_52 = arith.constant 0 : index
    %106 = vector.load %arg15[%c0_51, %c0_52] : memref<1x1024xf32, #tpu.memory_space<vmem>>, vector<1x1024xf32>
    %107 = vector.broadcast %106 : vector<1x1024xf32> to vector<8x1024xf32>
    %108 = arith.addf %105, %107 : vector<8x1024xf32>
    %cst_53 = arith.constant 2.000000e-01 : f32
    %109 = vector.broadcast %cst_53 : f32 to vector<8x1024xf32>
    %110 = arith.mulf %109, %108 : vector<8x1024xf32>
    %111 = arith.maximumf %108, %110 : vector<8x1024xf32>
    %cst_54 = arith.constant dense<0.000000e+00> : vector<1024xf32>
    %112 = vector.multi_reduction <add>, %111, %cst_54 [0] : vector<8x1024xf32> to vector<1024xf32>
    %113 = vector.shape_cast %112 : vector<1024xf32> to vector<1x1024xf32>
    %cst_55 = arith.constant 1.250000e-01 : f32
    %114 = vector.broadcast %cst_55 : f32 to vector<1x1024xf32>
    %115 = arith.mulf %113, %114 : vector<1x1024xf32>
    %116 = arith.mulf %111, %111 : vector<8x1024xf32>
    %cst_56 = arith.constant dense<0.000000e+00> : vector<1024xf32>
    %117 = vector.multi_reduction <add>, %116, %cst_56 [0] : vector<8x1024xf32> to vector<1024xf32>
    %118 = vector.shape_cast %117 : vector<1024xf32> to vector<1x1024xf32>
    %cst_57 = arith.constant 1.250000e-01 : f32
    %119 = vector.broadcast %cst_57 : f32 to vector<1x1024xf32>
    %120 = arith.mulf %118, %119 : vector<1x1024xf32>
    %121 = arith.mulf %115, %115 : vector<1x1024xf32>
    %122 = arith.subf %120, %121 : vector<1x1024xf32>
    %cst_58 = arith.constant 0.000000e+00 : f32
    %123 = vector.broadcast %cst_58 : f32 to vector<1x1024xf32>
    %124 = arith.maximumf %122, %123 : vector<1x1024xf32>
    %cst_59 = arith.constant 9.99999974E-6 : f32
    %125 = vector.broadcast %cst_59 : f32 to vector<1x1024xf32>
    %126 = arith.addf %124, %125 : vector<1x1024xf32>
    %127 = math.rsqrt %126 : vector<1x1024xf32>
    %c0_60 = arith.constant 0 : index
    %c0_61 = arith.constant 0 : index
    %128 = vector.load %arg16[%c0_60, %c0_61] : memref<1x1024xf32, #tpu.memory_space<vmem>>, vector<1x1024xf32>
    %129 = arith.mulf %128, %127 : vector<1x1024xf32>
    %c0_62 = arith.constant 0 : index
    %c0_63 = arith.constant 0 : index
    %130 = vector.load %arg17[%c0_62, %c0_63] : memref<1x1024xf32, #tpu.memory_space<vmem>>, vector<1x1024xf32>
    %131 = arith.mulf %115, %129 : vector<1x1024xf32>
    %132 = arith.subf %130, %131 : vector<1x1024xf32>
    %133 = vector.broadcast %129 : vector<1x1024xf32> to vector<8x1024xf32>
    %134 = arith.mulf %111, %133 : vector<8x1024xf32>
    %135 = vector.broadcast %132 : vector<1x1024xf32> to vector<8x1024xf32>
    %136 = arith.addf %134, %135 : vector<8x1024xf32>
    %137 = arith.truncf %136 : vector<8x1024xf32> to vector<8x1024xbf16>
    %c0_64 = arith.constant 0 : index
    %c0_65 = arith.constant 0 : index
    %138 = vector.load %arg18[%c0_64, %c0_65] : memref<1024x512xbf16, #tpu.memory_space<vmem>>, vector<1024x512xbf16>
    %cst_66 = arith.constant dense<0.000000e+00> : vector<8x512xf32>
    %139 = tpu.matmul %137, %138, %cst_66 {dimension_numbers = #tpu.dot_dimension_numbers<[1], [0], [0], [1], [0, 0, 1, 1], [], []>} : vector<8x1024xbf16>, vector<1024x512xbf16>, vector<8x512xf32> -> vector<8x512xf32>
    %c0_67 = arith.constant 0 : index
    %c0_68 = arith.constant 0 : index
    %140 = vector.load %arg19[%c0_67, %c0_68] : memref<1x512xf32, #tpu.memory_space<vmem>>, vector<1x512xf32>
    %141 = vector.broadcast %140 : vector<1x512xf32> to vector<8x512xf32>
    %142 = arith.addf %139, %141 : vector<8x512xf32>
    %c0_69 = arith.constant 0 : index
    %c0_70 = arith.constant 0 : index
    %143 = vector.load %arg20[%c0_69, %c0_70] : memref<8x512xf32, #tpu.memory_space<vmem>>, vector<8x512xf32>
    tpu.vector_store %arg20[%c0_69, %c0_70], %142 {strides = array<i32>} : memref<8x512xf32, #tpu.memory_space<vmem>>, vector<8x512xf32>,
    return
  }
  func.func @transform_0(%arg0: i32) -> (i32, i32) {
    %c0_i32 = arith.constant 0 : i32
    %c0_i32_0 = arith.constant 0 : i32
    %c0_i32_1 = arith.constant 0 : i32
    return %c0_i32, %c0_i32_0 : i32, i32
  }
  func.func @transform_1(%arg0: i32) -> (i32, i32) {
    %c0_i32 = arith.constant 0 : i32
    %c0_i32_0 = arith.constant 0 : i32
    %c0_i32_1 = arith.constant 0 : i32
    return %c0_i32, %c0_i32_0 : i32, i32
  }
  func.func @transform_2(%arg0: i32) -> (i32, i32) {
    %c0_i32 = arith.constant 0 : i32
    %c0_i32_0 = arith.constant 0 : i32
    %c0_i32_1 = arith.constant 0 : i32
    return %c0_i32, %c0_i32_0 : i32, i32
  }
  func.func @transform_3(%arg0: i32) -> (i32, i32) {
    %c0_i32 = arith.constant 0 : i32
    %c0_i32_0 = arith.constant 0 : i32
    %c0_i32_1 = arith.constant 0 : i32
    return %c0_i32, %c0_i32_0 : i32, i32
  }
  func.func @transform_4(%arg0: i32) -> (i32, i32) {
    %c0_i32 = arith.constant 0 : i32
    %c0_i32_0 = arith.constant 0 : i32
    %c0_i32_1 = arith.constant 0 : i32
    return %c0_i32, %c0_i32_0 : i32, i32
  }
  func.func @transform_5(%arg0: i32) -> (i32, i32) {
    %c0_i32 = arith.constant 0 : i32
    %c0_i32_0 = arith.constant 0 : i32
    %c0_i32_1 = arith.constant 0 : i32
    return %c0_i32, %c0_i32_0 : i32, i32
  }
  func.func @transform_6(%arg0: i32) -> (i32, i32) {
    %c0_i32 = arith.constant 0 : i32
    %c0_i32_0 = arith.constant 0 : i32
    %c0_i32_1 = arith.constant 0 : i32
    return %c0_i32, %c0_i32_0 : i32, i32
  }
  func.func @transform_7(%arg0: i32) -> (i32, i32) {
    %c0_i32 = arith.constant 0 : i32
    %c0_i32_0 = arith.constant 0 : i32
    %c0_i32_1 = arith.constant 0 : i32
    return %c0_i32, %c0_i32_0 : i32, i32
  }
  func.func @transform_8(%arg0: i32) -> (i32, i32) {
    %c0_i32 = arith.constant 0 : i32
    %c0_i32_0 = arith.constant 0 : i32
    %c0_i32_1 = arith.constant 0 : i32
    return %c0_i32, %c0_i32_0 : i32, i32
  }
  func.func @transform_9(%arg0: i32) -> (i32, i32) {
    %c0_i32 = arith.constant 0 : i32
    %c0_i32_0 = arith.constant 0 : i32
    %c0_i32_1 = arith.constant 0 : i32
    return %c0_i32, %c0_i32_0 : i32, i32
  }
  func.func @transform_10(%arg0: i32) -> (i32, i32) {
    %c0_i32 = arith.constant 0 : i32
    %c0_i32_0 = arith.constant 0 : i32
    %c0_i32_1 = arith.constant 0 : i32
    return %c0_i32, %c0_i32_0 : i32, i32
  }
  func.func @transform_11(%arg0: i32) -> (i32, i32) {
    %c0_i32 = arith.constant 0 : i32
    %c0_i32_0 = arith.constant 0 : i32
    %c0_i32_1 = arith.constant 0 : i32
    return %c0_i32, %c0_i32_0 : i32, i32
  }
  func.func @transform_12(%arg0: i32) -> (i32, i32) {
    %c0_i32 = arith.constant 0 : i32
    %c0_i32_0 = arith.constant 0 : i32
    %c0_i32_1 = arith.constant 0 : i32
    return %c0_i32, %c0_i32_0 : i32, i32
  }
  func.func @transform_13(%arg0: i32) -> (i32, i32) {
    %c0_i32 = arith.constant 0 : i32
    %c0_i32_0 = arith.constant 0 : i32
    %c0_i32_1 = arith.constant 0 : i32
    return %c0_i32, %c0_i32_0 : i32, i32
  }
  func.func @transform_14(%arg0: i32) -> (i32, i32) {
    %c0_i32 = arith.constant 0 : i32
    %c0_i32_0 = arith.constant 0 : i32
    %c0_i32_1 = arith.constant 0 : i32
    return %c0_i32, %c0_i32_0 : i32, i32
  }
  func.func @transform_15(%arg0: i32) -> (i32, i32) {
    %c0_i32 = arith.constant 0 : i32
    %c0_i32_0 = arith.constant 0 : i32
    %c0_i32_1 = arith.constant 0 : i32
    return %c0_i32, %c0_i32_0 : i32, i32
  }
  func.func @transform_16(%arg0: i32) -> (i32, i32) {
    %c0_i32 = arith.constant 0 : i32
    %c0_i32_0 = arith.constant 0 : i32
    %c0_i32_1 = arith.constant 0 : i32
    return %c0_i32, %c0_i32_0 : i32, i32
  }
  func.func @transform_17(%arg0: i32) -> (i32, i32) {
    %c0_i32 = arith.constant 0 : i32
    %c0_i32_0 = arith.constant 0 : i32
    return %c0_i32, %arg0 : i32, i32
  }
  func.func @transform_18(%arg0: i32) -> (i32, i32) {
    %c0_i32 = arith.constant 0 : i32
    %c0_i32_0 = arith.constant 0 : i32
    return %c0_i32, %arg0 : i32, i32
  }
  func.func @transform_19(%arg0: i32) -> (i32, i32) {
    %c0_i32 = arith.constant 0 : i32
    %c0_i32_0 = arith.constant 0 : i32
    return %c0_i32, %arg0 : i32, i32
  }
}

</mosaic_0001>

<bundles_post_ra>
// kernel: generator_forward.1
= control target key start
LH: loop header
LB: loop body
LE: loop exit
PB: predicated region body
PF: predicated region fallthrough
CT: control target
= control target key end

     0   :  { %s9708_s0 = inlined_call_operand.hbm [shape: f32[8,32], index: 0, kind: input, shape index: {}]   ;;  %s9709_s1 = inlined_call_operand.hbm [shape: bf16[32,128], index: 1, kind: input, shape index: {}]   ;;  %s9710_s2 = inlined_call_operand.hbm [shape: f32[1,128], index: 2, kind: input, shape index: {}]   ;;  %s9711_s3 = inlined_call_operand.hbm [shape: f32[1,128], index: 3, kind: input, shape index: {}]   ;;  %s9712_s4 = inlined_call_operand.hbm [shape: f32[1,128], index: 4, kind: input, shape index: {}]   ;;  %s9713_s5 = inlined_call_operand.hbm [shape: bf16[128,256], index: 5, kind: input, shape index: {}]   ;;  %s9714_s6 = inlined_call_operand.hbm [shape: f32[1,256], index: 6, kind: input, shape index: {}]   ;;  %s9715_s7 = inlined_call_operand.hbm [shape: f32[1,256], index: 7, kind: input, shape index: {}]   ;;  %s9716_s8 = inlined_call_operand.hbm [shape: f32[1,256], index: 8, kind: input, shape index: {}]   ;;  %s9717_s9 = inlined_call_operand.hbm [shape: bf16[256,512], index: 9, kind: input, shape index: {}]   ;;  %s9718_s10 = inlined_call_operand.hbm [shape: f32[1,512], index: 10, kind: input, shape index: {}]   ;;  %s9719_s11 = inlined_call_operand.hbm [shape: f32[1,512], index: 11, kind: input, shape index: {}]   ;;  %s9720_s12 = inlined_call_operand.hbm [shape: f32[1,512], index: 12, kind: input, shape index: {}]   ;;  %s9721_s13 = inlined_call_operand.hbm [shape: bf16[512,1024], index: 13, kind: input, shape index: {}]   ;;  %s9722_s14 = inlined_call_operand.hbm [shape: f32[1,1024], index: 14, kind: input, shape index: {}]   ;;  %s9723_s15 = inlined_call_operand.hbm [shape: f32[1,1024], index: 15, kind: input, shape index: {}]   ;;  %s9724_s16 = inlined_call_operand.hbm [shape: f32[1,1024], index: 16, kind: input, shape index: {}]   ;;  %s9725_s17 = inlined_call_operand.hbm [shape: bf16[1024,1024], index: 17, kind: input, shape index: {}]   ;;  %s9726_s18 = inlined_call_operand.hbm [shape: f32[1,1024], index: 18, kind: input, shape index: {}]   ;;  %s9727_s19 = inlined_call_operand.vmem [shape: f32[8,1024], index: 19, kind: output, shape index: {}]  }
   0x1   :  { %9754 = sst [smem:[#allocation42_spill]] %s9708_s0 }
   0x2   :  { %9755 = sst [smem:[#allocation43_spill]] %s9709_s1 }
   0x3   :  { %9756 = sst [smem:[#allocation44_spill]] %s9710_s2 }
   0x4   :  { %9757 = sst [smem:[#allocation45_spill]] %s9711_s3 }
   0x5   :  { %9758 = sst [smem:[#allocation46_spill]] %s9712_s4 }
   0x6   :  { %9759 = sst [smem:[#allocation47_spill]] %s9713_s5 }
   0x7   :  { %9760 = sst [smem:[#allocation48_spill]] %s9714_s6 }
   0x8   :  { %9761 = sst [smem:[#allocation49_spill]] %s9715_s7 }
   0x9   :  { %9762 = sst [smem:[#allocation50_spill]] %s9716_s8 }
   0xa   :  { %9763 = sst [smem:[#allocation51_spill]] %s9717_s9 }
   0xb   :  { %9764 = sst [smem:[#allocation52_spill]] %s9718_s10 }
   0xc   :  { %9765 = sst [smem:[#allocation53_spill]] %s9719_s11 }
   0xd   :  { %9766 = sst [smem:[#allocation54_spill]] %s9720_s12 }
   0xe   :  { %9767 = sst [smem:[#allocation55_spill]] %s9721_s13 }
   0xf   :  { %9768 = sst [smem:[#allocation56_spill]] %s9722_s14 }
  0x10   :  { %9769 = sst [smem:[#allocation57_spill]] %s9723_s15 }
  0x11   :  { %9770 = sst [smem:[#allocation58_spill]] %s9724_s16 }
  0x12   :  { %9771 = sst [smem:[#allocation59_spill]] %s9726_s18 }
  0x13   :  { %9772 = sst [smem:[#allocation60_spill]] %s9727_s19 }
  0x14   :  { %24 = vsyncpa [#allocation3], 0 }
  0x15   :  { %25 = vsyncpa [#allocation5], 0 }
  0x16   :  { %26 = vsyncpa [#allocation8], 0 }
  0x17   :  { %27 = vsyncpa [#allocation11], 0 }
  0x18   :  { %28 = vsyncpa [#allocation14], 0 }
  0x19   :  { %29 = vsyncpa [#allocation17], 0 }
  0x1a   :  { %30 = vsyncpa [#allocation20], 0 }
  0x1b   :  { %31 = vsyncpa [#allocation23], 0 }
  0x1c   :  { %32 = vsyncpa [#allocation26], 0 }
  0x1d   :  { %33 = vsyncpa [#allocation29], 0 }
  0x1e   :  { %35 = vsyncpa [#allocation29 + $0x1], 0  ;;  %s8624_s0 = smov 0   ;;  %s8626_s30 = smov 0  }
  0x1f   :  { %s8628_s20 = smov 0   ;;  %s8630_s21 = smov 0  }
  0x20 LB: > { %s8493_s1 = smov [#allocation4]   ;;  %s8645_s2 = sadd.s32 4294967295, %s8491_s21   ;;  %s8491_s21 = sphi %s8630_s21, %s9831_s21   ;;  %s8487_s20 = sphi %s8628_s20, %s9830_s20   ;;  %s8483_s30 = sphi %s8626_s30, %s9829_s30   ;;  %s8479_s0 = sphi %s8624_s0, %s9828_s0  }
  0x21   : > { %s504_s22 = sshll.u32 %s8493_s1, 4  ;;  %p6412_p0 = scmp.ge.s32.totalorder %s8491_s21, 1  ;;  %s8650_s22 = int_to_ptr.vmem [resolvable:$true] %s504_s22 }
  0x22   : > { %p9742_p1 = scmp.eq.s32.totalorder %s8645_s2, 0  ;;  %p481_p2 = scmp.lt.s32.totalorder %s8491_s21, 3 }
  0x23   : > { %s8494_s24 = smov [#allocation7]   ;;  %s8495_s26 = smov [#allocation10]  }
  0x24   : > { %p8652_p3 = pnand %p6412_p0, %p481_p2  ;;  %s529_s25 = sshll.u32 %s8494_s24, 4  ;;  %s8664_s25 = int_to_ptr.vmem [resolvable:$true] %s529_s25 }
  0x25   : > { %s550_s27 = sshll.u32 %s8495_s26, 4  ;;  %s9776_s1 = sld [smem:[#allocation43_spill]]  ;;  %s8666_s27 = int_to_ptr.vmem [resolvable:$true] %s550_s27 }
  0x26   : > { %s9773_s23 = scalar_select %p8652_p3, 1, 0 }
  0x27   : > { %p7194_p4 = pneg %p8652_p3 }
  0x28   : > { %9774 = sst [smem:[#allocation41_spill]] %s9773_s23 }
  0x29   : > { %p8660_p5 = pnand %p7194_p4, %p9742_p1 }
  0x2b   : > { %s9775_s3 = scalar_select %p8660_p5, 1, 0 }
  0x2c   : > { %s7885_s19 = scalar_lea.hbm %s9776_s1, 256  ;;  %p8676_p7 = pneg %p8660_p5 }
  0x2d   : > { %p7886_p6 = scmp.ne.s32.totalorder %s9776_s1, %s7885_s19  ;;  %p7892_p10 = scmp.lt.u32.totalorder %s7885_s19, %s9776_s1 }
  0x2f   : > { %p7888_p8 = pnand %p8676_p7, %p7886_p6 }
  0x31   : > { %p7889_p9 = pneg %p7888_p8 }
  0x33   : > { %p7894_p11 = pnand %p7892_p10, %p7889_p9 }
  0x35   : > { %7897 = shalt.err (!%p7894_p11)
}
  0x36   : > { %s7898_s18 = scalar_lea.vmem %s8650_s22, 256  ;;  %p7906_p2 = scmp.lt.s32.totalorder %s8650_s22, %s8650_s22 }
  0x37   : > { %p7899_p12 = scmp.ne.s32.totalorder %s8650_s22, %s7898_s18  ;;  %p7907_p4 = scmp.lt.s32.totalorder %s7898_s18, %s7898_s18 }
  0x39   : > { %p7901_p13 = pnand %p7899_p12, %p8676_p7  ;;  %p7908_p6 = por %p7907_p4, %p7906_p2 }
  0x3b   : > { %p7902_p0 = pneg %p7901_p13 }
  0x3d   : > { %p7909_p8 = pnand %p7908_p6, %p7902_p0 }
  0x3f   : > { %7912 = shalt.err (!%p7909_p8)
}
  0x40   : > { %s8496_s23 = smov 64   ;;  %s8497_s16 = smov 4  }
  0x41   : > { %7200 = dma.hbm_to_vmem [thread:$0]  (!%p8660_p5), %s9776_s1, 256, %s8650_s22, [#allocation5], %s8496_s23, %s8496_s23, %s8497_s16  }
  0x42   : > { %s9778_s14 = sld [smem:[#allocation45_spill]] }
  0x48   : > { %s7913_s12 = scalar_lea.hbm %s9778_s14, 16 }
  0x49   : > { %p7914_p9 = scmp.ne.s32.totalorder %s9778_s14, %s7913_s12  ;;  %p7920_p12 = scmp.lt.u32.totalorder %s7913_s12, %s9778_s14 }
  0x4b   : > { %p7916_p10 = pnand %p7914_p9, %p8676_p7 }
  0x4d   : > { %p7917_p11 = pneg %p7916_p10 }
  0x4f   : > { %p7922_p13 = pnand %p7920_p12, %p7917_p11 }
  0x51   : > { %7925 = shalt.err (!%p7922_p13)
}
  0x52   : > { %s7926_s22 = scalar_lea.vmem %s8664_s25, 16  ;;  %s7933_s8 = scalar_lea.vmem %s8664_s25, 32 }
  0x53   : > { %p7927_p0 = scmp.ne.s32.totalorder %s8664_s25, %s7926_s22  ;;  %p7934_p6 = scmp.lt.s32.totalorder %s8664_s25, %s8664_s25 }
  0x54   : > { %p7935_p8 = scmp.lt.s32.totalorder %s7933_s8, %s7926_s22 }
  0x55   : > { %p7929_p2 = pnand %p7927_p0, %p8676_p7 }
  0x56   : > { %p7936_p9 = por %p7935_p8, %p7934_p6 }
  0x57   : > { %p7930_p4 = pneg %p7929_p2 }
  0x59   : > { %p7937_p10 = pnand %p7936_p9, %p7930_p4 }
  0x5b   : > { %7940 = shalt.err (!%p7937_p10)
}
  0x5c   : > { %7206 = dma.hbm_to_vmem [thread:$0]  (!%p8660_p5), %s9778_s14, 16, %s8664_s25, [#allocation8]  }
  0x5d   : > { %s9779_s5 = sld [smem:[#allocation47_spill]] }
  0x63   : > { %s7941_s16 = scalar_lea.hbm %s9779_s5, 2048 }
  0x64   : > { %p7942_p11 = scmp.ne.s32.totalorder %s9779_s5, %s7941_s16  ;;  %p7948_p0 = scmp.lt.u32.totalorder %s7941_s16, %s9779_s5 }
  0x66   : > { %p7944_p12 = pnand %p7942_p11, %p8676_p7 }
  0x68   : > { %p7945_p13 = pneg %p7944_p12 }
  0x6a   : > { %p7950_p2 = pnand %p7948_p0, %p7945_p13 }
  0x6c   : > { %7953 = shalt.err (!%p7950_p2)
}
  0x6d   : > { %s7954_s25 = scalar_lea.vmem %s8666_s27, 2048  ;;  %p7962_p9 = scmp.lt.s32.totalorder %s8666_s27, %s8666_s27 }
  0x6e   : > { %p7955_p4 = scmp.ne.s32.totalorder %s8666_s27, %s7954_s25  ;;  %p7963_p10 = scmp.lt.s32.totalorder %s7954_s25, %s7954_s25 }
  0x70   : > { %p7957_p6 = pnand %p7955_p4, %p8676_p7  ;;  %p7964_p11 = por %p7963_p10, %p7962_p9 }
  0x72   : > { %p7958_p8 = pneg %p7957_p6 }
  0x74   : > { %p7965_p12 = pnand %p7964_p11, %p7958_p8 }
  0x76   : > { %7968 = shalt.err (!%p7965_p12)
}
  0x77   : > { %s8498_s18 = smov 128   ;;  %s8499_s22 = smov 8  }
  0x78   : > { %7212 = dma.hbm_to_vmem [thread:$0]  (!%p8660_p5), %s9779_s5, 2048, %s8666_s27, [#allocation11], %s8498_s18, %s8498_s18, %s8499_s22  }
  0x79   : > { %s8500_s10 = smov [#allocation13]   ;;  %s8501_s23 = smov [#allocation16]  }
  0x7a   : > { %s575_s12 = sshll.u32 %s8500_s10, 4  ;;  %s596_s16 = sshll.u32 %s8501_s23, 4  ;;  %s576_s12 = int_to_ptr.vmem [resolvable:$true] %s575_s12  ;;  %s597_s16 = int_to_ptr.vmem [resolvable:$true] %s596_s16 }
  0x7b   : > { %s9780_s7 = sld [smem:[#allocation49_spill]] }
  0x81   : > { %s7969_s29 = scalar_lea.hbm %s9780_s7, 32 }
  0x82   : > { %p7970_p13 = scmp.ne.s32.totalorder %s9780_s7, %s7969_s29  ;;  %p7976_p4 = scmp.lt.u32.totalorder %s7969_s29, %s9780_s7 }
  0x84   : > { %p7972_p0 = pnand %p7970_p13, %p8676_p7 }
  0x86   : > { %p7973_p2 = pneg %p7972_p0 }
  0x88   : > { %p7978_p6 = pnand %p7976_p4, %p7973_p2 }
  0x8a   : > { %7981 = shalt.err (!%p7978_p6)
}
  0x8b   : > { %s7982_s27 = scalar_lea.vmem %s576_s12, 32  ;;  %p7990_p11 = scmp.lt.s32.totalorder %s576_s12, %s576_s12 }
  0x8c   : > { %p7983_p8 = scmp.ne.s32.totalorder %s576_s12, %s7982_s27  ;;  %p7991_p12 = scmp.lt.s32.totalorder %s7982_s27, %s7982_s27 }
  0x8e   : > { %p7985_p9 = pnand %p7983_p8, %p8676_p7  ;;  %p7992_p1 = por %p7991_p12, %p7990_p11 }
  0x90   : > { %p7986_p10 = pneg %p7985_p9 }
  0x92   : > { %p7993_p3 = pnand %p7992_p1, %p7986_p10 }
  0x94   : > { %7996 = shalt.err (!%p7993_p3)
}
  0x95   : > { %7218 = dma.hbm_to_vmem [thread:$0]  (!%p8660_p5), %s9780_s7, 32, %s576_s12, [#allocation14]  }
  0x96   : > { %s9781_s9 = sld [smem:[#allocation51_spill]] }
  0x9c   : > { %s7997_s8 = scalar_lea.hbm %s9781_s9, 8192 }
  0x9d   : > { %p7998_p13 = scmp.ne.s32.totalorder %s9781_s9, %s7997_s8  ;;  %p8004_p3 = scmp.lt.u32.totalorder %s7997_s8, %s9781_s9 }
  0x9f   : > { %p8000_p0 = pnand %p7998_p13, %p8676_p7 }
  0xa1   : > { %p8001_p1 = pneg %p8000_p0 }
  0xa3   : > { %p8006_p2 = pnand %p8004_p3, %p8001_p1 }
  0xa5   : > { %8009 = shalt.err (!%p8006_p2)
}
  0xa6   : > { %s8010_s28 = scalar_lea.vmem %s597_s16, 8192  ;;  %p8018_p9 = scmp.lt.s32.totalorder %s597_s16, %s597_s16 }
  0xa7   : > { %p8011_p4 = scmp.ne.s32.totalorder %s597_s16, %s8010_s28  ;;  %p8019_p10 = scmp.lt.s32.totalorder %s8010_s28, %s8010_s28 }
  0xa9   : > { %p8013_p6 = pnand %p8011_p4, %p8676_p7  ;;  %p8020_p11 = por %p8019_p10, %p8018_p9 }
  0xab   : > { %p8014_p8 = pneg %p8013_p6 }
  0xad   : > { %p8021_p12 = pnand %p8020_p11, %p8014_p8 }
  0xaf   : > { %8024 = shalt.err (!%p8021_p12)
}
  0xb0   : > { %s9746_s12 = smov 256   ;;  %s8503_s29 = smov 16  }
  0xb1   : > { %7224 = dma.hbm_to_vmem [thread:$0]  (!%p8660_p5), %s9781_s9, 8192, %s597_s16, [#allocation17], %s9746_s12, %s9746_s12, %s8503_s29  }
  0xb2   : > { %s8504_s27 = smov [#allocation19]   ;;  %s8505_s22 = smov [#allocation22]  }
  0xb3   : > { %s621_s18 = sshll.u32 %s8504_s27, 4  ;;  %s642_s14 = sshll.u32 %s8505_s22, 4  ;;  %s622_s18 = int_to_ptr.vmem [resolvable:$true] %s621_s18  ;;  %s643_s14 = int_to_ptr.vmem [resolvable:$true] %s642_s14 }
  0xb4   : > { %s9782_s11 = sld [smem:[#allocation53_spill]] }
  0xba   : > { %s8025_s6 = scalar_lea.hbm %s9782_s11, 64 }
  0xbb   : > { %p8026_p13 = scmp.ne.s32.totalorder %s9782_s11, %s8025_s6  ;;  %p8032_p3 = scmp.lt.u32.totalorder %s8025_s6, %s9782_s11 }
  0xbd   : > { %p8028_p0 = pnand %p8026_p13, %p8676_p7 }
  0xbf   : > { %p8029_p1 = pneg %p8028_p0 }
  0xc1   : > { %p8034_p2 = pnand %p8032_p3, %p8029_p1 }
  0xc3   : > { %8037 = shalt.err (!%p8034_p2)
}
  0xc4   : > { %s8038_s16 = scalar_lea.vmem %s622_s18, 64  ;;  %p8046_p9 = scmp.lt.s32.totalorder %s622_s18, %s622_s18 }
  0xc5   : > { %p8039_p4 = scmp.ne.s32.totalorder %s622_s18, %s8038_s16  ;;  %p8047_p10 = scmp.lt.s32.totalorder %s8038_s16, %s8038_s16 }
  0xc7   : > { %p8041_p6 = pnand %p8039_p4, %p8676_p7  ;;  %p8048_p11 = por %p8047_p10, %p8046_p9 }
  0xc9   : > { %p8042_p8 = pneg %p8041_p6 }
  0xcb   : > { %p8049_p12 = pnand %p8048_p11, %p8042_p8 }
  0xcd   : > { %8052 = shalt.err (!%p8049_p12)
}
  0xce   : > { %7230 = dma.hbm_to_vmem [thread:$0]  (!%p8660_p5), %s9782_s11, 64, %s622_s18, [#allocation20]  }
  0xcf   : > { %s9783_s13 = sld [smem:[#allocation55_spill]] }
  0xd5   : > { %s8053_s1 = scalar_lea.hbm %s9783_s13, 32768 }
  0xd6   : > { %p8054_p13 = scmp.ne.s32.totalorder %s9783_s13, %s8053_s1  ;;  %p8060_p3 = scmp.lt.u32.totalorder %s8053_s1, %s9783_s13 }
  0xd8   : > { %p8056_p0 = pnand %p8054_p13, %p8676_p7 }
  0xda   : > { %p8057_p1 = pneg %p8056_p0 }
  0xdc   : > { %p8062_p2 = pnand %p8060_p3, %p8057_p1 }
  0xde   : > { %8065 = shalt.err (!%p8062_p2)
}
  0xdf   : > { %s8066_s19 = scalar_lea.vmem %s643_s14, 32768  ;;  %p8074_p9 = scmp.lt.s32.totalorder %s643_s14, %s643_s14 }
  0xe0   : > { %p8067_p4 = scmp.ne.s32.totalorder %s643_s14, %s8066_s19  ;;  %p8075_p10 = scmp.lt.s32.totalorder %s8066_s19, %s8066_s19 }
  0xe2   : > { %p8069_p6 = pnand %p8067_p4, %p8676_p7  ;;  %p8076_p11 = por %p8075_p10, %p8074_p9 }
  0xe4   : > { %p8070_p8 = pneg %p8069_p6 }
  0xe6   : > { %p8077_p12 = pnand %p8076_p11, %p8070_p8 }
  0xe8   : > { %8080 = shalt.err (!%p8077_p12)
}
  0xe9   : > { %s9745_s18 = smov 512   ;;  %s8507_s28 = smov 32  }
  0xea   : > { %7236 = dma.hbm_to_vmem [thread:$0]  (!%p8660_p5), %s9783_s13, 32768, %s643_s14, [#allocation23], %s9745_s18, %s9745_s18, %s8507_s28  }
  0xeb   : > { %s8508_s25 = smov [#allocation25]   ;;  %s9784_s15 = sld [smem:[#allocation57_spill]] }
  0xec   : > { %s667_s27 = sshll.u32 %s8508_s25, 4  ;;  %s668_s27 = int_to_ptr.vmem [resolvable:$true] %s667_s27 }
  0xf1   : > { %s8081_s8 = scalar_lea.hbm %s9784_s15, 128 }
  0xf2   : > { %p8082_p13 = scmp.ne.s32.totalorder %s9784_s15, %s8081_s8  ;;  %p8088_p3 = scmp.lt.u32.totalorder %s8081_s8, %s9784_s15 }
  0xf4   : > { %p8084_p0 = pnand %p8082_p13, %p8676_p7 }
  0xf6   : > { %p8085_p1 = pneg %p8084_p0 }
  0xf8   : > { %p8090_p2 = pnand %p8088_p3, %p8085_p1 }
  0xfa   : > { %8093 = shalt.err (!%p8090_p2)
}
  0xfb   : > { %s8094_s14 = scalar_lea.vmem %s668_s27, 128  ;;  %p8102_p9 = scmp.lt.s32.totalorder %s668_s27, %s668_s27 }
  0xfc   : > { %p8095_p4 = scmp.ne.s32.totalorder %s668_s27, %s8094_s14  ;;  %p8103_p10 = scmp.lt.s32.totalorder %s8094_s14, %s8094_s14 }
  0xfe   : > { %p8097_p6 = pnand %p8095_p4, %p8676_p7  ;;  %p8104_p11 = por %p8103_p10, %p8102_p9 }
 0x100   : > { %p8098_p8 = pneg %p8097_p6 }
 0x102   : > { %p8105_p12 = pnand %p8104_p11, %p8098_p8 }
 0x104   : > { %8108 = shalt.err (!%p8105_p12)
}
 0x105   : > { %7242 = dma.hbm_to_vmem [thread:$0]  (!%p8660_p5), %s9784_s15, 128, %s668_s27, [#allocation26]  }
 0x106   : > { %s8840_s26 = sadd.s32 1, %s8491_s21   ;;  %s405_s25 = sadd.s32 1, %s8487_s20 }
 0x107   : > { %s402_s22 = ssub.s32 %s8491_s21, %s8840_s26  ;;  %p412_p13 = scmp.ne.s32.totalorder %s8487_s20, %s8483_s30 }
 0x108   : > { %p403_p0 = scmp.eq.s32.totalorder %s402_s22, 0  ;;  %p413_p1 = scmp.eq.s32.totalorder %s8491_s21, 0 }
 0x109   : > { %p418_p3 = scmp.ne.s32.totalorder %s8483_s30, %s8479_s0  ;;  %p7270_p2 = scmp.lt.s32.totalorder %s8491_s21, 2 }
 0x10a   : > { %s8852_s1 = scalar_select %p403_p0, %s8487_s20, %s405_s25  }
 0x10b   : > { %p414_p4 = por %p413_p1, %p412_p13  ;;  %p9785_p6 = scmp.eq.s32.totalorder %s8645_s2, 0 }
 0x10c   : > { %s689_s6 = sand.u32 1, %s8491_s21   ;;  %s9744_s27 = sand.u32 1, %s8487_s20  }
 0x10d   : > { %p8856_p8 = por %p9785_p6, %p418_p3  ;;  %s6431_s10 = sshll.u32 %s9744_s27, 11 }
 0x10e   : > { %s7057_s23 = sshll.u32 %s8491_s21, 8  ;;  %s693_s0 = scalar_lea.vmem [#allocation28], %s6431_s10 }
 0x10f   : > { %s9786_s8 = scalar_select %p8856_p8, 1, 0 }
 0x110   : > { %s8868_s28 = scalar_lea.hbm %s9725_s17, %s7057_s23  ;;  %s700_s16 = sshll.u32 %s693_s0, 4  ;;  %s8870_s16 = int_to_ptr.vmem [resolvable:$true] %s700_s16 }
 0x111   : > { %p8872_p9 = pnand %p7270_p2, %p414_p4  ;;  %s8509_s22 = smov [#allocation2]  }
 0x112   : > { %s8876_s27 = sshll.u32 %s8509_s22, 4  ;;  %s8878_s19 = scalar_lea.sflag [#allocation29], %s689_s6  ;;  %s495_s27 = int_to_ptr.vmem [resolvable:$true] %s8876_s27 }
 0x113   : > { %s9787_s25 = scalar_select %p8872_p9, 1, 0 }
 0x114   : > { %s8109_s23 = scalar_lea.hbm %s8868_s28, 32768  ;;  %p9750_p11 = pneg %p8872_p9 }
 0x115   : > { %p8110_p10 = scmp.ne.s32.totalorder %s8868_s28, %s8109_s23  ;;  %s8114_s0 = scalar_lea.hbm %s9725_s17, 65536 }
 0x116   : > { %p8115_p0 = scmp.lt.u32.totalorder %s8868_s28, %s9725_s17  ;;  %p8116_p1 = scmp.lt.u32.totalorder %s8114_s0, %s8109_s23 }
 0x117   : > { %p8112_p12 = pnand %p9750_p11, %p8110_p10  ;;  %p8118_p2 = scmp.lt.u32.totalorder %s8109_s23, %s8868_s28 }
 0x118   : > { %p8117_p3 = por %p8116_p1, %p8115_p0 }
 0x119   : > { %p8113_p13 = pneg %p8112_p12 }
 0x11a   : > { %p8119_p4 = por %p8118_p2, %p8117_p3 }
 0x11c   : > { %p8120_p6 = pnand %p8119_p4, %p8113_p13 }
 0x11e   : > { %8123 = shalt.err (!%p8120_p6)
}
 0x11f   : > { %s8124_s6 = scalar_lea.vmem %s8870_s16, 32768  ;;  %s8510_s22 = smov [#allocation28]  }
 0x120   : > { %p8125_p10 = scmp.ne.s32.totalorder %s8870_s16, %s8124_s6  ;;  %s8129_s10 = sshll.u32 %s8510_s22, 4  ;;  %s8130_s10 = int_to_ptr.vmem [resolvable:$false] %s8129_s10 }
 0x121   : > { %s8131_s12 = scalar_lea.vmem %s8130_s10, 65536  ;;  %p8132_p5 = scmp.lt.s32.totalorder %s8870_s16, %s8130_s10 }
 0x122   : > { %p8127_p12 = pnand %p8125_p10, %p9750_p11  ;;  %p8133_p0 = scmp.lt.s32.totalorder %s8131_s12, %s8124_s6 }
 0x124   : > { %p8128_p8 = pneg %p8127_p12  ;;  %p8134_p1 = por %p8133_p0, %p8132_p5 }
 0x126   : > { %p8135_p3 = pnand %p8134_p1, %p8128_p8 }
 0x128   : > { %8138 = shalt.err (!%p8135_p3)
}
 0x129   : > { %s9788_s18 = smov 256   ;;  %s9789_s23 = smov 512  }
 0x12a   : > { %7249 = dma.hbm_to_vmem [thread:$0]  (!%p8872_p9), %s8868_s28, 32768, %s8870_s16, %s8878_s19, %s9789_s23, %s9788_s18, %s8503_s29  }
 0x12b   : > { %s8511_s14 = smov [#allocation6]   ;;  %s9790_s6 = sld [smem:[#allocation42_spill]] }
 0x12c   : > { %s518_s0 = sshll.u32 %s8511_s14, 4  ;;  %s519_s0 = int_to_ptr.vmem [resolvable:$true] %s518_s0 }
 0x131   : > { %s8139_s12 = scalar_lea.hbm %s9790_s6, 128 }
 0x132   : > { %p8140_p5 = scmp.ne.s32.totalorder %s9790_s6, %s8139_s12  ;;  %p8146_p2 = scmp.lt.u32.totalorder %s8139_s12, %s9790_s6 }
 0x134   : > { %p8142_p8 = pnand %p8140_p5, %p8676_p7 }
 0x136   : > { %p8143_p13 = pneg %p8142_p8 }
 0x138   : > { %p8148_p4 = pnand %p8146_p2, %p8143_p13 }
 0x13a   : > { %8151 = shalt.err (!%p8148_p4)
}
 0x13b   : > { %s8152_s29 = scalar_lea.vmem %s495_s27, 128  ;;  %p8160_p0 = scmp.lt.s32.totalorder %s495_s27, %s495_s27 }
 0x13c   : > { %p8153_p6 = scmp.ne.s32.totalorder %s495_s27, %s8152_s29  ;;  %p8161_p1 = scmp.lt.s32.totalorder %s8152_s29, %s8152_s29 }
 0x13e   : > { %p8155_p10 = pnand %p8153_p6, %p8676_p7  ;;  %p8162_p3 = por %p8161_p1, %p8160_p0 }
 0x140   : > { %p8156_p12 = pneg %p8155_p10 }
 0x142   : > { %p8163_p11 = pnand %p8162_p3, %p8156_p12 }
 0x144   : > { %8166 = shalt.err (!%p8163_p11)
}
 0x145   : > { %p9791_p5 = scmp.ne.s32.totalorder %s9775_s3, 0  ;;  %s9792_s28 = sld [smem:[#allocation44_spill]] }
 0x147   : > { %7197 = dma.hbm_to_vmem [thread:$0]  (!%p9791_p5), %s9790_s6, 128, %s495_s27, [#allocation3]  }
 0x14b   : > { %s8167_s16 = scalar_lea.hbm %s9792_s28, 16 }
 0x14c   : > { %p8168_p8 = scmp.ne.s32.totalorder %s9792_s28, %s8167_s16  ;;  %p8174_p11 = scmp.lt.u32.totalorder %s8167_s16, %s9792_s28 }
 0x14e   : > { %p8170_p13 = pnand %p8168_p8, %p8676_p7 }
 0x150   : > { %p8171_p2 = pneg %p8170_p13 }
 0x152   : > { %p8176_p4 = pnand %p8174_p11, %p8171_p2 }
 0x154   : > { %8179 = shalt.err (!%p8176_p4)
}
 0x155   : > { %s8180_s10 = scalar_lea.vmem %s519_s0, 16  ;;  %s8187_s27 = scalar_lea.vmem %s519_s0, 32 }
 0x156   : > { %p8181_p6 = scmp.ne.s32.totalorder %s519_s0, %s8180_s10  ;;  %p8188_p0 = scmp.lt.s32.totalorder %s519_s0, %s519_s0 }
 0x157   : > { %p8189_p1 = scmp.lt.s32.totalorder %s8187_s27, %s8180_s10 }
 0x158   : > { %p8183_p10 = pnand %p8181_p6, %p8676_p7 }
 0x159   : > { %p8190_p3 = por %p8189_p1, %p8188_p0 }
 0x15a   : > { %p8184_p12 = pneg %p8183_p10 }
 0x15c   : > { %p8191_p9 = pnand %p8190_p3, %p8184_p12 }
 0x15e   : > { %8194 = shalt.err (!%p8191_p9)
}
 0x15f   : > { %7203 = dma.hbm_to_vmem [thread:$0]  (!%p9791_p5), %s9792_s28, 16, %s519_s0, [#allocation5]  }
 0x160   : > { %s8512_s5 = smov [#allocation9]   ;;  %s8513_s9 = smov [#allocation12]  }
 0x161   : > { %s540_s7 = sshll.u32 %s8512_s5, 4  ;;  %s564_s11 = sshll.u32 %s8513_s9, 4  ;;  %s541_s7 = int_to_ptr.vmem [resolvable:$true] %s540_s7  ;;  %s565_s11 = int_to_ptr.vmem [resolvable:$true] %s564_s11 }
 0x162   : > { %s9793_s4 = sld [smem:[#allocation46_spill]] }
 0x168   : > { %s8195_s23 = scalar_lea.hbm %s9793_s4, 16 }
 0x169   : > { %p8196_p9 = scmp.ne.s32.totalorder %s9793_s4, %s8195_s23  ;;  %p8202_p2 = scmp.lt.u32.totalorder %s8195_s23, %s9793_s4 }
 0x16b   : > { %p8198_p8 = pnand %p8196_p9, %p8676_p7 }
 0x16d   : > { %p8199_p13 = pneg %p8198_p8 }
 0x16f   : > { %p8204_p11 = pnand %p8202_p2, %p8199_p13 }
 0x171   : > { %8207 = shalt.err (!%p8204_p11)
}
 0x172   : > { %s8208_s0 = scalar_lea.vmem %s541_s7, 16  ;;  %s8215_s12 = scalar_lea.vmem %s541_s7, 32 }
 0x173   : > { %p8209_p4 = scmp.ne.s32.totalorder %s541_s7, %s8208_s0  ;;  %p8216_p12 = scmp.lt.s32.totalorder %s541_s7, %s541_s7 }
 0x174   : > { %p8217_p0 = scmp.lt.s32.totalorder %s8215_s12, %s8208_s0 }
 0x175   : > { %p8211_p6 = pnand %p8209_p4, %p8676_p7 }
 0x176   : > { %p8218_p1 = por %p8217_p0, %p8216_p12 }
 0x177   : > { %p8212_p10 = pneg %p8211_p6 }
 0x179   : > { %p8219_p3 = pnand %p8218_p1, %p8212_p10 }
 0x17b   : > { %8222 = shalt.err (!%p8219_p3)
}
 0x17c   : > { %7209 = dma.hbm_to_vmem [thread:$0]  (!%p9791_p5), %s9793_s4, 16, %s541_s7, [#allocation8]  }
 0x17d   : > { %s9794_s18 = sld [smem:[#allocation48_spill]] }
 0x183   : > { %s8223_s23 = scalar_lea.hbm %s9794_s18, 32 }
 0x184   : > { %p8224_p9 = scmp.ne.s32.totalorder %s9794_s18, %s8223_s23  ;;  %p8230_p2 = scmp.lt.u32.totalorder %s8223_s23, %s9794_s18 }
 0x186   : > { %p8226_p8 = pnand %p8224_p9, %p8676_p7 }
 0x188   : > { %p8227_p13 = pneg %p8226_p8 }
 0x18a   : > { %p8232_p11 = pnand %p8230_p2, %p8227_p13 }
 0x18c   : > { %8235 = shalt.err (!%p8232_p11)
}
 0x18d   : > { %s8236_s0 = scalar_lea.vmem %s565_s11, 32  ;;  %p8244_p12 = scmp.lt.s32.totalorder %s565_s11, %s565_s11 }
 0x18e   : > { %p8237_p4 = scmp.ne.s32.totalorder %s565_s11, %s8236_s0  ;;  %p8245_p0 = scmp.lt.s32.totalorder %s8236_s0, %s8236_s0 }
 0x190   : > { %p8239_p6 = pnand %p8237_p4, %p8676_p7  ;;  %p8246_p1 = por %p8245_p0, %p8244_p12 }
 0x192   : > { %p8240_p10 = pneg %p8239_p6 }
 0x194   : > { %p8247_p3 = pnand %p8246_p1, %p8240_p10 }
 0x196   : > { %8250 = shalt.err (!%p8247_p3)
}
 0x197   : > { %7215 = dma.hbm_to_vmem [thread:$0]  (!%p9791_p5), %s9794_s18, 32, %s565_s11, [#allocation11]  }
 0x198   : > { %s8514_s29 = smov [#allocation15]   ;;  %s8515_s9 = smov [#allocation18]  }
 0x199   : > { %s586_s5 = sshll.u32 %s8514_s29, 4  ;;  %s610_s16 = sshll.u32 %s8515_s9, 4  ;;  %s587_s5 = int_to_ptr.vmem [resolvable:$true] %s586_s5  ;;  %s611_s16 = int_to_ptr.vmem [resolvable:$true] %s610_s16 }
 0x19a   : > { %s9795_s22 = sld [smem:[#allocation50_spill]] }
 0x1a0   : > { %s8251_s10 = scalar_lea.hbm %s9795_s22, 32 }
 0x1a1   : > { %p8252_p9 = scmp.ne.s32.totalorder %s9795_s22, %s8251_s10  ;;  %p8258_p2 = scmp.lt.u32.totalorder %s8251_s10, %s9795_s22 }
 0x1a3   : > { %p8254_p8 = pnand %p8252_p9, %p8676_p7 }
 0x1a5   : > { %p8255_p13 = pneg %p8254_p8 }
 0x1a7   : > { %p8260_p11 = pnand %p8258_p2, %p8255_p13 }
 0x1a9   : > { %8263 = shalt.err (!%p8260_p11)
}
 0x1aa   : > { %s8264_s11 = scalar_lea.vmem %s587_s5, 32  ;;  %p8272_p12 = scmp.lt.s32.totalorder %s587_s5, %s587_s5 }
 0x1ab   : > { %p8265_p4 = scmp.ne.s32.totalorder %s587_s5, %s8264_s11  ;;  %p8273_p0 = scmp.lt.s32.totalorder %s8264_s11, %s8264_s11 }
 0x1ad   : > { %p8267_p6 = pnand %p8265_p4, %p8676_p7  ;;  %p8274_p1 = por %p8273_p0, %p8272_p12 }
 0x1af   : > { %p8268_p10 = pneg %p8267_p6 }
 0x1b1   : > { %p8275_p3 = pnand %p8274_p1, %p8268_p10 }
 0x1b3   : > { %8278 = shalt.err (!%p8275_p3)
}
 0x1b4   : > { %7221 = dma.hbm_to_vmem [thread:$0]  (!%p9791_p5), %s9795_s22, 32, %s587_s5, [#allocation14]  }
 0x1b5   : > { %s9796_s23 = sld [smem:[#allocation52_spill]] }
 0x1bb   : > { %s8279_s14 = scalar_lea.hbm %s9796_s23, 64 }
 0x1bc   : > { %p8280_p9 = scmp.ne.s32.totalorder %s9796_s23, %s8279_s14  ;;  %p8286_p2 = scmp.lt.u32.totalorder %s8279_s14, %s9796_s23 }
 0x1be   : > { %p8282_p8 = pnand %p8280_p9, %p8676_p7 }
 0x1c0   : > { %p8283_p13 = pneg %p8282_p8 }
 0x1c2   : > { %p8288_p11 = pnand %p8286_p2, %p8283_p13 }
 0x1c4   : > { %8291 = shalt.err (!%p8288_p11)
}
 0x1c5   : > { %s8292_s11 = scalar_lea.vmem %s611_s16, 64  ;;  %p8300_p12 = scmp.lt.s32.totalorder %s611_s16, %s611_s16 }
 0x1c6   : > { %p8293_p4 = scmp.ne.s32.totalorder %s611_s16, %s8292_s11  ;;  %p8301_p0 = scmp.lt.s32.totalorder %s8292_s11, %s8292_s11 }
 0x1c8   : > { %p8295_p6 = pnand %p8293_p4, %p8676_p7  ;;  %p8302_p1 = por %p8301_p0, %p8300_p12 }
 0x1ca   : > { %p8296_p10 = pneg %p8295_p6 }
 0x1cc   : > { %p8303_p3 = pnand %p8302_p1, %p8296_p10 }
 0x1ce   : > { %8306 = shalt.err (!%p8303_p3)
}
 0x1cf   : > { %7227 = dma.hbm_to_vmem [thread:$0]  (!%p9791_p5), %s9796_s23, 64, %s611_s16, [#allocation17]  }
 0x1d0   : > { %s8516_s29 = smov [#allocation21]   ;;  %s8517_s9 = smov [#allocation24]  }
 0x1d1   : > { %s632_s4 = sshll.u32 %s8516_s29, 4  ;;  %s656_s14 = sshll.u32 %s8517_s9, 4  ;;  %s633_s4 = int_to_ptr.vmem [resolvable:$true] %s632_s4  ;;  %s657_s14 = int_to_ptr.vmem [resolvable:$true] %s656_s14 }
 0x1d2   : > { %s9797_s0 = sld [smem:[#allocation54_spill]] }
 0x1d8   : > { %s9798_s7 = smov %s9797_s0  ;;  %s8307_s6 = scalar_lea.hbm %s9797_s0, 64 }
 0x1d9   : > { %p8308_p9 = scmp.ne.s32.totalorder %s9798_s7, %s8307_s6  ;;  %p8314_p2 = scmp.lt.u32.totalorder %s8307_s6, %s9798_s7 }
 0x1db   : > { %p8310_p8 = pnand %p8308_p9, %p8676_p7 }
 0x1dd   : > { %p8311_p13 = pneg %p8310_p8 }
 0x1df   : > { %p8316_p11 = pnand %p8314_p2, %p8311_p13 }
 0x1e1   : > { %8319 = shalt.err (!%p8316_p11)
}
 0x1e2   : > { %s8320_s16 = scalar_lea.vmem %s633_s4, 64  ;;  %p8328_p12 = scmp.lt.s32.totalorder %s633_s4, %s633_s4 }
 0x1e3   : > { %p8321_p4 = scmp.ne.s32.totalorder %s633_s4, %s8320_s16  ;;  %p8329_p0 = scmp.lt.s32.totalorder %s8320_s16, %s8320_s16 }
 0x1e5   : > { %p8323_p6 = pnand %p8321_p4, %p8676_p7  ;;  %p8330_p1 = por %p8329_p0, %p8328_p12 }
 0x1e7   : > { %p8324_p10 = pneg %p8323_p6 }
 0x1e9   : > { %p8331_p3 = pnand %p8330_p1, %p8324_p10 }
 0x1eb   : > { %8334 = shalt.err (!%p8331_p3)
}
 0x1ec   : > { %7233 = dma.hbm_to_vmem [thread:$0]  (!%p9791_p5), %s9798_s7, 64, %s633_s4, [#allocation20]  }
 0x1ed   : > { %s9799_s29 = sld [smem:[#allocation56_spill]] }
 0x1f3   : > { %s8335_s9 = scalar_lea.hbm %s9799_s29, 128 }
 0x1f4   : > { %p8336_p9 = scmp.ne.s32.totalorder %s9799_s29, %s8335_s9  ;;  %p8342_p2 = scmp.lt.u32.totalorder %s8335_s9, %s9799_s29 }
 0x1f6   : > { %p8338_p8 = pnand %p8336_p9, %p8676_p7 }
 0x1f8   : > { %p8339_p13 = pneg %p8338_p8 }
 0x1fa   : > { %p8344_p11 = pnand %p8342_p2, %p8339_p13 }
 0x1fc   : > { %8347 = shalt.err (!%p8344_p11)
}
 0x1fd   : > { %s8348_s5 = scalar_lea.vmem %s657_s14, 128  ;;  %p8356_p12 = scmp.lt.s32.totalorder %s657_s14, %s657_s14 }
 0x1fe   : > { %p8349_p4 = scmp.ne.s32.totalorder %s657_s14, %s8348_s5  ;;  %p8357_p0 = scmp.lt.s32.totalorder %s8348_s5, %s8348_s5 }
 0x200   : > { %p8351_p6 = pnand %p8349_p4, %p8676_p7  ;;  %p8358_p1 = por %p8357_p0, %p8356_p12 }
 0x202   : > { %p8352_p10 = pneg %p8351_p6 }
 0x204   : > { %p8359_p3 = pnand %p8358_p1, %p8352_p10 }
 0x206   : > { %8362 = shalt.err (!%p8359_p3)
}
 0x207   : > { %7239 = dma.hbm_to_vmem [thread:$0]  (!%p9791_p5), %s9799_s29, 128, %s657_s14, [#allocation23]  }
 0x208   : > { %s8518_s13 = smov [#allocation27]   ;;  %s9800_s15 = sand.u32 1, %s8487_s20  }
 0x209   : > { %s678_s12 = sshll.u32 %s8518_s13, 4  ;;  %s6434_s6 = sshll.u32 %s9800_s15, 2  ;;  %s679_s12 = int_to_ptr.vmem [resolvable:$true] %s678_s12 }
 0x20a   : > { %s9801_s27 = sld [smem:[#allocation58_spill]] }
 0x210   : > { %s8363_s0 = scalar_lea.hbm %s9801_s27, 128 }
 0x211   : > { %p8364_p9 = scmp.ne.s32.totalorder %s9801_s27, %s8363_s0  ;;  %p8370_p2 = scmp.lt.u32.totalorder %s8363_s0, %s9801_s27 }
 0x213   : > { %p8366_p8 = pnand %p8364_p9, %p8676_p7 }
 0x215   : > { %p8367_p13 = pneg %p8366_p8 }
 0x217   : > { %p8372_p11 = pnand %p8370_p2, %p8367_p13 }
 0x219   : > { %8375 = shalt.err (!%p8372_p11)
}
 0x21a   : > { %s8376_s14 = scalar_lea.vmem %s679_s12, 128  ;;  %p8384_p12 = scmp.lt.s32.totalorder %s679_s12, %s679_s12 }
 0x21b   : > { %p8377_p4 = scmp.ne.s32.totalorder %s679_s12, %s8376_s14  ;;  %p8385_p0 = scmp.lt.s32.totalorder %s8376_s14, %s8376_s14 }
 0x21d   : > { %p8379_p6 = pnand %p8377_p4, %p8676_p7  ;;  %p8386_p1 = por %p8385_p0, %p8384_p12 }
 0x21f   : > { %p8380_p10 = pneg %p8379_p6 }
 0x221   : > { %p8387_p3 = pnand %p8386_p1, %p8380_p10 }
 0x223   : > { %8390 = shalt.err (!%p8387_p3)
}
 0x224   : > { %7245 = dma.hbm_to_vmem [thread:$0]  (!%p9791_p5), %s9801_s27, 128, %s679_s12, [#allocation26]  }
 0x225   : > { %s7058_s9 = sshll.u32 %s8491_s21, 6  ;;  %s714_s10 = scalar_lea.vmem [#allocation30], %s6434_s6 }
 0x226   : > { %s722_s0 = sshll.u32 %s714_s10, 4  ;;  %s9802_s5 = sld [smem:[#allocation59_spill]]  ;;  %s723_s0 = int_to_ptr.vmem [resolvable:$true] %s722_s0 }
 0x227   : > { %p9803_p9 = scmp.ne.s32.totalorder %s9787_s25, 0 }
 0x229   : > { %p9804_p8 = pneg %p9803_p9 }
 0x22c   : > { %s720_s4 = scalar_lea.hbm %s9802_s5, %s7058_s9  ;;  %s8396_s13 = scalar_lea.hbm %s9802_s5, 128 }
 0x22d   : > { %s8391_s16 = scalar_lea.hbm %s720_s4, 64  ;;  %p8397_p5 = scmp.lt.u32.totalorder %s720_s4, %s9802_s5 }
 0x22e   : > { %p8392_p7 = scmp.ne.s32.totalorder %s720_s4, %s8391_s16  ;;  %p8398_p11 = scmp.lt.u32.totalorder %s8396_s13, %s8391_s16 }
 0x22f   : > { %p8400_p6 = scmp.lt.u32.totalorder %s8391_s16, %s720_s4 }
 0x230   : > { %p8394_p13 = pnand %p8392_p7, %p9804_p8  ;;  %p8399_p4 = por %p8398_p11, %p8397_p5 }
 0x232   : > { %p8395_p2 = pneg %p8394_p13  ;;  %p8401_p10 = por %p8400_p6, %p8399_p4 }
 0x234   : > { %p8402_p12 = pnand %p8401_p10, %p8395_p2 }
 0x236   : > { %8405 = shalt.err (!%p8402_p12)
}
 0x237   : > { %s8406_s21 = scalar_lea.vmem %s723_s0, 64  ;;  %p9805_p1 = pmov %p9804_p8 }
 0x238   : > { %p8407_p0 = scmp.ne.s32.totalorder %s723_s0, %s8406_s21  ;;  %s8519_s6 = smov [#allocation30]  }
 0x239   : > { %s8411_s9 = sshll.u32 %s8519_s6, 4  ;;  %s8412_s9 = int_to_ptr.vmem [resolvable:$false] %s8411_s9 }
 0x23a   : > { %p8409_p3 = pnand %p8407_p0, %p9805_p1  ;;  %s8413_s10 = scalar_lea.vmem %s8412_s9, 128 }
 0x23b   : > { %p8414_p8 = scmp.lt.s32.totalorder %s723_s0, %s8412_s9  ;;  %p8415_p13 = scmp.lt.s32.totalorder %s8413_s10, %s8406_s21 }
 0x23c   : > { %p8410_p7 = pneg %p8409_p3 }
 0x23d   : > { %p8416_p5 = por %p8415_p13, %p8414_p8 }
 0x23f   : > { %p8417_p11 = pnand %p8416_p5, %p8410_p7 }
 0x241   : > { %8420 = shalt.err (!%p8417_p11)
}
 0x242   : > { %7252 = dma.hbm_to_vmem [thread:$0]  (!%p9803_p9), %s720_s4, 64, %s723_s0, %s8878_s19  }
 0x243   : > { %s9806_s11 = sld [smem:[#allocation41_spill]] }
 0x249   : > { %p9807_p2 = scmp.ne.s32.totalorder %s9806_s11, 0 }
 0x24a   : > { %p9808_p4 = scmp.eq.s32.totalorder (!%p9807_p2), %s8645_s2, 0 }
 0x24b   : > { %731 = sbr.rel (%p9807_p2) target bundleno = 2351 (0x92f), region = 96 }
 0x252   : > { %8438 = dma.done.wait (%p9808_p4), [#allocation3], 128   ;;  %p9809_p6 = pmov %p9808_p4 }
 0x253   : > { %p9810_p10 = pmov %p9808_p4 }
 0x254   : > { %8440 = vsyncadd (%p9809_p6), [#allocation3], 4294967168 }
 0x255   : > { %8442 = dma.done.wait (%p9810_p10), [#allocation5], 272   ;;  %p9811_p12 = pmov %p9808_p4 }
 0x256   : > { %p9812_p0 = pmov %p9808_p4 }
 0x257   : > { %8444 = vsyncadd (%p9811_p12), [#allocation5], 4294967024 }
 0x258   : > { %8446 = dma.done.wait (%p9812_p0), [#allocation8], 32   ;;  %p9813_p9 = pmov %p9812_p0 }
 0x259   : > { %p9814_p1 = pmov %p9812_p0 }
 0x25a   : > { %8448 = vsyncadd (%p9813_p9), [#allocation8], 4294967264 }
 0x25b   : > { %8450 = dma.done.wait (%p9814_p1), [#allocation11], 2080   ;;  %p9815_p3 = pmov %p9812_p0 }
 0x25c   : > { %p9816_p7 = pmov %p9812_p0 }
 0x25d   : > { %8452 = vsyncadd (%p9815_p3), [#allocation11], 4294965216 }
 0x25e   : > { %8454 = dma.done.wait (%p9816_p7), [#allocation14], 64   ;;  %p9817_p8 = pmov %p9812_p0 }
 0x25f   : > { %p9818_p13 = pmov %p9812_p0 }
 0x260   : > { %8456 = vsyncadd (%p9817_p8), [#allocation14], 4294967232 }
 0x261   : > { %8458 = dma.done.wait (%p9818_p13), [#allocation17], 8256   ;;  %p9819_p5 = pmov %p9812_p0 }
 0x262   : > { %p9820_p11 = pmov %p9812_p0 }
 0x263   : > { %8460 = vsyncadd (%p9819_p5), [#allocation17], 4294959040 }
 0x264   : > { %8462 = dma.done.wait (%p9820_p11), [#allocation20], 128   ;;  %p9821_p2 = pmov %p9812_p0 }
 0x265   : > { %p9822_p4 = pmov %p9812_p0 }
 0x266   : > { %8464 = vsyncadd (%p9821_p2), [#allocation20], 4294967168 }
 0x267   : > { %8466 = dma.done.wait (%p9822_p4), [#allocation23], 32896   ;;  %p9823_p6 = pmov %p9812_p0 }
 0x268   : > { %p9824_p10 = pmov %p9812_p0 }
 0x269   : > { %8468 = vsyncadd (%p9823_p6), [#allocation23], 4294934400 }
 0x26a   : > { %8470 = dma.done.wait (%p9824_p10), [#allocation26], 256   ;;  %p9825_p12 = pmov %p9812_p0 }
 0x26b   : > { %s801_s25 = sand.u32 1, %s8645_s2   ;;  %s803_s19 = sand.u32 1, %s8483_s30  }
 0x26c   : > { %8472 = vsyncadd (%p9825_p12), [#allocation26], 4294967040  ;;  %s6455_s0 = sshll.u32 %s803_s19, 11  ;;  %s802_s24 = scalar_lea.sflag [#allocation29], %s801_s25 }
 0x26d   : > { %s9135_s4 = scalar_lea.vmem [#allocation28], %s6455_s0  ;;  %p9826_p0 = scmp.ne.s32.totalorder %s9786_s8, 0 }
 0x26f   : > { %8474 = dma.done.wait (%p9826_p0), %s802_s24, 32832  }
 0x270   : > { %8476 = vsyncadd (%p9826_p0), %s802_s24, 4294934464  ;;  %v8520_v0 = vmov 0.0   ;;  %vm8521_vm0 = vmmov 0   ;;  %v7349_v1 = vld [vmem:[#allocation4] sm:$0xff]   ;;  %v7350_v2 = vld [vmem:[#allocation4 + $0x8] sm:$0xff]   ;;  %vm908_vm1 = vcmask 261120   ;;  %v980_v49 = vlaneseq }
 0x271   : > { %7062 = vmatprep.subr.bf16.mxu0 %v8520_v0  ;;  %7066 = vmatprep.mubr.msk.bf16.mxu0 %vm8521_vm0, %v8520_v0  ;;  %v883_v3 = vld [vmem:[#allocation2] sm:$0xff]  ;;  %v7354_v7 = vld [vmem:[#allocation10 + $0x14] ss:$8 sps:$4 sm:$0xff]   ;;  %v7356_v8 = vld [vmem:[#allocation10 + $0x10] ss:$8 sps:$4 sm:$0xff]   ;;  %v8522_v12 = vmov 0  }
 0x272   : > { %7063 = vmatpush3.bf16.msra.mxu0 %v7349_v1  ;;  %v884_v4 = vpack.c.bf16 %v883_v3, %v883_v3  ;;  %v7351_v5 = vld [vmem:[#allocation10 + $0x4] ss:$8 sps:$4 sm:$0xff]   ;;  %v7353_v6 = vld [vmem:[#allocation10] ss:$8 sps:$4 sm:$0xff]   ;;  %v7360_v11 = vld [vmem:[#allocation10 + $0x34] ss:$8 sps:$4 sm:$0xff]   ;;  %1134 = vmatprep.mubr.bf16.mxu1 %v8522_v12 }
 0x273   : > { %7064 = vmatprep.subr.bf16.mxu0 %v8520_v0  ;;  %1102 = vmatprep.subr.bf16.mxu1 %v7351_v5  ;;  %v7357_v9 = vld [vmem:[#allocation10 + $0x24] ss:$8 sps:$4 sm:$0xff]   ;;  %v7359_v10 = vld [vmem:[#allocation10 + $0x20] ss:$8 sps:$4 sm:$0xff]   ;;  %v7362_v13 = vld [vmem:[#allocation10 + $0x30] ss:$8 sps:$4 sm:$0xff]  }
 0x274   : > { %1103 = vmatpush1.bf16.msra.mxu1 %v7353_v6  ;;  %v7363_v14 = vld [vmem:[#allocation10 + $0x44] ss:$8 sps:$4 sm:$0xff]   ;;  %v7365_v15 = vld [vmem:[#allocation10 + $0x40] ss:$8 sps:$4 sm:$0xff]   ;;  %v7366_v16 = vld [vmem:[#allocation10 + $0x54] ss:$8 sps:$4 sm:$0xff]  }
 0x275   : > { %1104 = vmatprep.subr.bf16.mxu1 %v7354_v7  ;;  %v7368_v17 = vld [vmem:[#allocation10 + $0x50] ss:$8 sps:$4 sm:$0xff]   ;;  %v7369_v18 = vld [vmem:[#allocation10 + $0x64] ss:$8 sps:$4 sm:$0xff]   ;;  %v7371_v19 = vld [vmem:[#allocation10 + $0x60] ss:$8 sps:$4 sm:$0xff]  }
 0x276   : > { %7065 = vmatpush3.bf16.msra.mxu0 %v7350_v2  ;;  %v7372_v20 = vld [vmem:[#allocation10 + $0x74] ss:$8 sps:$4 sm:$0xff]   ;;  %v7374_v21 = vld [vmem:[#allocation10 + $0x70] ss:$8 sps:$4 sm:$0xff]   ;;  %v9141_v50 = vshrl.u32 %v980_v49, 7  ;;  %s6457_s8 = sshll.u32 %s8645_s2, 2 }
 0x277   : > { %v6459_v22 = vld [vmem:[#allocation6] ss:$0 sm:$0xff]  ;;  %v974_v51 = vld [vmem:[#allocation7] sm:$0x1]  ;;  %v976_v55 = vld [vmem:[#allocation9] sm:$0x1] }
 0x278   : > { %1105 = vmatpush1.bf16.msra.mxu1 %v7356_v8  ;;  %v9144_v52 = vsub.s32 0, %v9141_v50  ;;  %v7377_v63 = vld [vmem:[#allocation16 + $0x4] ss:$16 sps:$4 sm:$0xff]   ;;  %v7380_v0 = vld [vmem:[#allocation16 + $0xc] ss:$16 sps:$4 sm:$0xff]   ;;  %s6456_s16 = sshll.u32 %s803_s19, 2 }
 0x279   : > { %7067 = vmatmul.mubr.msk.bf16.vlgmr.msra.gmra.mrb[0].mxu0 %vm908_vm1, %v884_v4  ;;  %1106 = vmatprep.subr.bf16.mxu1 %v7357_v9  ;;  %v7375_v1 = vld [vmem:[#allocation16] ss:$16 sps:$4 sm:$0xff]   ;;  %v7378_v2 = vld [vmem:[#allocation16 + $0x8] ss:$16 sps:$4 sm:$0xff]   ;;  %v7383_v3 = vld [vmem:[#allocation16 + $0x24] ss:$16 sps:$4 sm:$0xff]  }
 0x27a   : > { %1663 = vmatprep.subr.bf16.mxu0 %v7377_v63  ;;  %v7386_v4 = vld [vmem:[#allocation16 + $0x2c] ss:$16 sps:$4 sm:$0xff]   ;;  %v7381_v5 = vld [vmem:[#allocation16 + $0x20] ss:$16 sps:$4 sm:$0xff]   ;;  %v7384_v6 = vld [vmem:[#allocation16 + $0x28] ss:$16 sps:$4 sm:$0xff]  }
 0x27b   : > { %1664 = vmatpush1.bf16.msra.mxu0 %v7375_v1  ;;  %v7389_v7 = vld [vmem:[#allocation16 + $0x44] ss:$16 sps:$4 sm:$0xff]   ;;  %v7392_v8 = vld [vmem:[#allocation16 + $0x4c] ss:$16 sps:$4 sm:$0xff]   ;;  %v7387_v9 = vld [vmem:[#allocation16 + $0x40] ss:$16 sps:$4 sm:$0xff]  }
 0x27c   : > { %1107 = vmatpush1.bf16.msra.mxu1 %v7359_v10  ;;  %1665 = vmatprep.subr.bf16.mxu0 %v7383_v3  ;;  %v7390_v10 = vld [vmem:[#allocation16 + $0x48] ss:$16 sps:$4 sm:$0xff]   ;;  %v7398_v12 = vld [vmem:[#allocation16 + $0x6c] ss:$16 sps:$4 sm:$0xff]   ;;  %v7447_v49 = vld [vmem:[#allocation16 + $0x180] ss:$16 sps:$4 sm:$0xff]  }
 0x27d   : > { %1108 = vmatprep.subr.bf16.mxu1 %v7360_v11  ;;  %v7395_v11 = vld [vmem:[#allocation16 + $0x64] ss:$16 sps:$4 sm:$0xff]   ;;  %v7465_v63 = vld [vmem:[#allocation16 + $0x1e0] ss:$16 sps:$4 sm:$0xff]   ;;  %v1010_v1 = vld [vmem:[#allocation12] sm:$0x3] }
 0x27e   : > { %v1015_v3 = vrot.slane %v1010_v1, %v9144_v52  ;;  %p877_p9 = scmp.lt.s32.totalorder %s6457_s8, 7  ;;  %s814_s3 = scalar_lea.vmem [#allocation30], %s6456_s16 }
 0x27f   : > { %1666 = vmatpush1.bf16.msra.mxu0 %v7381_v5  ;;  %s9827_s12 = sld [smem:[#allocation60_spill]] }
 0x280   : > { %1109 = vmatpush1.bf16.msra.mxu1 %v7362_v13  ;;  %1667 = vmatprep.subr.bf16.mxu0 %v7389_v7  ;;  %v7393_v13 = vld [vmem:[#allocation16 + $0x60] ss:$16 sps:$4 sm:$0xff]   ;;  %s9833_s8 = smov (!%p877_p9, %s6457_s8), 7 }
 0x281   : > { %1110 = vmatprep.subr.bf16.mxu1 %v7363_v14  ;;  %v7396_v14 = vld [vmem:[#allocation16 + $0x68] ss:$16 sps:$4 sm:$0xff]   ;;  %s6458_s14 = sshll.u32 %s9833_s8, 3 }
 0x283   : > { %1668 = vmatpush1.bf16.msra.mxu0 %v7387_v9 }
 0x284   : > { %1111 = vmatpush1.bf16.msra.mxu1 %v7365_v15  ;;  %1669 = vmatprep.subr.bf16.mxu0 %v7395_v11  ;;  %v7401_v15 = vld [vmem:[#allocation16 + $0x84] ss:$16 sps:$4 sm:$0xff]  }
 0x285   : > { %1112 = vmatprep.subr.bf16.mxu1 %v7366_v16  ;;  %v7404_v16 = vld [vmem:[#allocation16 + $0x8c] ss:$16 sps:$4 sm:$0xff]   ;;  %s880_s21 = scalar_lea.vmem %s9827_s12, %s6458_s14 }
 0x287   : > { %1670 = vmatpush1.bf16.msra.mxu0 %v7393_v13 }
 0x288   : > { %1113 = vmatpush1.bf16.msra.mxu1 %v7368_v17  ;;  %v7399_v17 = vld [vmem:[#allocation16 + $0x80] ss:$16 sps:$4 sm:$0xff]   ;;  %1671 = vmatprep.subr.bf16.mxu0 %v7401_v15 }
 0x289   : > { %1114 = vmatprep.subr.bf16.mxu1 %v7369_v18  ;;  %v7402_v18 = vld [vmem:[#allocation16 + $0x88] ss:$16 sps:$4 sm:$0xff]  }
 0x28b   : > { %1672 = vmatpush1.bf16.msra.mxu0 %v7399_v17 }
 0x28c   : > { %1115 = vmatpush1.bf16.msra.mxu1 %v7371_v19  ;;  %v7407_v19 = vld [vmem:[#allocation16 + $0xa4] ss:$16 sps:$4 sm:$0xff]  }
 0x28d   : > { %1116 = vmatprep.subr.bf16.mxu1 %v7372_v20  ;;  %v7410_v20 = vld [vmem:[#allocation16 + $0xac] ss:$16 sps:$4 sm:$0xff]   ;;  %1673 = vmatprep.subr.bf16.mxu0 %v7407_v19 }
 0x290   : > { %1117 = vmatpush1.bf16.msra.mxu1 %v7374_v21  ;;  %v7405_v21 = vld [vmem:[#allocation16 + $0xa0] ss:$16 sps:$4 sm:$0xff]  }
 0x291   : > { %1704 = vmatprep.subr.bf16.mxu1 %v7380_v0  ;;  %1674 = vmatpush1.bf16.msra.mxu0 %v7405_v21  ;;  %v7468_v0 = vld [vmem:[#allocation16 + $0x1e8] ss:$16 sps:$4 sm:$0xff]  }
 0x34c   : > { %v946_v23 = vpop.f32.mrb[0].mxu0 }
 0x34d   : > { %v947_v24 = vadd.f32 %v6459_v22, %v946_v23  ;;  %v7068_v25 = vpop.f32.mrb[1].mxu0  ;;  %v7408_v22 = vld [vmem:[#allocation16 + $0xa8] ss:$16 sps:$4 sm:$0xff]   ;;  %v7413_v23 = vld [vmem:[#allocation16 + $0xc4] ss:$16 sps:$4 sm:$0xff]  }
 0x34e   : > { %v949_v26 = vpop.f32.mrb[2].mxu0  ;;  %v7411_v25 = vld [vmem:[#allocation16 + $0xc0] ss:$16 sps:$4 sm:$0xff]   ;;  %1675 = vmatprep.subr.bf16.mxu0 %v7413_v23 }
 0x34f   : > { %v952_v27 = vmul.f32 0.2, %v947_v24  ;;  %v7069_v28 = vpop.f32.mrb[3].mxu0  ;;  %v7414_v26 = vld [vmem:[#allocation16 + $0xc8] ss:$16 sps:$4 sm:$0xff]   ;;  %1676 = vmatpush1.bf16.msra.mxu0 %v7411_v25 }
 0x350   : > { %v7419_v28 = vld [vmem:[#allocation16 + $0xe4] ss:$16 sps:$4 sm:$0xff]  }
 0x351   : > { %v953_v29 = vmax.f32 %v947_v24, %v952_v27  ;;  %v7416_v24 = vld [vmem:[#allocation16 + $0xcc] ss:$16 sps:$4 sm:$0xff]   ;;  %v7417_v27 = vld [vmem:[#allocation16 + $0xe0] ss:$16 sps:$4 sm:$0xff]   ;;  %1677 = vmatprep.subr.bf16.mxu0 %v7419_v28 }
 0x353   : > { %v954_v30 = vrot.slane %v953_v29, 4  ;;  %v961_v31 = vmul.f32 %v953_v29, %v953_v29  ;;  %1678 = vmatpush1.bf16.msra.mxu0 %v7417_v27 }
 0x355   : > { %v955_v32 = vadd.f32 %v954_v30, %v953_v29  ;;  %v962_v33 = vrot.slane %v961_v31, 4  ;;  %v7422_v30 = vld [vmem:[#allocation16 + $0xec] ss:$16 sps:$4 sm:$0xff]  }
 0x357   : > { %v956_v34 = vrot.slane %v955_v32, 2  ;;  %v963_v35 = vadd.f32 %v962_v33, %v961_v31  ;;  %v7425_v31 = vld [vmem:[#allocation16 + $0x104] ss:$16 sps:$4 sm:$0xff]   ;;  %v7423_v33 = vld [vmem:[#allocation16 + $0x100] ss:$16 sps:$4 sm:$0xff]  }
 0x358   : > { %1679 = vmatprep.subr.bf16.mxu0 %v7425_v31 }
 0x359   : > { %v957_v36 = vadd.f32 %v956_v34, %v955_v32  ;;  %v964_v37 = vrot.slane %v963_v35, 2  ;;  %v7428_v32 = vld [vmem:[#allocation16 + $0x10c] ss:$16 sps:$4 sm:$0xff]   ;;  %v7426_v34 = vld [vmem:[#allocation16 + $0x108] ss:$16 sps:$4 sm:$0xff]   ;;  %1680 = vmatpush1.bf16.msra.mxu0 %v7423_v33 }
 0x35b   : > { %v958_v38 = vrot.slane %v957_v36, 1  ;;  %v965_v39 = vadd.f32 %v964_v37, %v963_v35  ;;  %v7431_v35 = vld [vmem:[#allocation16 + $0x124] ss:$16 sps:$4 sm:$0xff]   ;;  %v7429_v37 = vld [vmem:[#allocation16 + $0x120] ss:$16 sps:$4 sm:$0xff]  }
 0x35c   : > { %1681 = vmatprep.subr.bf16.mxu0 %v7431_v35 }
 0x35d   : > { %v966_v40 = vrot.slane %v965_v39, 1  ;;  %v959_v41 = vadd.f32 %v958_v38, %v957_v36  ;;  %v7434_v36 = vld [vmem:[#allocation16 + $0x12c] ss:$16 sps:$4 sm:$0xff]   ;;  %v7432_v38 = vld [vmem:[#allocation16 + $0x128] ss:$16 sps:$4 sm:$0xff]   ;;  %1682 = vmatpush1.bf16.msra.mxu0 %v7429_v37 }
 0x35f   : > { %v967_v42 = vadd.f32 %v966_v40, %v965_v39  ;;  %v960_v43 = vmul.f32 0.125, %v959_v41  ;;  %v7437_v39 = vld [vmem:[#allocation16 + $0x144] ss:$16 sps:$4 sm:$0xff]   ;;  %v7440_v40 = vld [vmem:[#allocation16 + $0x14c] ss:$16 sps:$4 sm:$0xff]  }
 0x360   : > { %v7435_v41 = vld [vmem:[#allocation16 + $0x140] ss:$16 sps:$4 sm:$0xff]   ;;  %1683 = vmatprep.subr.bf16.mxu0 %v7437_v39 }
 0x361   : > { %v968_v44 = vmul.f32 0.125, %v967_v42  ;;  %v969_v45 = vmul.f32 %v960_v43, %v960_v43  ;;  %v7438_v42 = vld [vmem:[#allocation16 + $0x148] ss:$16 sps:$4 sm:$0xff]   ;;  %1684 = vmatpush1.bf16.msra.mxu0 %v7435_v41 }
 0x363   : > { %v970_v46 = vsub.f32 %v968_v44, %v969_v45  ;;  %v7446_v44 = vld [vmem:[#allocation16 + $0x16c] ss:$16 sps:$4 sm:$0xff]   ;;  %v7441_v45 = vld [vmem:[#allocation16 + $0x160] ss:$16 sps:$4 sm:$0xff]  }
 0x365   : > { %v971_v47 = vmax.f32 %v970_v46, 0.0  ;;  %v7444_v46 = vld [vmem:[#allocation16 + $0x168] ss:$16 sps:$4 sm:$0xff]  }
 0x367   : > { %v972_v48 = vadd.f32 1e-05, %v971_v47  ;;  %v7449_v47 = vld [vmem:[#allocation16 + $0x184] ss:$16 sps:$4 sm:$0xff]  }
 0x369   : > { %7855 = vrsqrt.f32 %v972_v48  ;;  %v7452_v48 = vld [vmem:[#allocation16 + $0x18c] ss:$16 sps:$4 sm:$0xff]  }
 0x373   : > { %v7856_v53 = vpop.eup %7855 }
 0x374   : > { %v975_v54 = vmul.f32 %v7856_v53, %v974_v51  ;;  %v7450_v51 = vld [vmem:[#allocation16 + $0x188] ss:$16 sps:$4 sm:$0xff]   ;;  %v7455_v53 = vld [vmem:[#allocation16 + $0x1a4] ss:$16 sps:$4 sm:$0xff]  }
 0x376   : > { %v977_v56 = vmul.f32 %v975_v54, %v960_v43  ;;  %v983_v57 = vrot.slane %v975_v54, %v9144_v52  ;;  %v7443_v43 = vld [vmem:[#allocation16 + $0x164] ss:$16 sps:$4 sm:$0xff]   ;;  %v7458_v54 = vld [vmem:[#allocation16 + $0x1ac] ss:$16 sps:$4 sm:$0xff]  }
 0x377   : > { %1685 = vmatprep.subr.bf16.mxu0 %v7443_v43 }
 0x378   : > { %v978_v58 = vsub.f32 %v976_v55, %v977_v56  ;;  %v985_v59 = vmul.f32 %v983_v57, %v953_v29  ;;  %v7420_v29 = vld [vmem:[#allocation16 + $0xe8] ss:$16 sps:$4 sm:$0xff]   ;;  %1686 = vmatpush1.bf16.msra.mxu0 %v7441_v45  ;;  %v7453_v55 = vld [vmem:[#allocation16 + $0x1a0] ss:$16 sps:$4 sm:$0xff]   ;;  %v7461_v57 = vld [vmem:[#allocation16 + $0x1c4] ss:$16 sps:$4 sm:$0xff]  }
 0x379   : > { %1687 = vmatprep.subr.bf16.mxu0 %v7449_v47  ;;  %v7456_v56 = vld [vmem:[#allocation16 + $0x1a8] ss:$16 sps:$4 sm:$0xff]  }
 0x37a   : > { %v990_v60 = vrot.slane %v978_v58, %v9144_v52  ;;  %v7464_v58 = vld [vmem:[#allocation16 + $0x1cc] ss:$16 sps:$4 sm:$0xff]  }
 0x37c   : > { %v992_v61 = vadd.f32 %v990_v60, %v985_v59  ;;  %1688 = vmatpush1.bf16.msra.mxu0 %v7447_v49  ;;  %v7459_v59 = vld [vmem:[#allocation16 + $0x1c0] ss:$16 sps:$4 sm:$0xff]   ;;  %v7462_v60 = vld [vmem:[#allocation16 + $0x1c8] ss:$16 sps:$4 sm:$0xff]  }
 0x37d   : > { %1689 = vmatprep.subr.bf16.mxu0 %v7455_v53 }
 0x37e   : > { %v993_v62 = vpack.c.bf16 %v992_v61, %v992_v61  ;;  %v7467_v61 = vld [vmem:[#allocation16 + $0x1e4] ss:$16 sps:$4 sm:$0xff]  }
 0x380   : > { %1135 = vmatmul.mubr.bf16.vlgmr.msra.gmra.mrb[0].mxu1 %v993_v62  ;;  %1690 = vmatpush1.bf16.msra.mxu0 %v7453_v55  ;;  %v7470_v62 = vld [vmem:[#allocation16 + $0x1ec] ss:$16 sps:$4 sm:$0xff]   ;;  %v8523_v55 = vmov 1966171168  }
 0x381   : > { %1705 = vmatpush1.bf16.msra.mxu1 %v7378_v2  ;;  %1691 = vmatprep.subr.bf16.mxu0 %v7461_v57  ;;  %v9149_v2 = vsub.s32 1, %v9141_v50 }
 0x382   : > { %1706 = vmatprep.subr.bf16.mxu1 %v7386_v4 }
 0x383   : > { %v1019_v4 = vrot.slane %v1010_v1, %v9149_v2 }
 0x384   : > { %1692 = vmatpush1.bf16.msra.mxu0 %v7459_v59 }
 0x385   : > { %1707 = vmatpush1.bf16.msra.mxu1 %v7384_v6  ;;  %1693 = vmatprep.subr.bf16.mxu0 %v7467_v61 }
 0x386   : > { %1708 = vmatprep.subr.bf16.mxu1 %v7392_v8 }
 0x388   : > { %1694 = vmatpush1.bf16.msra.mxu0 %v7465_v63  ;;  %v1187_v63 = vld [vmem:[#allocation13] sm:$0x3] }
 0x389   : > { %1709 = vmatpush1.bf16.msra.mxu1 %v7390_v10 }
 0x38a   : > { %1710 = vmatprep.subr.bf16.mxu1 %v7398_v12 }
 0x38d   : > { %1711 = vmatpush1.bf16.msra.mxu1 %v7396_v14 }
 0x38e   : > { %1712 = vmatprep.subr.bf16.mxu1 %v7404_v16 }
 0x391   : > { %1713 = vmatpush1.bf16.msra.mxu1 %v7402_v18 }
 0x392   : > { %1714 = vmatprep.subr.bf16.mxu1 %v7410_v20 }
 0x395   : > { %1715 = vmatpush1.bf16.msra.mxu1 %v7408_v22 }
 0x396   : > { %1716 = vmatprep.subr.bf16.mxu1 %v7416_v24 }
 0x399   : > { %1717 = vmatpush1.bf16.msra.mxu1 %v7414_v26 }
 0x39a   : > { %1718 = vmatprep.subr.bf16.mxu1 %v7422_v30 }
 0x39d   : > { %1719 = vmatpush1.bf16.msra.mxu1 %v7420_v29 }
 0x39e   : > { %1720 = vmatprep.subr.bf16.mxu1 %v7428_v32 }
 0x3a1   : > { %1721 = vmatpush1.bf16.msra.mxu1 %v7426_v34 }
 0x3a2   : > { %1722 = vmatprep.subr.bf16.mxu1 %v7434_v36 }
 0x3a5   : > { %1723 = vmatpush1.bf16.msra.mxu1 %v7432_v38 }
 0x3a6   : > { %1724 = vmatprep.subr.bf16.mxu1 %v7440_v40 }
 0x3a9   : > { %1725 = vmatpush1.bf16.msra.mxu1 %v7438_v42 }
 0x3aa   : > { %1726 = vmatprep.subr.bf16.mxu1 %v7446_v44 }
 0x3ad   : > { %1727 = vmatpush1.bf16.msra.mxu1 %v7444_v46 }
 0x3ae   : > { %1728 = vmatprep.subr.bf16.mxu1 %v7452_v48 }
 0x3b1   : > { %1729 = vmatpush1.bf16.msra.mxu1 %v7450_v51 }
 0x3b2   : > { %1730 = vmatprep.subr.bf16.mxu1 %v7458_v54 }
 0x3b5   : > { %1731 = vmatpush1.bf16.msra.mxu1 %v7456_v56  ;;  %v1192_v56 = vunpack.c.l.s4 %v8523_v55  ;;  %v1989_v55 = vld [vmem:[#allocation22 + $0x120] sm:$0xff] }
 0x3b6   : > { %1732 = vmatprep.subr.bf16.mxu1 %v7464_v58 }
 0x3b7   : > { %v1193_v57 = vunpack.c.0.s8 %v1192_v56  ;;  %v1986_v56 = vld [vmem:[#allocation22 + $0x108] sm:$0xff] }
 0x3b9   : > { %1733 = vmatpush1.bf16.msra.mxu1 %v7462_v60  ;;  %v9154_v59 = vsub.s32 %v1193_v57, %v9141_v50 }
 0x3ba   : > { %1734 = vmatprep.subr.bf16.mxu1 %v7470_v62 }
 0x3bd   : > { %1735 = vmatpush1.bf16.msra.mxu1 %v7468_v0 }
 0x453   : > { %v1136_v5 = vpop.f32.mrb[0].mxu1 }
 0x454   : > { %v1137_v6 = vadd.f32 %v1136_v5, %v1015_v3  ;;  %v1138_v7 = vpop.f32.mrb[1].mxu1 }
 0x455   : > { %v1139_v8 = vadd.f32 %v1138_v7, %v1019_v4  ;;  %v1140_v9 = vpop.f32.mrb[2].mxu1 }
 0x456   : > { %v1143_v10 = vmul.f32 0.2, %v1137_v6  ;;  %v1141_v11 = vpop.f32.mrb[3].mxu1 }
 0x457   : > { %v1144_v12 = vmul.f32 0.2, %v1139_v8  ;;  %v1207_v11 = vld [vmem:[#allocation15] sm:$0x3] }
 0x458   : > { %v1145_v13 = vmax.f32 %v1137_v6, %v1143_v10 }
 0x459   : > { %v1146_v14 = vmax.f32 %v1139_v8, %v1144_v12 }
 0x45a   : > { %v1147_v15 = vrot.slane %v1145_v13, 4  ;;  %v1161_v16 = vmul.f32 %v1145_v13, %v1145_v13 }
 0x45b   : > { %v1153_v17 = vrot.slane %v1146_v14, 4  ;;  %v1162_v18 = vmul.f32 %v1146_v14, %v1146_v14 }
 0x45c   : > { %v1148_v19 = vadd.f32 %v1147_v15, %v1145_v13  ;;  %v1163_v20 = vrot.slane %v1161_v16, 4 }
 0x45d   : > { %v1154_v21 = vadd.f32 %v1153_v17, %v1146_v14  ;;  %v1169_v22 = vrot.slane %v1162_v18, 4 }
 0x45e   : > { %v1149_v23 = vrot.slane %v1148_v19, 2  ;;  %v1164_v24 = vadd.f32 %v1163_v20, %v1161_v16 }
 0x45f   : > { %v1155_v25 = vrot.slane %v1154_v21, 2  ;;  %v1170_v26 = vadd.f32 %v1169_v22, %v1162_v18  ;;  %v1954_v22 = vld [vmem:[#allocation22 + $0x8] sm:$0xff] }
 0x460   : > { %v1150_v27 = vadd.f32 %v1149_v23, %v1148_v19  ;;  %v1165_v28 = vrot.slane %v1164_v24, 2 }
 0x461   : > { %v1156_v29 = vadd.f32 %v1155_v25, %v1154_v21  ;;  %v1171_v30 = vrot.slane %v1170_v26, 2 }
 0x462   : > { %v1151_v31 = vrot.slane %v1150_v27, 1  ;;  %v1166_v32 = vadd.f32 %v1165_v28, %v1164_v24  ;;  %v1958_v24 = vld [vmem:[#allocation22 + $0x28] sm:$0xff]  ;;  %v1961_v28 = vld [vmem:[#allocation22 + $0x40] sm:$0xff] }
 0x463   : > { %v1157_v33 = vrot.slane %v1156_v29, 1  ;;  %v1172_v34 = vadd.f32 %v1171_v30, %v1170_v26  ;;  %v6545_v26 = vcombine.low %v1954_v22, %v1958_v24  ;;  %v1962_v30 = vld [vmem:[#allocation22 + $0x48] sm:$0xff] }
 0x464   : > { %v1152_v35 = vadd.f32 %v1151_v31, %v1150_v27  ;;  %v1167_v36 = vrot.slane %v1166_v32, 1  ;;  %v6546_v27 = vcombine.high %v1954_v22, %v1958_v24  ;;  %v2017_v24 = vld [vmem:[#allocation22 + $0x200] sm:$0xff] }
 0x465   : > { %v1173_v37 = vrot.slane %v1172_v34, 1  ;;  %v1158_v38 = vadd.f32 %v1157_v33, %v1156_v29  ;;  %v1965_v29 = vld [vmem:[#allocation22 + $0x60] sm:$0xff] }
 0x466   : > { %v1159_v39 = vmul.f32 0.125, %v1152_v35  ;;  %v1168_v40 = vadd.f32 %v1167_v36, %v1166_v32  ;;  %3613 = vmatprep.subr.bf16.mxu1 %v6546_v27  ;;  %v6552_v31 = vcombine.high %v1961_v28, %v1965_v29  ;;  %v1966_v32 = vld [vmem:[#allocation22 + $0x68] sm:$0xff]  ;;  %v6551_v33 = vcombine.low %v1961_v28, %v1965_v29  ;;  %v1969_v36 = vld [vmem:[#allocation22 + $0x80] sm:$0xff] }
 0x467   : > { %v1174_v41 = vadd.f32 %v1173_v37, %v1172_v34  ;;  %v1160_v42 = vmul.f32 0.125, %v1158_v38  ;;  %v6553_v34 = vcombine.low %v1962_v30, %v1966_v32  ;;  %v6554_v35 = vcombine.high %v1962_v30, %v1966_v32  ;;  %v1973_v37 = vld [vmem:[#allocation22 + $0xa0] sm:$0xff]  ;;  %v1970_v38 = vld [vmem:[#allocation22 + $0x88] sm:$0xff] }
 0x468   : > { %v1175_v43 = vmul.f32 0.125, %v1168_v40  ;;  %v1177_v44 = vmul.f32 %v1159_v39, %v1159_v39  ;;  %v1974_v40 = vld [vmem:[#allocation22 + $0xa8] sm:$0xff]  ;;  %v2025_v32 = vld [vmem:[#allocation22 + $0x240] sm:$0xff] }
 0x469   : > { %v1176_v45 = vmul.f32 0.125, %v1174_v41  ;;  %v1178_v46 = vmul.f32 %v1160_v42, %v1160_v42  ;;  %v6559_v41 = vcombine.low %v1969_v36, %v1973_v37  ;;  %v2022_v28 = vld [vmem:[#allocation22 + $0x228] sm:$0xff] }
 0x46a   : > { %v1179_v47 = vsub.f32 %v1175_v43, %v1177_v44  ;;  %v6562_v43 = vcombine.high %v1970_v38, %v1974_v40  ;;  %v1977_v44 = vld [vmem:[#allocation22 + $0xc0] sm:$0xff] }
 0x46b   : > { %v1180_v48 = vsub.f32 %v1176_v45, %v1178_v46  ;;  %v1981_v45 = vld [vmem:[#allocation22 + $0xe0] sm:$0xff]  ;;  %v1978_v46 = vld [vmem:[#allocation22 + $0xc8] sm:$0xff] }
 0x46c   : > { %v1181_v49 = vmax.f32 %v1179_v47, 0.0  ;;  %v6568_v47 = vcombine.high %v1977_v44, %v1981_v45 }
 0x46d   : > { %v1182_v51 = vmax.f32 %v1180_v48, 0.0  ;;  %v1982_v48 = vld [vmem:[#allocation22 + $0xe8] sm:$0xff] }
 0x46e   : > { %v1183_v53 = vadd.f32 1e-05, %v1181_v49  ;;  %v6567_v49 = vcombine.low %v1977_v44, %v1981_v45  ;;  %v2038_v44 = vld [vmem:[#allocation22 + $0x2a8] sm:$0xff] }
 0x46f   : > { %v1184_v54 = vadd.f32 1e-05, %v1182_v51  ;;  %v6569_v51 = vcombine.low %v1978_v46, %v1982_v48 }
 0x470   : > { %7857 = vrsqrt.f32 %v1183_v53  ;;  %v6570_v53 = vcombine.high %v1978_v46, %v1982_v48  ;;  %v2041_v48 = vld [vmem:[#allocation22 + $0x2c0] sm:$0xff] }
 0x471   : > { %7859 = vrsqrt.f32 %v1184_v54  ;;  %v1985_v54 = vld [vmem:[#allocation22 + $0x100] sm:$0xff] }
 0x472   : > { %v6576_v57 = vcombine.high %v1985_v54, %v1989_v55 }
 0x47a   : > { %v7858_v58 = vpop.eup %7857 }
 0x47b   : > { %v7860_v60 = vpop.eup %7859 }
 0x47c   : > { %v1190_v61 = vcombine.low %v7858_v58, %v7860_v60  ;;  %v1990_v58 = vld [vmem:[#allocation22 + $0x128] sm:$0xff]  ;;  %v6575_v60 = vcombine.low %v1985_v54, %v1989_v55 }
 0x47d   : > { %v2046_v54 = vld [vmem:[#allocation22 + $0x2e8] sm:$0xff] }
 0x47e   : > { %v1197_v62 = vrot.slane %v1190_v61, %v9154_v59  ;;  %v6577_v61 = vcombine.low %v1986_v56, %v1990_v58 }
 0x480   : > { %v1204_v0 = vrot.slane %v1197_v62, %v9154_v59  ;;  %v6578_v62 = vcombine.high %v1986_v56, %v1990_v58  ;;  %v2049_v58 = vld [vmem:[#allocation22 + $0x300] sm:$0xff] }
 0x482   : > { %v1206_v1 = vmul.f32 %v1204_v0, %v1187_v63  ;;  %v1993_v63 = vld [vmem:[#allocation22 + $0x140] sm:$0xff] }
 0x483   : > { %v1997_v0 = vld [vmem:[#allocation22 + $0x160] sm:$0xff] }
 0x484   : > { %v1212_v3 = vrot.slane %v1206_v1, %v9144_v52  ;;  %v1216_v4 = vrot.slane %v1206_v1, %v9149_v2  ;;  %v1994_v1 = vld [vmem:[#allocation22 + $0x148] sm:$0xff] }
 0x486   : > { %v1219_v5 = vmul.f32 %v1212_v3, %v1159_v39  ;;  %v1220_v6 = vmul.f32 %v1216_v4, %v1160_v42  ;;  %v1241_v7 = vmul.f32 %v1216_v4, %v1146_v14  ;;  %v1240_v8 = vmul.f32 %v1212_v3, %v1145_v13  ;;  %v1953_v13 = vld [vmem:[#allocation22] sm:$0xff]  ;;  %v1998_v4 = vld [vmem:[#allocation22 + $0x168] sm:$0xff] }
 0x487   : > { %v1957_v14 = vld [vmem:[#allocation22 + $0x20] sm:$0xff]  ;;  %v6560_v39 = vcombine.high %v1969_v36, %v1973_v37  ;;  %v6561_v42 = vcombine.low %v1970_v38, %v1974_v40  ;;  %v6584_v3 = vcombine.high %v1993_v63, %v1997_v0  ;;  %v2030_v36 = vld [vmem:[#allocation22 + $0x268] sm:$0xff] }
 0x488   : > { %v1223_v9 = vcombine.low %v1219_v5, %v1220_v6  ;;  %v6544_v23 = vcombine.high %v1953_v13, %v1957_v14  ;;  %v6543_v25 = vcombine.low %v1953_v13, %v1957_v14  ;;  %v6583_v5 = vcombine.low %v1993_v63, %v1997_v0  ;;  %v2014_v13 = vld [vmem:[#allocation22 + $0x1e8] sm:$0xff]  ;;  %v2033_v40 = vld [vmem:[#allocation22 + $0x280] sm:$0xff] }
 0x489   : > { %v6585_v6 = vcombine.low %v1994_v1, %v1998_v4  ;;  %v2054_v63 = vld [vmem:[#allocation22 + $0x328] sm:$0xff] }
 0x48a   : > { %v1230_v10 = vrot.slane %v1223_v9, %v9154_v59  ;;  %3531 = vmatprep.subr.bf16.mxu0 %v6544_v23  ;;  %v2005_v9 = vld [vmem:[#allocation22 + $0x1a0] sm:$0xff] }
 0x48c   : > { %v1237_v12 = vrot.slane %v1230_v10, %v9154_v59  ;;  %v2002_v10 = vld [vmem:[#allocation22 + $0x188] sm:$0xff] }
 0x48e   : > { %v1239_v15 = vsub.f32 %v1207_v11, %v1237_v12  ;;  %v2006_v12 = vld [vmem:[#allocation22 + $0x1a8] sm:$0xff] }
 0x490   : > { %v1250_v16 = vrot.slane %v1239_v15, %v9149_v2  ;;  %v1246_v17 = vrot.slane %v1239_v15, %v9144_v52 }
 0x492   : > { %v1254_v18 = vadd.f32 %v1250_v16, %v1241_v7  ;;  %v1253_v19 = vadd.f32 %v1246_v17, %v1240_v8  ;;  %v6586_v7 = vcombine.high %v1994_v1, %v1998_v4  ;;  %v2001_v8 = vld [vmem:[#allocation22 + $0x180] sm:$0xff]  ;;  %v6593_v16 = vcombine.low %v2002_v10, %v2006_v12 }
 0x493   : > { %v6592_v11 = vcombine.high %v2001_v8, %v2005_v9  ;;  %v6591_v15 = vcombine.low %v2001_v8, %v2005_v9  ;;  %v6594_v17 = vcombine.high %v2002_v10, %v2006_v12  ;;  %v2057_v4 = vld [vmem:[#allocation22 + $0x340] sm:$0xff]  ;;  %v2062_v9 = vld [vmem:[#allocation22 + $0x368] sm:$0xff] }
 0x494   : > { %v1256_v20 = vpack.c.bf16 %v1254_v18, %v1254_v18  ;;  %v1255_v21 = vpack.c.bf16 %v1253_v19, %v1253_v19  ;;  %v2009_v18 = vld [vmem:[#allocation22 + $0x1c0] sm:$0xff] }
 0x495   : > { %v2013_v19 = vld [vmem:[#allocation22 + $0x1e0] sm:$0xff] }
 0x496   : > { %1695 = vmatprep.mubr.bf16.mxu0 %v1256_v20  ;;  %1736 = vmatprep.mubr.bf16.mxu1 %v1256_v20  ;;  %v2010_v20 = vld [vmem:[#allocation22 + $0x1c8] sm:$0xff]  ;;  %v6599_v14 = vcombine.low %v2009_v18, %v2013_v19  ;;  %v2065_v10 = vld [vmem:[#allocation22 + $0x380] sm:$0xff] }
 0x497   : > { %1696 = vmatmul.mubr.bf16.vlgmr.msra.gmra.mrb[4].mxu0 %v1255_v21  ;;  %1737 = vmatmul.mubr.bf16.vlgmr.msra.gmra.mrb[4].mxu1 %v1255_v21  ;;  %v6600_v21 = vcombine.high %v2009_v18, %v2013_v19  ;;  %v6601_v22 = vcombine.low %v2010_v20, %v2014_v13  ;;  %v6602_v23 = vcombine.high %v2010_v20, %v2014_v13  ;;  %v2070_v18 = vld [vmem:[#allocation22 + $0x3a8] sm:$0xff]  ;;  %v2073_v19 = vld [vmem:[#allocation22 + $0x3c0] sm:$0xff] }
 0x498   : > { %3532 = vmatpush1.bf16.msra.mxu0 %v6543_v25  ;;  %3614 = vmatpush1.bf16.msra.mxu1 %v6545_v26  ;;  %v2021_v25 = vld [vmem:[#allocation22 + $0x220] sm:$0xff]  ;;  %v2018_v26 = vld [vmem:[#allocation22 + $0x208] sm:$0xff] }
 0x499   : > { %3533 = vmatprep.subr.bf16.mxu0 %v6552_v31  ;;  %3615 = vmatprep.subr.bf16.mxu1 %v6554_v35  ;;  %v6608_v27 = vcombine.high %v2017_v24, %v2021_v25  ;;  %v6607_v29 = vcombine.low %v2017_v24, %v2021_v25  ;;  %v6609_v30 = vcombine.low %v2018_v26, %v2022_v28  ;;  %v2026_v35 = vld [vmem:[#allocation22 + $0x248] sm:$0xff] }
 0x49a   : > { %v6610_v31 = vcombine.high %v2018_v26, %v2022_v28  ;;  %v6617_v38 = vcombine.low %v2026_v35, %v2030_v36  ;;  %v2074_v13 = vld [vmem:[#allocation22 + $0x3c8] sm:$0xff]  ;;  %v9164_v28 = vld [vmem:[#allocation22 + $0x400] sm:$0xff] }
 0x49c   : > { %3534 = vmatpush1.bf16.msra.mxu0 %v6551_v33  ;;  %3616 = vmatpush1.bf16.msra.mxu1 %v6553_v34  ;;  %v2029_v33 = vld [vmem:[#allocation22 + $0x260] sm:$0xff] }
 0x49d   : > { %3535 = vmatprep.subr.bf16.mxu0 %v6560_v39  ;;  %3617 = vmatprep.subr.bf16.mxu1 %v6562_v43  ;;  %v6616_v34 = vcombine.high %v2025_v32, %v2029_v33  ;;  %v6615_v37 = vcombine.low %v2025_v32, %v2029_v33  ;;  %v6618_v39 = vcombine.high %v2026_v35, %v2030_v36  ;;  %v9172_v32 = vld [vmem:[#allocation22 + $0x428] sm:$0xff]  ;;  %v9181_v36 = vsub.s32 2, %v9141_v50 }
 0x4a0   : > { %3536 = vmatpush1.bf16.msra.mxu0 %v6559_v41  ;;  %3618 = vmatpush1.bf16.msra.mxu1 %v6561_v42  ;;  %v2037_v41 = vld [vmem:[#allocation22 + $0x2a0] sm:$0xff]  ;;  %v2034_v42 = vld [vmem:[#allocation22 + $0x288] sm:$0xff] }
 0x4a1   : > { %3537 = vmatprep.subr.bf16.mxu0 %v6568_v47  ;;  %3619 = vmatprep.subr.bf16.mxu1 %v6570_v53  ;;  %v6624_v43 = vcombine.high %v2033_v40, %v2037_v41  ;;  %v6623_v45 = vcombine.low %v2033_v40, %v2037_v41  ;;  %v6625_v46 = vcombine.low %v2034_v42, %v2038_v44 }
 0x4a2   : > { %v6626_v47 = vcombine.high %v2034_v42, %v2038_v44 }
 0x4a4   : > { %3538 = vmatpush1.bf16.msra.mxu0 %v6567_v49  ;;  %3620 = vmatpush1.bf16.msra.mxu1 %v6569_v51  ;;  %v2045_v49 = vld [vmem:[#allocation22 + $0x2e0] sm:$0xff]  ;;  %v2042_v51 = vld [vmem:[#allocation22 + $0x2c8] sm:$0xff] }
 0x4a5   : > { %3539 = vmatprep.subr.bf16.mxu0 %v6576_v57  ;;  %3621 = vmatprep.subr.bf16.mxu1 %v6578_v62  ;;  %v6632_v53 = vcombine.high %v2041_v48, %v2045_v49  ;;  %v6631_v55 = vcombine.low %v2041_v48, %v2045_v49  ;;  %v6633_v56 = vcombine.low %v2042_v51, %v2046_v54 }
 0x4a6   : > { %v6634_v57 = vcombine.high %v2042_v51, %v2046_v54 }
 0x4a8   : > { %3540 = vmatpush1.bf16.msra.mxu0 %v6575_v60  ;;  %3622 = vmatpush1.bf16.msra.mxu1 %v6577_v61  ;;  %v2053_v60 = vld [vmem:[#allocation22 + $0x320] sm:$0xff]  ;;  %v2050_v61 = vld [vmem:[#allocation22 + $0x308] sm:$0xff] }
 0x4a9   : > { %3541 = vmatprep.subr.bf16.mxu0 %v6584_v3  ;;  %3623 = vmatprep.subr.bf16.mxu1 %v6586_v7  ;;  %v6640_v62 = vcombine.high %v2049_v58, %v2053_v60  ;;  %v6639_v0 = vcombine.low %v2049_v58, %v2053_v60  ;;  %v6641_v1 = vcombine.low %v2050_v61, %v2054_v63 }
 0x4aa   : > { %v6642_v3 = vcombine.high %v2050_v61, %v2054_v63 }
 0x4ac   : > { %3542 = vmatpush1.bf16.msra.mxu0 %v6583_v5  ;;  %3624 = vmatpush1.bf16.msra.mxu1 %v6585_v6  ;;  %v2061_v5 = vld [vmem:[#allocation22 + $0x360] sm:$0xff]  ;;  %v2058_v6 = vld [vmem:[#allocation22 + $0x348] sm:$0xff] }
 0x4ad   : > { %3543 = vmatprep.subr.bf16.mxu0 %v6592_v11  ;;  %3625 = vmatprep.subr.bf16.mxu1 %v6594_v17  ;;  %v6647_v7 = vcombine.low %v2057_v4, %v2061_v5  ;;  %v6648_v8 = vcombine.high %v2057_v4, %v2061_v5  ;;  %v2069_v11 = vld [vmem:[#allocation22 + $0x3a0] sm:$0xff]  ;;  %v6649_v12 = vcombine.low %v2058_v6, %v2062_v9  ;;  %v2066_v17 = vld [vmem:[#allocation22 + $0x388] sm:$0xff] }
 0x4ae   : > { %v6658_v20 = vcombine.high %v2066_v17, %v2070_v18 }
 0x4b0   : > { %3544 = vmatpush1.bf16.msra.mxu0 %v6591_v15  ;;  %3626 = vmatpush1.bf16.msra.mxu1 %v6593_v16  ;;  %v6650_v15 = vcombine.high %v2058_v6, %v2062_v9  ;;  %v6656_v16 = vcombine.high %v2065_v10, %v2069_v11 }
 0x4b1   : > { %3545 = vmatprep.subr.bf16.mxu0 %v6600_v21  ;;  %3627 = vmatprep.subr.bf16.mxu1 %v6602_v23  ;;  %v2077_v21 = vld [vmem:[#allocation22 + $0x3e0] sm:$0xff]  ;;  %v6657_v23 = vcombine.low %v2066_v17, %v2070_v18 }
 0x4b2   : > { %v6664_v24 = vcombine.high %v2073_v19, %v2077_v21  ;;  %v6663_v26 = vcombine.low %v2073_v19, %v2077_v21 }
 0x4b4   : > { %3546 = vmatpush1.bf16.msra.mxu0 %v6599_v14  ;;  %3628 = vmatpush1.bf16.msra.mxu1 %v6601_v22  ;;  %v2078_v14 = vld [vmem:[#allocation22 + $0x3e8] sm:$0xff]  ;;  %v6655_v22 = vcombine.low %v2065_v10, %v2069_v11 }
 0x4b5   : > { %3547 = vmatprep.subr.bf16.mxu0 %v6608_v27  ;;  %3629 = vmatprep.subr.bf16.mxu1 %v6610_v31  ;;  %v6666_v25 = vcombine.high %v2074_v13, %v2078_v14  ;;  %v6665_v27 = vcombine.low %v2074_v13, %v2078_v14 }
 0x4b8   : > { %3548 = vmatpush1.bf16.msra.mxu0 %v6607_v29  ;;  %3630 = vmatpush1.bf16.msra.mxu1 %v6609_v30  ;;  %v9166_v29 = vld [vmem:[#allocation22 + $0x420] sm:$0xff]  ;;  %v9168_v30 = vld [vmem:[#allocation22 + $0x408] sm:$0xff] }
 0x4b9   : > { %3549 = vmatprep.subr.bf16.mxu0 %v6616_v34  ;;  %3631 = vmatprep.subr.bf16.mxu1 %v6618_v39  ;;  %v6672_v31 = vcombine.high %v9164_v28, %v9166_v29  ;;  %v6671_v33 = vcombine.low %v9164_v28, %v9166_v29  ;;  %v6673_v34 = vcombine.low %v9168_v30, %v9172_v32 }
 0x4ba   : > { %v6674_v35 = vcombine.high %v9168_v30, %v9172_v32 }
 0x4bc   : > { %3550 = vmatpush1.bf16.msra.mxu0 %v6615_v37  ;;  %3632 = vmatpush1.bf16.msra.mxu1 %v6617_v38  ;;  %v1321_v37 = vld [vmem:[#allocation18] sm:$0xf]  ;;  %v9184_v38 = vsub.s32 3, %v9141_v50 }
 0x4bd   : > { %3551 = vmatprep.subr.bf16.mxu0 %v6624_v43  ;;  %3633 = vmatprep.subr.bf16.mxu1 %v6626_v47  ;;  %v1326_v39 = vrot.slane %v1321_v37, %v9144_v52  ;;  %v1334_v40 = vrot.slane %v1321_v37, %v9181_v36  ;;  %v1330_v41 = vrot.slane %v1321_v37, %v9149_v2 }
 0x4be   : > { %v1338_v42 = vrot.slane %v1321_v37, %v9184_v38 }
 0x4c0   : > { %3552 = vmatpush1.bf16.msra.mxu0 %v6623_v45  ;;  %3634 = vmatpush1.bf16.msra.mxu1 %v6625_v46 }
 0x4c1   : > { %3553 = vmatprep.subr.bf16.mxu0 %v6632_v53  ;;  %3635 = vmatprep.subr.bf16.mxu1 %v6634_v57 }
 0x4c4   : > { %3554 = vmatpush1.bf16.msra.mxu0 %v6631_v55  ;;  %3636 = vmatpush1.bf16.msra.mxu1 %v6633_v56 }
 0x4c5   : > { %3555 = vmatprep.subr.bf16.mxu0 %v6640_v62  ;;  %3637 = vmatprep.subr.bf16.mxu1 %v6642_v3 }
 0x4c8   : > { %3556 = vmatpush1.bf16.msra.mxu0 %v6639_v0  ;;  %3638 = vmatpush1.bf16.msra.mxu1 %v6641_v1 }
 0x4c9   : > { %3557 = vmatprep.subr.bf16.mxu0 %v6648_v8  ;;  %3639 = vmatprep.subr.bf16.mxu1 %v6650_v15 }
 0x4cc   : > { %3558 = vmatpush1.bf16.msra.mxu0 %v6647_v7  ;;  %3640 = vmatpush1.bf16.msra.mxu1 %v6649_v12 }
 0x4cd   : > { %3559 = vmatprep.subr.bf16.mxu0 %v6656_v16  ;;  %3641 = vmatprep.subr.bf16.mxu1 %v6658_v20 }
 0x4d0   : > { %3560 = vmatpush1.bf16.msra.mxu0 %v6655_v22  ;;  %3642 = vmatpush1.bf16.msra.mxu1 %v6657_v23 }
 0x4d1   : > { %3561 = vmatprep.subr.bf16.mxu0 %v6664_v24  ;;  %3643 = vmatprep.subr.bf16.mxu1 %v6666_v25 }
 0x4d4   : > { %3562 = vmatpush1.bf16.msra.mxu0 %v6663_v26  ;;  %3644 = vmatpush1.bf16.msra.mxu1 %v6665_v27 }
 0x4d5   : > { %3572 = vmatprep.subr.bf16.mxu0 %v6672_v31  ;;  %3654 = vmatprep.subr.bf16.mxu1 %v6674_v35 }
 0x56a   : > { %v1697_v43 = vpop.f32.mrb[4].mxu0  ;;  %v1738_v44 = vpop.f32.mrb[4].mxu1 }
 0x56b   : > { %v1698_v45 = vadd.f32 %v1697_v43, %v1326_v39  ;;  %v1739_v46 = vadd.f32 %v1738_v44, %v1334_v40  ;;  %v1699_v47 = vpop.f32.mrb[5].mxu0  ;;  %v1740_v48 = vpop.f32.mrb[5].mxu1 }
 0x56c   : > { %v1700_v49 = vadd.f32 %v1699_v47, %v1330_v41  ;;  %v1741_v51 = vadd.f32 %v1740_v48, %v1338_v42  ;;  %v1701_v53 = vpop.f32.mrb[6].mxu0  ;;  %v1742_v54 = vpop.f32.mrb[6].mxu1 }
 0x56d   : > { %v1745_v55 = vmul.f32 0.2, %v1698_v45  ;;  %v1747_v56 = vmul.f32 0.2, %v1739_v46  ;;  %v1702_v57 = vpop.f32.mrb[7].mxu0  ;;  %v1743_v58 = vpop.f32.mrb[7].mxu1 }
 0x56e   : > { %v1746_v60 = vmul.f32 0.2, %v1700_v49  ;;  %v1748_v61 = vmul.f32 0.2, %v1741_v51 }
 0x56f   : > { %v9190_v62 = vmax.f32 %v1698_v45, %v1745_v55  ;;  %v9192_v63 = vmax.f32 %v1739_v46, %v1747_v56 }
 0x570   : > { %v9194_v0 = vmax.f32 %v1700_v49, %v1746_v60  ;;  %v9196_v1 = vmax.f32 %v1741_v51, %v1748_v61 }
 0x571   : > { %v1753_v3 = vrot.slane %v9190_v62, 4  ;;  %v1781_v4 = vmul.f32 %v9190_v62, %v9190_v62  ;;  %v1765_v5 = vrot.slane %v9192_v63, 4  ;;  %v1783_v6 = vmul.f32 %v9192_v63, %v9192_v63 }
 0x572   : > { %v1759_v7 = vrot.slane %v9194_v0, 4  ;;  %v1782_v8 = vmul.f32 %v9194_v0, %v9194_v0  ;;  %v1771_v9 = vrot.slane %v9196_v1, 4  ;;  %v1784_v10 = vmul.f32 %v9196_v1, %v9196_v1 }
 0x573   : > { %v1754_v11 = vadd.f32 %v1753_v3, %v9190_v62  ;;  %v1785_v12 = vrot.slane %v1781_v4, 4  ;;  %v1766_v15 = vadd.f32 %v1765_v5, %v9192_v63  ;;  %v1797_v16 = vrot.slane %v1783_v6, 4 }
 0x574   : > { %v1760_v17 = vadd.f32 %v1759_v7, %v9194_v0  ;;  %v1791_v18 = vrot.slane %v1782_v8, 4  ;;  %v1772_v19 = vadd.f32 %v1771_v9, %v9196_v1  ;;  %v1803_v20 = vrot.slane %v1784_v10, 4 }
 0x575   : > { %v1755_v21 = vrot.slane %v1754_v11, 2  ;;  %v1786_v13 = vadd.f32 %v1785_v12, %v1781_v4  ;;  %v1767_v14 = vrot.slane %v1766_v15, 2  ;;  %v1798_v22 = vadd.f32 %v1797_v16, %v1783_v6 }
 0x576   : > { %v1761_v23 = vrot.slane %v1760_v17, 2  ;;  %v1792_v24 = vadd.f32 %v1791_v18, %v1782_v8  ;;  %v1773_v25 = vrot.slane %v1772_v19, 2  ;;  %v1804_v26 = vadd.f32 %v1803_v20, %v1784_v10 }
 0x577   : > { %v1756_v27 = vadd.f32 %v1755_v21, %v1754_v11  ;;  %v1787_v31 = vrot.slane %v1786_v13, 2  ;;  %v1768_v35 = vadd.f32 %v1767_v14, %v1766_v15  ;;  %v1799_v37 = vrot.slane %v1798_v22, 2 }
 0x578   : > { %v1762_v39 = vadd.f32 %v1761_v23, %v1760_v17  ;;  %v1793_v40 = vrot.slane %v1792_v24, 2  ;;  %v1774_v41 = vadd.f32 %v1773_v25, %v1772_v19  ;;  %v1805_v42 = vrot.slane %v1804_v26, 2 }
 0x579   : > { %v1757_v43 = vrot.slane %v1756_v27, 1  ;;  %v1788_v44 = vadd.f32 %v1787_v31, %v1786_v13  ;;  %v1769_v45 = vrot.slane %v1768_v35, 1  ;;  %v1800_v46 = vadd.f32 %v1799_v37, %v1798_v22 }
 0x57a   : > { %v1763_v47 = vrot.slane %v1762_v39, 1  ;;  %v1794_v48 = vadd.f32 %v1793_v40, %v1792_v24  ;;  %v1775_v49 = vrot.slane %v1774_v41, 1  ;;  %v1806_v51 = vadd.f32 %v1805_v42, %v1804_v26 }
 0x57b   : > { %v1758_v53 = vadd.f32 %v1757_v43, %v1756_v27  ;;  %v1789_v54 = vrot.slane %v1788_v44, 1  ;;  %v1770_v55 = vadd.f32 %v1769_v45, %v1768_v35  ;;  %v1801_v56 = vrot.slane %v1800_v46, 1 }
 0x57c   : > { %v1764_v57 = vadd.f32 %v1763_v47, %v1762_v39  ;;  %v1795_v58 = vrot.slane %v1794_v48, 1  ;;  %v1776_v60 = vadd.f32 %v1775_v49, %v1774_v41  ;;  %v1807_v61 = vrot.slane %v1806_v51, 1 }
 0x57d   : > { %v1777_v3 = vmul.f32 0.125, %v1758_v53  ;;  %v1790_v4 = vadd.f32 %v1789_v54, %v1788_v44  ;;  %v1779_v5 = vmul.f32 0.125, %v1770_v55  ;;  %v1802_v6 = vadd.f32 %v1801_v56, %v1800_v46 }
 0x57e   : > { %v1778_v7 = vmul.f32 0.125, %v1764_v57  ;;  %v1796_v8 = vadd.f32 %v1795_v58, %v1794_v48  ;;  %v1780_v9 = vmul.f32 0.125, %v1776_v60  ;;  %v1808_v10 = vadd.f32 %v1807_v61, %v1806_v51  ;;  %v1833_v48 = vld [vmem:[#allocation19] sm:$0xf] }
 0x57f   : > { %v1809_v11 = vmul.f32 0.125, %v1790_v4  ;;  %v1813_v12 = vmul.f32 %v1777_v3, %v1777_v3  ;;  %v1811_v15 = vmul.f32 0.125, %v1802_v6  ;;  %v1815_v16 = vmul.f32 %v1779_v5, %v1779_v5 }
 0x580   : > { %v1810_v17 = vmul.f32 0.125, %v1796_v8  ;;  %v1814_v18 = vmul.f32 %v1778_v7, %v1778_v7  ;;  %v1812_v19 = vmul.f32 0.125, %v1808_v10  ;;  %v1816_v20 = vmul.f32 %v1780_v9, %v1780_v9 }
 0x581   : > { %v1817_v21 = vsub.f32 %v1809_v11, %v1813_v12  ;;  %v1819_v13 = vsub.f32 %v1811_v15, %v1815_v16 }
 0x582   : > { %v1818_v14 = vsub.f32 %v1810_v17, %v1814_v18  ;;  %v1820_v22 = vsub.f32 %v1812_v19, %v1816_v20  ;;  %v1864_v18 = vld [vmem:[#allocation21] sm:$0xf]  ;;  %v2089_v20 = vld [vmem:[#allocation22 + $0x440] sm:$0xff] }
 0x583   : > { %v1821_v23 = vmax.f32 %v1817_v21, 0.0  ;;  %v1823_v24 = vmax.f32 %v1819_v13, 0.0  ;;  %v2093_v13 = vld [vmem:[#allocation22 + $0x460] sm:$0xff] }
 0x584   : > { %v1822_v25 = vmax.f32 %v1818_v14, 0.0  ;;  %v1824_v26 = vmax.f32 %v1820_v22, 0.0  ;;  %v2090_v14 = vld [vmem:[#allocation22 + $0x448] sm:$0xff] }
 0x585   : > { %v1825_v27 = vadd.f32 1e-05, %v1821_v23  ;;  %v1827_v31 = vadd.f32 1e-05, %v1823_v24  ;;  %v2094_v22 = vld [vmem:[#allocation22 + $0x468] sm:$0xff] }
 0x586   : > { %v1826_v35 = vadd.f32 1e-05, %v1822_v25  ;;  %v1828_v37 = vadd.f32 1e-05, %v1824_v26  ;;  %v2097_v25 = vld [vmem:[#allocation22 + $0x480] sm:$0xff]  ;;  %v6680_v26 = vcombine.high %v2089_v20, %v2093_v13 }
 0x587   : > { %7861 = vrsqrt.f32 %v1825_v27  ;;  %v6682_v27 = vcombine.high %v2090_v14, %v2094_v22 }
 0x588   : > { %7863 = vrsqrt.f32 %v1827_v31  ;;  %v2101_v31 = vld [vmem:[#allocation22 + $0x4a0] sm:$0xff] }
 0x589   : > { %7865 = vrsqrt.f32 %v1826_v35  ;;  %v2098_v35 = vld [vmem:[#allocation22 + $0x488] sm:$0xff]  ;;  %v6687_v28 = vcombine.low %v2097_v25, %v2101_v31 }
 0x58a   : > { %7867 = vrsqrt.f32 %v1828_v37  ;;  %v2102_v37 = vld [vmem:[#allocation22 + $0x4a8] sm:$0xff] }
 0x58b   : > { %v6689_v29 = vcombine.low %v2098_v35, %v2102_v37 }
 0x591   : > { %v7862_v39 = vpop.eup %7861 }
 0x592   : > { %v7864_v40 = vpop.eup %7863 }
 0x593   : > { %v7866_v41 = vpop.eup %7865 }
 0x594   : > { %v7868_v42 = vpop.eup %7867  ;;  %v1838_v43 = vcombine.low %v7862_v39, %v7866_v41  ;;  %v6681_v41 = vcombine.low %v2090_v14, %v2094_v22  ;;  %v2146_v14 = vld [vmem:[#allocation22 + $0x608] sm:$0xff] }
 0x595   : > { %v1839_v44 = vcombine.low %v7864_v40, %v7868_v42  ;;  %v6679_v40 = vcombine.low %v2089_v20, %v2093_v13  ;;  %v6688_v42 = vcombine.high %v2097_v25, %v2101_v31  ;;  %v2145_v20 = vld [vmem:[#allocation22 + $0x600] sm:$0xff]  ;;  %v2150_v22 = vld [vmem:[#allocation22 + $0x628] sm:$0xff] }
 0x596   : > { %v1846_v45 = vrot.slane %v1838_v43, %v9154_v59  ;;  %v6690_v43 = vcombine.high %v2098_v35, %v2102_v37  ;;  %v2149_v13 = vld [vmem:[#allocation22 + $0x620] sm:$0xff]  ;;  %v6738_v31 = vcombine.high %v2146_v14, %v2150_v22 }
 0x597   : > { %v1853_v46 = vrot.slane %v1839_v44, %v9154_v59  ;;  %v2105_v44 = vld [vmem:[#allocation22 + $0x4c0] sm:$0xff] }
 0x598   : > { %v2153_v35 = vld [vmem:[#allocation22 + $0x640] sm:$0xff] }
 0x599   : > { %v1854_v47 = vcombine.low %v1846_v45, %v1853_v46  ;;  %v2109_v45 = vld [vmem:[#allocation22 + $0x4e0] sm:$0xff]  ;;  %v2106_v46 = vld [vmem:[#allocation22 + $0x4c8] sm:$0xff] }
 0x59a   : > { %v6696_v30 = vcombine.high %v2105_v44, %v2109_v45  ;;  %v2157_v37 = vld [vmem:[#allocation22 + $0x660] sm:$0xff] }
 0x59b   : > { %v1861_v49 = vrot.slane %v1854_v47, %v9154_v59  ;;  %v2110_v47 = vld [vmem:[#allocation22 + $0x4e8] sm:$0xff] }
 0x59c   : > { %v6698_v32 = vcombine.high %v2106_v46, %v2110_v47 }
 0x59d   : > { %v1863_v51 = vmul.f32 %v1861_v49, %v1833_v48  ;;  %v2114_v48 = vld [vmem:[#allocation22 + $0x508] sm:$0xff] }
 0x59e   : > { %v2118_v49 = vld [vmem:[#allocation22 + $0x528] sm:$0xff] }
 0x59f   : > { %v1877_v53 = vrot.slane %v1863_v51, %v9181_v36  ;;  %v1881_v54 = vrot.slane %v1863_v51, %v9184_v38  ;;  %v1869_v55 = vrot.slane %v1863_v51, %v9144_v52  ;;  %v1873_v56 = vrot.slane %v1863_v51, %v9149_v2 }
 0x5a0   : > { %v6695_v51 = vcombine.low %v2105_v44, %v2109_v45  ;;  %v6744_v44 = vcombine.high %v2153_v35, %v2157_v37 }
 0x5a1   : > { %v1888_v57 = vmul.f32 %v1877_v53, %v1779_v5  ;;  %v1889_v58 = vmul.f32 %v1881_v54, %v1780_v9  ;;  %v1886_v60 = vmul.f32 %v1869_v55, %v1777_v3  ;;  %v1887_v61 = vmul.f32 %v1873_v56, %v1778_v7 }
 0x5a2   : > { %v1921_v4 = vmul.f32 %v1873_v56, %v9194_v0  ;;  %v1920_v6 = vmul.f32 %v1869_v55, %v9190_v62  ;;  %v1923_v8 = vmul.f32 %v1881_v54, %v9196_v1  ;;  %v1922_v10 = vmul.f32 %v1877_v53, %v9192_v63  ;;  %v2121_v56 = vld [vmem:[#allocation22 + $0x540] sm:$0xff] }
 0x5a3   : > { %v1895_v11 = vcombine.low %v1888_v57, %v1889_v58  ;;  %v1894_v12 = vcombine.low %v1886_v60, %v1887_v61  ;;  %v6697_v53 = vcombine.low %v2106_v46, %v2110_v47  ;;  %v6706_v55 = vcombine.high %v2114_v48, %v2118_v49  ;;  %v2125_v57 = vld [vmem:[#allocation22 + $0x560] sm:$0xff]  ;;  %v2122_v58 = vld [vmem:[#allocation22 + $0x548] sm:$0xff] }
 0x5a4   : > { %v2126_v60 = vld [vmem:[#allocation22 + $0x568] sm:$0xff]  ;;  %v2161_v46 = vld [vmem:[#allocation22 + $0x680] sm:$0xff] }
 0x5a5   : > { %v1909_v15 = vrot.slane %v1895_v11, %v9154_v59  ;;  %v1902_v16 = vrot.slane %v1894_v12, %v9154_v59  ;;  %v2133_v11 = vld [vmem:[#allocation22 + $0x5a0] sm:$0xff]  ;;  %v2130_v12 = vld [vmem:[#allocation22 + $0x588] sm:$0xff] }
 0x5a6   : > { %v2165_v47 = vld [vmem:[#allocation22 + $0x6a0] sm:$0xff] }
 0x5a7   : > { %v1910_v17 = vcombine.low %v1902_v16, %v1909_v15  ;;  %v2134_v15 = vld [vmem:[#allocation22 + $0x5a8] sm:$0xff]  ;;  %v6711_v16 = vcombine.low %v2121_v56, %v2125_v57 }
 0x5a9   : > { %v1917_v5 = vrot.slane %v1910_v17, %v9154_v59  ;;  %v6713_v17 = vcombine.low %v2122_v58, %v2126_v60 }
 0x5ab   : > { %v1919_v3 = vsub.f32 %v1864_v18, %v1917_v5  ;;  %v6722_v5 = vcombine.high %v2130_v12, %v2134_v15 }
 0x5ad   : > { %v1932_v7 = vrot.slane %v1919_v3, %v9149_v2  ;;  %v1928_v0 = vrot.slane %v1919_v3, %v9144_v52  ;;  %v1940_v62 = vrot.slane %v1919_v3, %v9184_v38  ;;  %v1936_v1 = vrot.slane %v1919_v3, %v9181_v36  ;;  %v2137_v3 = vld [vmem:[#allocation22 + $0x5c0] sm:$0xff] }
 0x5af   : > { %v1946_v63 = vadd.f32 %v1932_v7, %v1921_v4  ;;  %v1945_v9 = vadd.f32 %v1928_v0, %v1920_v6  ;;  %v1948_v19 = vadd.f32 %v1940_v62, %v1923_v8  ;;  %v9232_v21 = vadd.f32 %v1936_v1, %v1922_v10  ;;  %v2129_v10 = vld [vmem:[#allocation22 + $0x580] sm:$0xff]  ;;  %v2138_v0 = vld [vmem:[#allocation22 + $0x5c8] sm:$0xff] }
 0x5b0   : > { %v6705_v4 = vcombine.low %v2114_v48, %v2118_v49  ;;  %v6712_v6 = vcombine.high %v2121_v56, %v2125_v57  ;;  %v6714_v8 = vcombine.high %v2122_v58, %v2126_v60  ;;  %v6720_v18 = vcombine.high %v2129_v10, %v2133_v11  ;;  %v2141_v7 = vld [vmem:[#allocation22 + $0x5e0] sm:$0xff]  ;;  %v2142_v62 = vld [vmem:[#allocation22 + $0x5e8] sm:$0xff] }
 0x5b1   : > { %v9234_v23 = vpack.c.bf16 %v1946_v63, %v1946_v63  ;;  %v9236_v24 = vpack.c.bf16 %v1945_v9, %v1945_v9  ;;  %v9242_v39 = vpack.c.bf16 %v1948_v19, %v1948_v19  ;;  %v6719_v1 = vcombine.low %v2129_v10, %v2133_v11  ;;  %v2169_v48 = vld [vmem:[#allocation22 + $0x6c0] sm:$0xff] }
 0x5b2   : > { %v6721_v63 = vcombine.low %v2130_v12, %v2134_v15  ;;  %v6728_v9 = vcombine.high %v2137_v3, %v2141_v7  ;;  %v6730_v19 = vcombine.high %v2138_v0, %v2142_v62  ;;  %v6727_v25 = vcombine.low %v2137_v3, %v2141_v7  ;;  %v2173_v49 = vld [vmem:[#allocation22 + $0x6e0] sm:$0xff] }
 0x5b3   : > { %3563 = vmatprep.mubr.bf16.mxu0 %v9234_v23  ;;  %3645 = vmatprep.mubr.bf16.mxu1 %v9234_v23  ;;  %v6760_v56 = vcombine.high %v2169_v48, %v2173_v49  ;;  %v2177_v58 = vld [vmem:[#allocation22 + $0x700] sm:$0xff] }
 0x5b4   : > { %3564 = vmatmul.mubr.bf16.vlgmr.msra.gmra.mrb[8].mxu0 %v9236_v24  ;;  %3646 = vmatmul.mubr.bf16.vlgmr.msra.gmra.mrb[8].mxu1 %v9236_v24  ;;  %v2181_v60 = vld [vmem:[#allocation22 + $0x720] sm:$0xff] }
 0x5b5   : > { %3573 = vmatpush1.bf16.msra.mxu0 %v6671_v33  ;;  %3655 = vmatpush1.bf16.msra.mxu1 %v6673_v34  ;;  %v2113_v33 = vld [vmem:[#allocation22 + $0x500] sm:$0xff]  ;;  %v6768_v10 = vcombine.high %v2177_v58, %v2181_v60 }
 0x5b6   : > { %3604 = vmatprep.mubr.bf16.mxu0 %v9242_v39  ;;  %3686 = vmatprep.mubr.bf16.mxu1 %v9242_v39  ;;  %v2117_v34 = vld [vmem:[#allocation22 + $0x520] sm:$0xff] }
 0x5b7   : > { %3574 = vmatprep.subr.bf16.mxu0 %v6680_v26  ;;  %3656 = vmatprep.subr.bf16.mxu1 %v6682_v27  ;;  %v6704_v54 = vcombine.high %v2113_v33, %v2117_v34  ;;  %v6703_v61 = vcombine.low %v2113_v33, %v2117_v34  ;;  %v6729_v26 = vcombine.low %v2138_v0, %v2142_v62  ;;  %v2185_v12 = vld [vmem:[#allocation22 + $0x740] sm:$0xff] }
 0x5b8   : > { %v6736_v27 = vcombine.high %v2145_v20, %v2149_v13  ;;  %v6752_v33 = vcombine.high %v2161_v46, %v2165_v47  ;;  %v2189_v15 = vld [vmem:[#allocation22 + $0x760] sm:$0xff] }
 0x5b9   : > { %3575 = vmatpush1.bf16.msra.mxu0 %v6679_v40  ;;  %3657 = vmatpush1.bf16.msra.mxu1 %v6681_v41  ;;  %v2154_v40 = vld [vmem:[#allocation22 + $0x648] sm:$0xff]  ;;  %v6776_v3 = vcombine.high %v2185_v12, %v2189_v15  ;;  %v2193_v0 = vld [vmem:[#allocation22 + $0x780] sm:$0xff] }
 0x5ba   : > { %3576 = vmatprep.subr.bf16.mxu0 %v6688_v42  ;;  %3658 = vmatprep.subr.bf16.mxu1 %v6690_v43  ;;  %v2158_v41 = vld [vmem:[#allocation22 + $0x668] sm:$0xff]  ;;  %v6735_v42 = vcombine.low %v2145_v20, %v2149_v13  ;;  %v6737_v43 = vcombine.low %v2146_v14, %v2150_v22  ;;  %v2197_v62 = vld [vmem:[#allocation22 + $0x7a0] sm:$0xff] }
 0x5bb   : > { %v6746_v45 = vcombine.high %v2154_v40, %v2158_v41  ;;  %v6784_v20 = vcombine.high %v2193_v0, %v2197_v62  ;;  %v2201_v14 = vld [vmem:[#allocation22 + $0x7c0] sm:$0xff] }
 0x5bc   : > { %v2205_v22 = vld [vmem:[#allocation22 + $0x7e0] sm:$0xff] }
 0x5bd   : > { %3577 = vmatpush1.bf16.msra.mxu0 %v6687_v28  ;;  %3659 = vmatpush1.bf16.msra.mxu1 %v6689_v29  ;;  %v2162_v28 = vld [vmem:[#allocation22 + $0x688] sm:$0xff] }
 0x5be   : > { %3578 = vmatprep.subr.bf16.mxu0 %v6696_v30  ;;  %3660 = vmatprep.subr.bf16.mxu1 %v6698_v32  ;;  %v2166_v29 = vld [vmem:[#allocation22 + $0x6a8] sm:$0xff]  ;;  %v6743_v30 = vcombine.low %v2153_v35, %v2157_v37  ;;  %v6745_v32 = vcombine.low %v2154_v40, %v2158_v41  ;;  %v6792_v35 = vcombine.high %v2201_v14, %v2205_v22  ;;  %v1955_v40 = vld [vmem:[#allocation22 + $0x10] sm:$0xff] }
 0x5bf   : > { %v6754_v34 = vcombine.high %v2162_v28, %v2166_v29  ;;  %v1959_v41 = vld [vmem:[#allocation22 + $0x30] sm:$0xff] }
 0x5c1   : > { %3579 = vmatpush1.bf16.msra.mxu0 %v6695_v51  ;;  %3661 = vmatpush1.bf16.msra.mxu1 %v6697_v53  ;;  %v2170_v51 = vld [vmem:[#allocation22 + $0x6c8] sm:$0xff] }
 0x5c2   : > { %3580 = vmatprep.subr.bf16.mxu0 %v6704_v54  ;;  %3662 = vmatprep.subr.bf16.mxu1 %v6706_v55  ;;  %v2174_v53 = vld [vmem:[#allocation22 + $0x6e8] sm:$0xff]  ;;  %v6751_v54 = vcombine.low %v2161_v46, %v2165_v47  ;;  %v6753_v55 = vcombine.low %v2162_v28, %v2166_v29  ;;  %v6548_v46 = vcombine.high %v1955_v40, %v1959_v41  ;;  %v1963_v28 = vld [vmem:[#allocation22 + $0x50] sm:$0xff] }
 0x5c3   : > { %v6762_v57 = vcombine.high %v2170_v51, %v2174_v53  ;;  %v1967_v29 = vld [vmem:[#allocation22 + $0x70] sm:$0xff] }
 0x5c5   : > { %3581 = vmatpush1.bf16.msra.mxu0 %v6703_v61  ;;  %3663 = vmatpush1.bf16.msra.mxu1 %v6705_v4  ;;  %v2178_v61 = vld [vmem:[#allocation22 + $0x708] sm:$0xff] }
 0x5c6   : > { %3582 = vmatprep.subr.bf16.mxu0 %v6712_v6  ;;  %3664 = vmatprep.subr.bf16.mxu1 %v6714_v8  ;;  %v2182_v4 = vld [vmem:[#allocation22 + $0x728] sm:$0xff]  ;;  %v6759_v6 = vcombine.low %v2169_v48, %v2173_v49  ;;  %v6761_v8 = vcombine.low %v2170_v51, %v2174_v53  ;;  %v6556_v49 = vcombine.high %v1963_v28, %v1967_v29  ;;  %v1971_v53 = vld [vmem:[#allocation22 + $0x90] sm:$0xff] }
 0x5c7   : > { %v6770_v11 = vcombine.high %v2178_v61, %v2182_v4 }
 0x5c9   : > { %3583 = vmatpush1.bf16.msra.mxu0 %v6711_v16  ;;  %3665 = vmatpush1.bf16.msra.mxu1 %v6713_v17  ;;  %v2186_v16 = vld [vmem:[#allocation22 + $0x748] sm:$0xff] }
 0x5ca   : > { %3584 = vmatprep.subr.bf16.mxu0 %v6720_v18  ;;  %3666 = vmatprep.subr.bf16.mxu1 %v6722_v5  ;;  %v2190_v17 = vld [vmem:[#allocation22 + $0x768] sm:$0xff]  ;;  %v6767_v18 = vcombine.low %v2177_v58, %v2181_v60  ;;  %v6769_v5 = vcombine.low %v2178_v61, %v2182_v4  ;;  %v1979_v61 = vld [vmem:[#allocation22 + $0xd0] sm:$0xff] }
 0x5cb   : > { %v6778_v7 = vcombine.high %v2186_v16, %v2190_v17  ;;  %v1983_v4 = vld [vmem:[#allocation22 + $0xf0] sm:$0xff] }
 0x5cd   : > { %3585 = vmatpush1.bf16.msra.mxu0 %v6719_v1  ;;  %3667 = vmatpush1.bf16.msra.mxu1 %v6721_v63  ;;  %v2194_v1 = vld [vmem:[#allocation22 + $0x788] sm:$0xff] }
 0x5ce   : > { %3586 = vmatprep.subr.bf16.mxu0 %v6728_v9  ;;  %3668 = vmatprep.subr.bf16.mxu1 %v6730_v19  ;;  %v2198_v63 = vld [vmem:[#allocation22 + $0x7a8] sm:$0xff]  ;;  %v6775_v9 = vcombine.low %v2185_v12, %v2189_v15  ;;  %v6777_v19 = vcombine.low %v2186_v16, %v2190_v17  ;;  %v6572_v12 = vcombine.high %v1979_v61, %v1983_v4  ;;  %v1987_v16 = vld [vmem:[#allocation22 + $0x110] sm:$0xff] }
 0x5cf   : > { %v6786_v13 = vcombine.high %v2194_v1, %v2198_v63  ;;  %v1991_v17 = vld [vmem:[#allocation22 + $0x130] sm:$0xff] }
 0x5d1   : > { %3587 = vmatpush1.bf16.msra.mxu0 %v6727_v25  ;;  %3669 = vmatpush1.bf16.msra.mxu1 %v6729_v26  ;;  %v2202_v25 = vld [vmem:[#allocation22 + $0x7c8] sm:$0xff] }
 0x5d2   : > { %3588 = vmatprep.subr.bf16.mxu0 %v6736_v27  ;;  %3670 = vmatprep.subr.bf16.mxu1 %v6738_v31  ;;  %v2206_v26 = vld [vmem:[#allocation22 + $0x7e8] sm:$0xff]  ;;  %v6783_v27 = vcombine.low %v2193_v0, %v2197_v62  ;;  %v6785_v31 = vcombine.low %v2194_v1, %v2198_v63  ;;  %v1995_v62 = vld [vmem:[#allocation22 + $0x150] sm:$0xff]  ;;  %v1996_v63 = vld [vmem:[#allocation22 + $0x158] sm:$0xff] }
 0x5d3   : > { %v6794_v37 = vcombine.high %v2202_v25, %v2206_v26  ;;  %v1999_v1 = vld [vmem:[#allocation22 + $0x170] sm:$0xff] }
 0x5d5   : > { %3589 = vmatpush1.bf16.msra.mxu0 %v6735_v42  ;;  %3671 = vmatpush1.bf16.msra.mxu1 %v6737_v43  ;;  %v1956_v42 = vld [vmem:[#allocation22 + $0x18] sm:$0xff] }
 0x5d6   : > { %3590 = vmatprep.subr.bf16.mxu0 %v6744_v44  ;;  %3672 = vmatprep.subr.bf16.mxu1 %v6746_v45  ;;  %v1960_v43 = vld [vmem:[#allocation22 + $0x38] sm:$0xff]  ;;  %v6791_v44 = vcombine.low %v2201_v14, %v2205_v22  ;;  %v6793_v45 = vcombine.low %v2202_v25, %v2206_v26  ;;  %v2003_v22 = vld [vmem:[#allocation22 + $0x190] sm:$0xff] }
 0x5d7   : > { %v6550_v47 = vcombine.high %v1956_v42, %v1960_v43  ;;  %v6549_v48 = vcombine.low %v1956_v42, %v1960_v43  ;;  %v2007_v25 = vld [vmem:[#allocation22 + $0x1b0] sm:$0xff]  ;;  %v2004_v26 = vld [vmem:[#allocation22 + $0x198] sm:$0xff] }
 0x5d8   : > { %v2015_v42 = vld [vmem:[#allocation22 + $0x1f0] sm:$0xff]  ;;  %v2012_v43 = vld [vmem:[#allocation22 + $0x1d8] sm:$0xff] }
 0x5d9   : > { %3591 = vmatpush1.bf16.msra.mxu0 %v6743_v30  ;;  %3673 = vmatpush1.bf16.msra.mxu1 %v6745_v32  ;;  %v1964_v30 = vld [vmem:[#allocation22 + $0x58] sm:$0xff] }
 0x5da   : > { %3592 = vmatprep.subr.bf16.mxu0 %v6752_v33  ;;  %3674 = vmatprep.subr.bf16.mxu1 %v6754_v34  ;;  %v1968_v32 = vld [vmem:[#allocation22 + $0x78] sm:$0xff]  ;;  %v6547_v33 = vcombine.low %v1955_v40, %v1959_v41  ;;  %v9254_v34 = vpack.c.bf16 %v9232_v21, %v9232_v21  ;;  %v2011_v41 = vld [vmem:[#allocation22 + $0x1d0] sm:$0xff] }
 0x5db   : > { %v6558_v51 = vcombine.high %v1964_v30, %v1968_v32  ;;  %v6557_v21 = vcombine.low %v1964_v30, %v1968_v32  ;;  %v2023_v30 = vld [vmem:[#allocation22 + $0x230] sm:$0xff]  ;;  %v2020_v32 = vld [vmem:[#allocation22 + $0x218] sm:$0xff] }
 0x5dd   : > { %3593 = vmatpush1.bf16.msra.mxu0 %v6751_v54  ;;  %3675 = vmatpush1.bf16.msra.mxu1 %v6753_v55  ;;  %v1975_v54 = vld [vmem:[#allocation22 + $0xb0] sm:$0xff]  ;;  %v1972_v55 = vld [vmem:[#allocation22 + $0x98] sm:$0xff] }
 0x5de   : > { %3594 = vmatprep.subr.bf16.mxu0 %v6760_v56  ;;  %3676 = vmatprep.subr.bf16.mxu1 %v6762_v57  ;;  %v1976_v56 = vld [vmem:[#allocation22 + $0xb8] sm:$0xff]  ;;  %v6555_v57 = vcombine.low %v1963_v28, %v1967_v29  ;;  %v6564_v58 = vcombine.high %v1971_v53, %v1975_v54  ;;  %v2019_v29 = vld [vmem:[#allocation22 + $0x210] sm:$0xff] }
 0x5df   : > { %v6566_v60 = vcombine.high %v1972_v55, %v1976_v56 }
 0x5e1   : > { %3595 = vmatpush1.bf16.msra.mxu0 %v6759_v6  ;;  %3677 = vmatpush1.bf16.msra.mxu1 %v6761_v8  ;;  %v1980_v6 = vld [vmem:[#allocation22 + $0xd8] sm:$0xff] }
 0x5e2   : > { %3596 = vmatprep.subr.bf16.mxu0 %v6768_v10  ;;  %3678 = vmatprep.subr.bf16.mxu1 %v6770_v11  ;;  %v1984_v8 = vld [vmem:[#allocation22 + $0xf8] sm:$0xff]  ;;  %v6563_v10 = vcombine.low %v1971_v53, %v1975_v54  ;;  %v6565_v11 = vcombine.low %v1972_v55, %v1976_v56  ;;  %v2027_v54 = vld [vmem:[#allocation22 + $0x250] sm:$0xff] }
 0x5e3   : > { %v6574_v15 = vcombine.high %v1980_v6, %v1984_v8  ;;  %v2031_v55 = vld [vmem:[#allocation22 + $0x270] sm:$0xff]  ;;  %v2028_v56 = vld [vmem:[#allocation22 + $0x258] sm:$0xff] }
 0x5e5   : > { %3597 = vmatpush1.bf16.msra.mxu0 %v6767_v18  ;;  %3679 = vmatpush1.bf16.msra.mxu1 %v6769_v5  ;;  %v1992_v18 = vld [vmem:[#allocation22 + $0x138] sm:$0xff]  ;;  %v6571_v5 = vcombine.low %v1979_v61, %v1983_v4  ;;  %v2035_v4 = vld [vmem:[#allocation22 + $0x290] sm:$0xff] }
 0x5e6   : > { %3598 = vmatprep.subr.bf16.mxu0 %v6776_v3  ;;  %3680 = vmatprep.subr.bf16.mxu1 %v6778_v7  ;;  %v6573_v3 = vcombine.low %v1980_v6, %v1984_v8  ;;  %v6580_v7 = vcombine.high %v1987_v16, %v1991_v17  ;;  %v2039_v6 = vld [vmem:[#allocation22 + $0x2b0] sm:$0xff]  ;;  %v2036_v8 = vld [vmem:[#allocation22 + $0x298] sm:$0xff] }
 0x5e9   : > { %3599 = vmatpush1.bf16.msra.mxu0 %v6775_v9  ;;  %3681 = vmatpush1.bf16.msra.mxu1 %v6777_v19  ;;  %v2000_v9 = vld [vmem:[#allocation22 + $0x178] sm:$0xff]  ;;  %v6579_v19 = vcombine.low %v1987_v16, %v1991_v17  ;;  %v2043_v17 = vld [vmem:[#allocation22 + $0x2d0] sm:$0xff] }
 0x5ea   : > { %3600 = vmatprep.subr.bf16.mxu0 %v6784_v20  ;;  %3682 = vmatprep.subr.bf16.mxu1 %v6786_v13  ;;  %v6588_v13 = vcombine.high %v1995_v62, %v1999_v1  ;;  %v6590_v14 = vcombine.high %v1996_v63, %v2000_v9 }
 0x5ed   : > { %3601 = vmatpush1.bf16.msra.mxu0 %v6783_v27  ;;  %3683 = vmatpush1.bf16.msra.mxu1 %v6785_v31  ;;  %v2008_v27 = vld [vmem:[#allocation22 + $0x1b8] sm:$0xff]  ;;  %v6587_v31 = vcombine.low %v1995_v62, %v1999_v1  ;;  %v2051_v1 = vld [vmem:[#allocation22 + $0x310] sm:$0xff] }
 0x5ee   : > { %3602 = vmatprep.subr.bf16.mxu0 %v6792_v35  ;;  %3684 = vmatprep.subr.bf16.mxu1 %v6794_v37  ;;  %v6589_v35 = vcombine.low %v1996_v63, %v2000_v9  ;;  %v6596_v37 = vcombine.high %v2003_v22, %v2007_v25  ;;  %v6598_v40 = vcombine.high %v2004_v26, %v2008_v27  ;;  %v2055_v63 = vld [vmem:[#allocation22 + $0x330] sm:$0xff]  ;;  %v2052_v9 = vld [vmem:[#allocation22 + $0x318] sm:$0xff] }
 0x5f1   : > { %3603 = vmatpush1.bf16.msra.mxu0 %v6791_v44  ;;  %3685 = vmatpush1.bf16.msra.mxu1 %v6793_v45  ;;  %v2016_v44 = vld [vmem:[#allocation22 + $0x1f8] sm:$0xff]  ;;  %v6595_v45 = vcombine.low %v2003_v22, %v2007_v25  ;;  %v2059_v25 = vld [vmem:[#allocation22 + $0x350] sm:$0xff] }
 0x5f2   : > { %3695 = vmatprep.subr.bf16.mxu0 %v6548_v46  ;;  %3777 = vmatprep.subr.bf16.mxu1 %v6550_v47  ;;  %v6597_v46 = vcombine.low %v2004_v26, %v2008_v27  ;;  %v6604_v47 = vcombine.high %v2011_v41, %v2015_v42  ;;  %v6606_v28 = vcombine.high %v2012_v43, %v2016_v44  ;;  %v2063_v26 = vld [vmem:[#allocation22 + $0x370] sm:$0xff]  ;;  %v2060_v27 = vld [vmem:[#allocation22 + $0x358] sm:$0xff] }
 0x5f4   : > { %3605 = vmatmul.mubr.bf16.vlgmr.msra.gmra.mrb[8].mxu0 %v9254_v34  ;;  %3687 = vmatmul.mubr.bf16.vlgmr.msra.gmra.mrb[8].mxu1 %v9254_v34 }
 0x5f5   : > { %3696 = vmatpush1.bf16.msra.mxu0 %v6547_v33  ;;  %3727 = vmatprep.mubr.bf16.mxu0 %v9234_v23  ;;  %v2024_v33 = vld [vmem:[#allocation22 + $0x238] sm:$0xff] }
 0x5f6   : > { %3778 = vmatpush1.bf16.msra.mxu1 %v6549_v48  ;;  %3809 = vmatprep.mubr.bf16.mxu1 %v9234_v23  ;;  %v1988_v23 = vld [vmem:[#allocation22 + $0x118] sm:$0xff]  ;;  %v6603_v48 = vcombine.low %v2011_v41, %v2015_v42  ;;  %v6614_v53 = vcombine.high %v2020_v32, %v2024_v33  ;;  %v2067_v42 = vld [vmem:[#allocation22 + $0x390] sm:$0xff] }
 0x5f7   : > { %3697 = vmatprep.subr.bf16.mxu0 %v6556_v49  ;;  %3779 = vmatprep.subr.bf16.mxu1 %v6558_v51  ;;  %v6582_v0 = vcombine.high %v1988_v23, %v1992_v18  ;;  %v6581_v20 = vcombine.low %v1988_v23, %v1992_v18  ;;  %v6605_v49 = vcombine.low %v2012_v43, %v2016_v44  ;;  %v2047_v23 = vld [vmem:[#allocation22 + $0x2f0] sm:$0xff]  ;;  %v2044_v18 = vld [vmem:[#allocation22 + $0x2d8] sm:$0xff] }
 0x5f8   : > { %v6612_v51 = vcombine.high %v2019_v29, %v2023_v30  ;;  %v2071_v43 = vld [vmem:[#allocation22 + $0x3b0] sm:$0xff]  ;;  %v2068_v44 = vld [vmem:[#allocation22 + $0x398] sm:$0xff] }
 0x5f9   : > { %3698 = vmatpush1.bf16.msra.mxu0 %v6555_v57  ;;  %v2032_v57 = vld [vmem:[#allocation22 + $0x278] sm:$0xff] }
 0x5fa   : > { %3780 = vmatpush1.bf16.msra.mxu1 %v6557_v21  ;;  %3699 = vmatprep.subr.bf16.mxu0 %v6564_v58  ;;  %v6611_v21 = vcombine.low %v2019_v29, %v2023_v30  ;;  %v6613_v58 = vcombine.low %v2020_v32, %v2024_v33  ;;  %v6622_v61 = vcombine.high %v2028_v56, %v2032_v57  ;;  %v2075_v30 = vld [vmem:[#allocation22 + $0x3d0] sm:$0xff]  ;;  %v2076_v33 = vld [vmem:[#allocation22 + $0x3d8] sm:$0xff] }
 0x5fb   : > { %3781 = vmatprep.subr.bf16.mxu1 %v6566_v60  ;;  %v6620_v60 = vcombine.high %v2027_v54, %v2031_v55  ;;  %v2079_v32 = vld [vmem:[#allocation22 + $0x3f0] sm:$0xff] }
 0x5fd   : > { %3700 = vmatpush1.bf16.msra.mxu0 %v6563_v10  ;;  %v2040_v10 = vld [vmem:[#allocation22 + $0x2b8] sm:$0xff] }
 0x5fe   : > { %3782 = vmatpush1.bf16.msra.mxu1 %v6565_v11  ;;  %3701 = vmatprep.subr.bf16.mxu0 %v6572_v12  ;;  %v6619_v11 = vcombine.low %v2027_v54, %v2031_v55  ;;  %v6621_v12 = vcombine.low %v2028_v56, %v2032_v57  ;;  %v6630_v16 = vcombine.high %v2036_v8, %v2040_v10  ;;  %v2083_v55 = vld [vmem:[#allocation22 + $0x410] sm:$0xff]  ;;  %v2084_v57 = vld [vmem:[#allocation22 + $0x418] sm:$0xff] }
 0x5ff   : > { %3783 = vmatprep.subr.bf16.mxu1 %v6574_v15  ;;  %v6628_v15 = vcombine.high %v2035_v4, %v2039_v6  ;;  %v2087_v56 = vld [vmem:[#allocation22 + $0x430] sm:$0xff] }
 0x601   : > { %3702 = vmatpush1.bf16.msra.mxu0 %v6571_v5  ;;  %v2048_v5 = vld [vmem:[#allocation22 + $0x2f8] sm:$0xff] }
 0x602   : > { %3784 = vmatpush1.bf16.msra.mxu1 %v6573_v3  ;;  %3703 = vmatprep.subr.bf16.mxu0 %v6580_v7  ;;  %v6627_v3 = vcombine.low %v2035_v4, %v2039_v6  ;;  %v6629_v7 = vcombine.low %v2036_v8, %v2040_v10  ;;  %v6638_v62 = vcombine.high %v2044_v18, %v2048_v5  ;;  %v2091_v6 = vld [vmem:[#allocation22 + $0x450] sm:$0xff] }
 0x603   : > { %3785 = vmatprep.subr.bf16.mxu1 %v6582_v0  ;;  %v6636_v0 = vcombine.high %v2043_v17, %v2047_v23  ;;  %v2095_v8 = vld [vmem:[#allocation22 + $0x470] sm:$0xff]  ;;  %v6675_v10 = vcombine.low %v2083_v55, %v2087_v56 }
 0x605   : > { %3704 = vmatpush1.bf16.msra.mxu0 %v6579_v19  ;;  %v2056_v19 = vld [vmem:[#allocation22 + $0x338] sm:$0xff] }
 0x606   : > { %3786 = vmatpush1.bf16.msra.mxu1 %v6581_v20  ;;  %3705 = vmatprep.subr.bf16.mxu0 %v6588_v13  ;;  %v6635_v20 = vcombine.low %v2043_v17, %v2047_v23  ;;  %v6637_v13 = vcombine.low %v2044_v18, %v2048_v5  ;;  %v6646_v22 = vcombine.high %v2052_v9, %v2056_v19  ;;  %v2099_v17 = vld [vmem:[#allocation22 + $0x490] sm:$0xff]  ;;  %v2100_v5 = vld [vmem:[#allocation22 + $0x498] sm:$0xff] }
 0x607   : > { %3787 = vmatprep.subr.bf16.mxu1 %v6590_v14  ;;  %v6644_v14 = vcombine.high %v2051_v1, %v2055_v63  ;;  %v2103_v23 = vld [vmem:[#allocation22 + $0x4b0] sm:$0xff] }
 0x609   : > { %3706 = vmatpush1.bf16.msra.mxu0 %v6587_v31  ;;  %v2064_v31 = vld [vmem:[#allocation22 + $0x378] sm:$0xff] }
 0x60a   : > { %3788 = vmatpush1.bf16.msra.mxu1 %v6589_v35  ;;  %3707 = vmatprep.subr.bf16.mxu0 %v6596_v37  ;;  %v6643_v35 = vcombine.low %v2051_v1, %v2055_v63  ;;  %v6645_v37 = vcombine.low %v2052_v9, %v2056_v19  ;;  %v6654_v41 = vcombine.high %v2060_v27, %v2064_v31  ;;  %v2107_v63 = vld [vmem:[#allocation22 + $0x4d0] sm:$0xff]  ;;  %v2108_v19 = vld [vmem:[#allocation22 + $0x4d8] sm:$0xff] }
 0x60b   : > { %3789 = vmatprep.subr.bf16.mxu1 %v6598_v40  ;;  %v6652_v40 = vcombine.high %v2059_v25, %v2063_v26  ;;  %v2111_v9 = vld [vmem:[#allocation22 + $0x4f0] sm:$0xff] }
 0x60d   : > { %3708 = vmatpush1.bf16.msra.mxu0 %v6595_v45  ;;  %v2072_v45 = vld [vmem:[#allocation22 + $0x3b8] sm:$0xff] }
 0x60e   : > { %3790 = vmatpush1.bf16.msra.mxu1 %v6597_v46  ;;  %3709 = vmatprep.subr.bf16.mxu0 %v6604_v47  ;;  %v6651_v46 = vcombine.low %v2059_v25, %v2063_v26  ;;  %v6653_v47 = vcombine.low %v2060_v27, %v2064_v31  ;;  %v6662_v29 = vcombine.high %v2068_v44, %v2072_v45  ;;  %v2115_v25 = vld [vmem:[#allocation22 + $0x510] sm:$0xff]  ;;  %v2116_v27 = vld [vmem:[#allocation22 + $0x518] sm:$0xff] }
 0x60f   : > { %3791 = vmatprep.subr.bf16.mxu1 %v6606_v28  ;;  %v6660_v28 = vcombine.high %v2067_v42, %v2071_v43  ;;  %v2119_v26 = vld [vmem:[#allocation22 + $0x530] sm:$0xff]  ;;  %v2120_v31 = vld [vmem:[#allocation22 + $0x538] sm:$0xff] }
 0x611   : > { %3710 = vmatpush1.bf16.msra.mxu0 %v6603_v48  ;;  %v2080_v48 = vld [vmem:[#allocation22 + $0x3f8] sm:$0xff] }
 0x612   : > { %3792 = vmatpush1.bf16.msra.mxu1 %v6605_v49  ;;  %3711 = vmatprep.subr.bf16.mxu0 %v6612_v51  ;;  %v6659_v49 = vcombine.low %v2067_v42, %v2071_v43  ;;  %v6661_v51 = vcombine.low %v2068_v44, %v2072_v45  ;;  %v6670_v54 = vcombine.high %v2076_v33, %v2080_v48  ;;  %v2127_v42 = vld [vmem:[#allocation22 + $0x570] sm:$0xff]  ;;  %v2124_v43 = vld [vmem:[#allocation22 + $0x558] sm:$0xff] }
 0x613   : > { %3793 = vmatprep.subr.bf16.mxu1 %v6614_v53  ;;  %v6668_v53 = vcombine.high %v2075_v30, %v2079_v32  ;;  %v2128_v44 = vld [vmem:[#allocation22 + $0x578] sm:$0xff]  ;;  %v6707_v45 = vcombine.low %v2115_v25, %v2119_v26 }
 0x615   : > { %3712 = vmatpush1.bf16.msra.mxu0 %v6611_v21  ;;  %v2088_v21 = vld [vmem:[#allocation22 + $0x438] sm:$0xff] }
 0x616   : > { %3794 = vmatpush1.bf16.msra.mxu1 %v6613_v58  ;;  %3713 = vmatprep.subr.bf16.mxu0 %v6620_v60  ;;  %v6667_v58 = vcombine.low %v2075_v30, %v2079_v32  ;;  %v6669_v60 = vcombine.low %v2076_v33, %v2080_v48  ;;  %v6678_v4 = vcombine.high %v2084_v57, %v2088_v21  ;;  %v2135_v30 = vld [vmem:[#allocation22 + $0x5b0] sm:$0xff]  ;;  %v2132_v32 = vld [vmem:[#allocation22 + $0x598] sm:$0xff] }
 0x617   : > { %3795 = vmatprep.subr.bf16.mxu1 %v6622_v61  ;;  %v6676_v61 = vcombine.high %v2083_v55, %v2087_v56  ;;  %v2136_v33 = vld [vmem:[#allocation22 + $0x5b8] sm:$0xff]  ;;  %v2143_v55 = vld [vmem:[#allocation22 + $0x5f0] sm:$0xff] }
 0x618   : > { %v2140_v56 = vld [vmem:[#allocation22 + $0x5d8] sm:$0xff] }
 0x619   : > { %3714 = vmatpush1.bf16.msra.mxu0 %v6619_v11  ;;  %v2092_v11 = vld [vmem:[#allocation22 + $0x458] sm:$0xff] }
 0x61a   : > { %3796 = vmatpush1.bf16.msra.mxu1 %v6621_v12  ;;  %3715 = vmatprep.subr.bf16.mxu0 %v6628_v15  ;;  %v2096_v12 = vld [vmem:[#allocation22 + $0x478] sm:$0xff]  ;;  %v6677_v15 = vcombine.low %v2084_v57, %v2088_v21 }
 0x61b   : > { %3797 = vmatprep.subr.bf16.mxu1 %v6630_v16  ;;  %v6684_v16 = vcombine.high %v2091_v6, %v2095_v8  ;;  %v6686_v18 = vcombine.high %v2092_v11, %v2096_v12  ;;  %v2144_v57 = vld [vmem:[#allocation22 + $0x5f8] sm:$0xff] }
 0x61d   : > { %3716 = vmatpush1.bf16.msra.mxu0 %v6627_v3  ;;  %v2104_v3 = vld [vmem:[#allocation22 + $0x4b8] sm:$0xff] }
 0x61e   : > { %3798 = vmatpush1.bf16.msra.mxu1 %v6629_v7  ;;  %3717 = vmatprep.subr.bf16.mxu0 %v6636_v0  ;;  %v6683_v7 = vcombine.low %v2091_v6, %v2095_v8  ;;  %v6685_v0 = vcombine.low %v2092_v11, %v2096_v12  ;;  %v6694_v1 = vcombine.high %v2100_v5, %v2104_v3  ;;  %v2151_v6 = vld [vmem:[#allocation22 + $0x630] sm:$0xff]  ;;  %v2148_v8 = vld [vmem:[#allocation22 + $0x618] sm:$0xff] }
 0x61f   : > { %3799 = vmatprep.subr.bf16.mxu1 %v6638_v62  ;;  %v6692_v62 = vcombine.high %v2099_v17, %v2103_v23  ;;  %v6733_v12 = vcombine.low %v2140_v56, %v2144_v57 }
 0x621   : > { %3718 = vmatpush1.bf16.msra.mxu0 %v6635_v20  ;;  %v2112_v20 = vld [vmem:[#allocation22 + $0x4f8] sm:$0xff] }
 0x622   : > { %3800 = vmatpush1.bf16.msra.mxu1 %v6637_v13  ;;  %3719 = vmatprep.subr.bf16.mxu0 %v6644_v14  ;;  %v6691_v13 = vcombine.low %v2099_v17, %v2103_v23  ;;  %v6700_v14 = vcombine.high %v2107_v63, %v2111_v9  ;;  %v2155_v17 = vld [vmem:[#allocation22 + $0x650] sm:$0xff] }
 0x623   : > { %3801 = vmatprep.subr.bf16.mxu1 %v6646_v22  ;;  %v6702_v22 = vcombine.high %v2108_v19, %v2112_v20  ;;  %v2159_v23 = vld [vmem:[#allocation22 + $0x670] sm:$0xff] }
 0x625   : > { %3720 = vmatpush1.bf16.msra.mxu0 %v6643_v35  ;;  %v6701_v35 = vcombine.low %v2108_v19, %v2112_v20  ;;  %v2168_v19 = vld [vmem:[#allocation22 + $0x6b8] sm:$0xff]  ;;  %v6747_v20 = vcombine.low %v2155_v17, %v2159_v23 }
 0x626   : > { %3802 = vmatpush1.bf16.msra.mxu1 %v6645_v37  ;;  %3721 = vmatprep.subr.bf16.mxu0 %v6652_v40  ;;  %v6708_v37 = vcombine.high %v2115_v25, %v2119_v26  ;;  %v6710_v40 = vcombine.high %v2116_v27, %v2120_v31  ;;  %v2175_v25 = vld [vmem:[#allocation22 + $0x6f0] sm:$0xff]  ;;  %v2172_v26 = vld [vmem:[#allocation22 + $0x6d8] sm:$0xff] }
 0x627   : > { %3803 = vmatprep.subr.bf16.mxu1 %v6654_v41  ;;  %v2123_v41 = vld [vmem:[#allocation22 + $0x550] sm:$0xff] }
 0x628   : > { %v6715_v48 = vcombine.low %v2123_v41, %v2127_v42 }
 0x629   : > { %3722 = vmatpush1.bf16.msra.mxu0 %v6651_v46  ;;  %v6709_v46 = vcombine.low %v2116_v27, %v2120_v31  ;;  %v2176_v27 = vld [vmem:[#allocation22 + $0x6f8] sm:$0xff] }
 0x62a   : > { %3804 = vmatpush1.bf16.msra.mxu1 %v6653_v47  ;;  %3723 = vmatprep.subr.bf16.mxu0 %v6660_v28  ;;  %v6716_v47 = vcombine.high %v2123_v41, %v2127_v42  ;;  %v6718_v28 = vcombine.high %v2124_v43, %v2128_v44  ;;  %v2183_v41 = vld [vmem:[#allocation22 + $0x730] sm:$0xff]  ;;  %v2180_v42 = vld [vmem:[#allocation22 + $0x718] sm:$0xff] }
 0x62b   : > { %3805 = vmatprep.subr.bf16.mxu1 %v6662_v29  ;;  %v2131_v29 = vld [vmem:[#allocation22 + $0x590] sm:$0xff] }
 0x62c   : > { %v6723_v21 = vcombine.low %v2131_v29, %v2135_v30 }
 0x62d   : > { %3724 = vmatpush1.bf16.msra.mxu0 %v6659_v49  ;;  %v6717_v49 = vcombine.low %v2124_v43, %v2128_v44  ;;  %v2184_v43 = vld [vmem:[#allocation22 + $0x738] sm:$0xff] }
 0x62e   : > { %3806 = vmatpush1.bf16.msra.mxu1 %v6661_v51  ;;  %3725 = vmatprep.subr.bf16.mxu0 %v6668_v53  ;;  %v6724_v51 = vcombine.high %v2131_v29, %v2135_v30  ;;  %v6726_v53 = vcombine.high %v2132_v32, %v2136_v33  ;;  %v2191_v29 = vld [vmem:[#allocation22 + $0x770] sm:$0xff]  ;;  %v2188_v30 = vld [vmem:[#allocation22 + $0x758] sm:$0xff] }
 0x62f   : > { %3807 = vmatprep.subr.bf16.mxu1 %v6670_v54  ;;  %v2139_v54 = vld [vmem:[#allocation22 + $0x5d0] sm:$0xff] }
 0x630   : > { %v6731_v11 = vcombine.low %v2139_v54, %v2143_v55 }
 0x631   : > { %3726 = vmatpush1.bf16.msra.mxu0 %v6667_v58  ;;  %v6725_v58 = vcombine.low %v2132_v32, %v2136_v33  ;;  %v2192_v32 = vld [vmem:[#allocation22 + $0x778] sm:$0xff] }
 0x632   : > { %3808 = vmatpush1.bf16.msra.mxu1 %v6669_v60  ;;  %3736 = vmatprep.subr.bf16.mxu0 %v6676_v61  ;;  %v6732_v60 = vcombine.high %v2139_v54, %v2143_v55  ;;  %v6734_v61 = vcombine.high %v2140_v56, %v2144_v57  ;;  %v2199_v54 = vld [vmem:[#allocation22 + $0x7b0] sm:$0xff]  ;;  %v2196_v55 = vld [vmem:[#allocation22 + $0x798] sm:$0xff] }
 0x633   : > { %3818 = vmatprep.subr.bf16.mxu1 %v6678_v4  ;;  %v2147_v4 = vld [vmem:[#allocation22 + $0x610] sm:$0xff]  ;;  %v2200_v56 = vld [vmem:[#allocation22 + $0x7b8] sm:$0xff] }
 0x634   : > { %3728 = vmatmul.mubr.bf16.vlgmr.msra.gmra.mrb[12].mxu0 %v9236_v24 }
 0x635   : > { %3810 = vmatmul.mubr.bf16.vlgmr.msra.gmra.mrb[12].mxu1 %v9236_v24  ;;  %3737 = vmatpush1.bf16.msra.mxu0 %v6675_v10  ;;  %v6693_v24 = vcombine.low %v2100_v5, %v2104_v3  ;;  %v2152_v10 = vld [vmem:[#allocation22 + $0x638] sm:$0xff]  ;;  %v6739_v3 = vcombine.low %v2147_v4, %v2151_v6 }
 0x636   : > { %3768 = vmatprep.mubr.bf16.mxu0 %v9242_v39  ;;  %3819 = vmatpush1.bf16.msra.mxu1 %v6677_v15  ;;  %v6740_v15 = vcombine.high %v2147_v4, %v2151_v6  ;;  %v2160_v5 = vld [vmem:[#allocation22 + $0x678] sm:$0xff]  ;;  %v2207_v4 = vld [vmem:[#allocation22 + $0x7f0] sm:$0xff] }
 0x637   : > { %3850 = vmatprep.mubr.bf16.mxu1 %v9242_v39  ;;  %3738 = vmatprep.subr.bf16.mxu0 %v6684_v16  ;;  %v6699_v39 = vcombine.low %v2107_v63, %v2111_v9  ;;  %v6742_v16 = vcombine.high %v2148_v8, %v2152_v10  ;;  %v2167_v63 = vld [vmem:[#allocation22 + $0x6b0] sm:$0xff]  ;;  %v2164_v9 = vld [vmem:[#allocation22 + $0x698] sm:$0xff] }
 0x638   : > { %3820 = vmatprep.subr.bf16.mxu1 %v6686_v18  ;;  %v2156_v18 = vld [vmem:[#allocation22 + $0x658] sm:$0xff] }
 0x639   : > { %3739 = vmatpush1.bf16.msra.mxu0 %v6683_v7  ;;  %v6741_v7 = vcombine.low %v2148_v8, %v2152_v10  ;;  %v2204_v6 = vld [vmem:[#allocation22 + $0x7d8] sm:$0xff] }
 0x63a   : > { %3821 = vmatpush1.bf16.msra.mxu1 %v6685_v0  ;;  %3740 = vmatprep.subr.bf16.mxu0 %v6692_v62  ;;  %v6748_v0 = vcombine.high %v2155_v17, %v2159_v23  ;;  %v6750_v62 = vcombine.high %v2156_v18, %v2160_v5  ;;  %v2208_v8 = vld [vmem:[#allocation22 + $0x7f8] sm:$0xff]  ;;  %v9266_v23 = vld [vmem:[#allocation24] sm:$0xff] }
 0x63b   : > { %3822 = vmatprep.subr.bf16.mxu1 %v6694_v1  ;;  %v2163_v1 = vld [vmem:[#allocation22 + $0x690] sm:$0xff]  ;;  %v6797_v17 = vcombine.low %v2204_v6, %v2208_v8 }
 0x63c   : > { %v6755_v31 = vcombine.low %v2163_v1, %v2167_v63 }
 0x63d   : > { %3741 = vmatpush1.bf16.msra.mxu0 %v6691_v13  ;;  %v6749_v13 = vcombine.low %v2156_v18, %v2160_v5  ;;  %v2214_v18 = vrot.slane %v9266_v23, %v9144_v52  ;;  %v2222_v5 = vrot.slane %v9266_v23, %v9181_v36 }
 0x63e   : > { %3823 = vmatpush1.bf16.msra.mxu1 %v6693_v24  ;;  %3742 = vmatprep.subr.bf16.mxu0 %v6700_v14  ;;  %v6756_v24 = vcombine.high %v2163_v1, %v2167_v63  ;;  %v6758_v14 = vcombine.high %v2164_v9, %v2168_v19 }
 0x63f   : > { %3824 = vmatprep.subr.bf16.mxu1 %v6702_v22  ;;  %v2171_v22 = vld [vmem:[#allocation22 + $0x6d0] sm:$0xff] }
 0x640   : > { %v6763_v44 = vcombine.low %v2171_v22, %v2175_v25 }
 0x641   : > { %3743 = vmatpush1.bf16.msra.mxu0 %v6699_v39  ;;  %v6757_v39 = vcombine.low %v2164_v9, %v2168_v19 }
 0x642   : > { %3825 = vmatpush1.bf16.msra.mxu1 %v6701_v35  ;;  %3744 = vmatprep.subr.bf16.mxu0 %v6708_v37  ;;  %v6764_v35 = vcombine.high %v2171_v22, %v2175_v25  ;;  %v6766_v37 = vcombine.high %v2172_v26, %v2176_v27 }
 0x643   : > { %3826 = vmatprep.subr.bf16.mxu1 %v6710_v40  ;;  %v2179_v40 = vld [vmem:[#allocation22 + $0x710] sm:$0xff] }
 0x644   : > { %v6771_v33 = vcombine.low %v2179_v40, %v2183_v41 }
 0x645   : > { %3745 = vmatpush1.bf16.msra.mxu0 %v6707_v45  ;;  %v6765_v45 = vcombine.low %v2172_v26, %v2176_v27 }
 0x646   : > { %3827 = vmatpush1.bf16.msra.mxu1 %v6709_v46  ;;  %3746 = vmatprep.subr.bf16.mxu0 %v6716_v47  ;;  %v6772_v46 = vcombine.high %v2179_v40, %v2183_v41  ;;  %v6774_v47 = vcombine.high %v2180_v42, %v2184_v43 }
 0x647   : > { %3828 = vmatprep.subr.bf16.mxu1 %v6718_v28  ;;  %v2187_v28 = vld [vmem:[#allocation22 + $0x750] sm:$0xff] }
 0x648   : > { %v6779_v57 = vcombine.low %v2187_v28, %v2191_v29 }
 0x649   : > { %3747 = vmatpush1.bf16.msra.mxu0 %v6715_v48  ;;  %v6773_v48 = vcombine.low %v2180_v42, %v2184_v43 }
 0x64a   : > { %3829 = vmatpush1.bf16.msra.mxu1 %v6717_v49  ;;  %3748 = vmatprep.subr.bf16.mxu0 %v6724_v51  ;;  %v6780_v49 = vcombine.high %v2187_v28, %v2191_v29  ;;  %v6782_v51 = vcombine.high %v2188_v30, %v2192_v32 }
 0x64b   : > { %3830 = vmatprep.subr.bf16.mxu1 %v6726_v53  ;;  %v2195_v53 = vld [vmem:[#allocation22 + $0x790] sm:$0xff] }
 0x64c   : > { %v6787_v10 = vcombine.low %v2195_v53, %v2199_v54 }
 0x64d   : > { %3749 = vmatpush1.bf16.msra.mxu0 %v6723_v21  ;;  %v6781_v21 = vcombine.low %v2188_v30, %v2192_v32 }
 0x64e   : > { %3831 = vmatpush1.bf16.msra.mxu1 %v6725_v58  ;;  %3750 = vmatprep.subr.bf16.mxu0 %v6732_v60  ;;  %v6788_v58 = vcombine.high %v2195_v53, %v2199_v54  ;;  %v6790_v60 = vcombine.high %v2196_v55, %v2200_v56 }
 0x64f   : > { %3832 = vmatprep.subr.bf16.mxu1 %v6734_v61  ;;  %v2203_v61 = vld [vmem:[#allocation22 + $0x7d0] sm:$0xff] }
 0x651   : > { %3751 = vmatpush1.bf16.msra.mxu0 %v6731_v11  ;;  %v6789_v11 = vcombine.low %v2196_v55, %v2200_v56 }
 0x652   : > { %3833 = vmatpush1.bf16.msra.mxu1 %v6733_v12  ;;  %3752 = vmatprep.subr.bf16.mxu0 %v6740_v15  ;;  %v6796_v12 = vcombine.high %v2203_v61, %v2207_v4  ;;  %v6798_v15 = vcombine.high %v2204_v6, %v2208_v8  ;;  %v7471_v8 = vld [vmem:[%s9135_s4] ss:$16 sps:$4 sm:$0xff]  }
 0x653   : > { %3834 = vmatprep.subr.bf16.mxu1 %v6742_v16  ;;  %v6795_v16 = vcombine.low %v2203_v61, %v2207_v4 }
 0x655   : > { %3753 = vmatpush1.bf16.msra.mxu0 %v6739_v3  ;;  %v2218_v3 = vrot.slane %v9266_v23, %v9149_v2 }
 0x656   : > { %3835 = vmatpush1.bf16.msra.mxu1 %v6741_v7  ;;  %3754 = vmatprep.subr.bf16.mxu0 %v6748_v0  ;;  %v2226_v7 = vrot.slane %v9266_v23, %v9184_v38 }
 0x657   : > { %3836 = vmatprep.subr.bf16.mxu1 %v6750_v62 }
 0x659   : > { %3755 = vmatpush1.bf16.msra.mxu0 %v6747_v20 }
 0x65a   : > { %3837 = vmatpush1.bf16.msra.mxu1 %v6749_v13  ;;  %3756 = vmatprep.subr.bf16.mxu0 %v6756_v24 }
 0x65b   : > { %3838 = vmatprep.subr.bf16.mxu1 %v6758_v14 }
 0x65d   : > { %3757 = vmatpush1.bf16.msra.mxu0 %v6755_v31 }
 0x65e   : > { %3839 = vmatpush1.bf16.msra.mxu1 %v6757_v39  ;;  %3758 = vmatprep.subr.bf16.mxu0 %v6764_v35 }
 0x65f   : > { %3840 = vmatprep.subr.bf16.mxu1 %v6766_v37 }
 0x661   : > { %3759 = vmatpush1.bf16.msra.mxu0 %v6763_v44 }
 0x662   : > { %3841 = vmatpush1.bf16.msra.mxu1 %v6765_v45  ;;  %3760 = vmatprep.subr.bf16.mxu0 %v6772_v46 }
 0x663   : > { %3842 = vmatprep.subr.bf16.mxu1 %v6774_v47 }
 0x665   : > { %3761 = vmatpush1.bf16.msra.mxu0 %v6771_v33 }
 0x666   : > { %3843 = vmatpush1.bf16.msra.mxu1 %v6773_v48  ;;  %3762 = vmatprep.subr.bf16.mxu0 %v6780_v49 }
 0x667   : > { %3844 = vmatprep.subr.bf16.mxu1 %v6782_v51 }
 0x669   : > { %3763 = vmatpush1.bf16.msra.mxu0 %v6779_v57 }
 0x66a   : > { %3845 = vmatpush1.bf16.msra.mxu1 %v6781_v21  ;;  %3764 = vmatprep.subr.bf16.mxu0 %v6788_v58  ;;  %v7473_v21 = vld [vmem:[%s9135_s4 + $0x4] ss:$16 sps:$4 sm:$0xff]   ;;  %v7476_v58 = vld [vmem:[%s9135_s4 + $0xc] ss:$16 sps:$4 sm:$0xff]  }
 0x66b   : > { %3846 = vmatprep.subr.bf16.mxu1 %v6790_v60 }
 0x66d   : > { %3765 = vmatpush1.bf16.msra.mxu0 %v6787_v10  ;;  %v7474_v10 = vld [vmem:[%s9135_s4 + $0x8] ss:$16 sps:$4 sm:$0xff]  }
 0x66e   : > { %3847 = vmatpush1.bf16.msra.mxu1 %v6789_v11  ;;  %3766 = vmatprep.subr.bf16.mxu0 %v6796_v12 }
 0x66f   : > { %3848 = vmatprep.subr.bf16.mxu1 %v6798_v15 }
 0x671   : > { %3767 = vmatpush1.bf16.msra.mxu0 %v6795_v16 }
 0x672   : > { %3849 = vmatpush1.bf16.msra.mxu1 %v6797_v17  ;;  %5827 = vmatprep.subr.bf16.mxu0 %v7473_v21 }
 0x673   : > { %5991 = vmatprep.subr.bf16.mxu1 %v7476_v58 }
 0x674   : > { %3769 = vmatmul.mubr.bf16.vlgmr.msra.gmra.mrb[12].mxu0 %v9254_v34 }
 0x675   : > { %3851 = vmatmul.mubr.bf16.vlgmr.msra.gmra.mrb[12].mxu1 %v9254_v34  ;;  %5828 = vmatpush1.bf16.msra.mxu0 %v7471_v8  ;;  %v7494_v8 = vld [vmem:[%s9135_s4 + $0x6c] ss:$16 sps:$4 sm:$0xff]  }
 0x676   : > { %5992 = vmatpush1.bf16.msra.mxu1 %v7474_v10 }
 0x6c7   : > { %v3606_v0 = vpop.f32.mrb[8].mxu0  ;;  %v3688_v62 = vpop.f32.mrb[8].mxu1 }
 0x6c8   : > { %v7070_v1 = vadd.f32 %v3606_v0, %v2214_v18  ;;  %v7072_v63 = vadd.f32 %v3688_v62, %v2222_v5  ;;  %v3608_v9 = vpop.f32.mrb[9].mxu0  ;;  %v3690_v34 = vpop.f32.mrb[9].mxu1 }
 0x6c9   : > { %v7071_v19 = vadd.f32 %v3608_v9, %v2218_v3  ;;  %v7073_v20 = vadd.f32 %v3690_v34, %v2226_v7  ;;  %v3610_v13 = vpop.f32.mrb[10].mxu0  ;;  %v3692_v24 = vpop.f32.mrb[10].mxu1  ;;  %v7482_v9 = vld [vmem:[%s9135_s4 + $0x2c] ss:$16 sps:$4 sm:$0xff]  }
 0x6ca   : > { %v3859_v14 = vmul.f32 0.2, %v7070_v1  ;;  %v3861_v22 = vmul.f32 0.2, %v7072_v63  ;;  %v3611_v25 = vpop.f32.mrb[11].mxu0  ;;  %v3693_v26 = vpop.f32.mrb[11].mxu1  ;;  %5993 = vmatprep.subr.bf16.mxu1 %v7482_v9 }
 0x6cb   : > { %v3860_v27 = vmul.f32 0.2, %v7071_v19  ;;  %v3862_v31 = vmul.f32 0.2, %v7073_v20  ;;  %v7477_v24 = vld [vmem:[%s9135_s4 + $0x20] ss:$16 sps:$4 sm:$0xff]  }
 0x6cc   : > { %v9276_v39 = vmax.f32 %v7070_v1, %v3859_v14  ;;  %v9278_v35 = vmax.f32 %v7072_v63, %v3861_v22  ;;  %v7479_v63 = vld [vmem:[%s9135_s4 + $0x24] ss:$16 sps:$4 sm:$0xff]   ;;  %v7480_v14 = vld [vmem:[%s9135_s4 + $0x28] ss:$16 sps:$4 sm:$0xff]  }
 0x6cd   : > { %v9280_v37 = vmax.f32 %v7071_v19, %v3860_v27  ;;  %v9282_v40 = vmax.f32 %v7073_v20, %v3862_v31  ;;  %5829 = vmatprep.subr.bf16.mxu0 %v7479_v63  ;;  %5994 = vmatpush1.bf16.msra.mxu1 %v7480_v14  ;;  %v7495_v63 = vld [vmem:[%s9135_s4 + $0x80] ss:$16 sps:$4 sm:$0xff]   ;;  %v7498_v9 = vld [vmem:[%s9135_s4 + $0x88] ss:$16 sps:$4 sm:$0xff]   ;;  %v7509_v14 = vld [vmem:[%s9135_s4 + $0xc4] ss:$16 sps:$4 sm:$0xff]  }
 0x6ce   : > { %v3875_v41 = vrot.slane %v9276_v39, 4  ;;  %v3931_v42 = vmul.f32 %v9276_v39, %v9276_v39  ;;  %v3887_v43 = vrot.slane %v9278_v35, 4  ;;  %v3933_v44 = vmul.f32 %v9278_v35, %v9278_v35  ;;  %5830 = vmatpush1.bf16.msra.mxu0 %v7477_v24  ;;  %v7504_v24 = vld [vmem:[%s9135_s4 + $0xa8] ss:$16 sps:$4 sm:$0xff]  }
 0x6cf   : > { %v3881_v45 = vrot.slane %v9280_v37, 4  ;;  %v3932_v46 = vmul.f32 %v9280_v37, %v9280_v37  ;;  %v3893_v47 = vrot.slane %v9282_v40, 4  ;;  %v3934_v28 = vmul.f32 %v9282_v40, %v9282_v40 }
 0x6d0   : > { %v3876_v29 = vadd.f32 %v3875_v41, %v9276_v39  ;;  %v3939_v30 = vrot.slane %v3931_v42, 4  ;;  %v3888_v32 = vadd.f32 %v3887_v43, %v9278_v35  ;;  %v3951_v33 = vrot.slane %v3933_v44, 4 }
 0x6d1   : > { %v3882_v48 = vadd.f32 %v3881_v45, %v9280_v37  ;;  %v3945_v49 = vrot.slane %v3932_v46, 4  ;;  %v3894_v51 = vadd.f32 %v3893_v47, %v9282_v40  ;;  %v3957_v53 = vrot.slane %v3934_v28, 4 }
 0x6d2   : > { %v3877_v54 = vrot.slane %v3876_v29, 2  ;;  %v3940_v55 = vadd.f32 %v3939_v30, %v3931_v42  ;;  %v3889_v56 = vrot.slane %v3888_v32, 2  ;;  %v3952_v57 = vadd.f32 %v3951_v33, %v3933_v44 }
 0x6d3   : > { %v3883_v60 = vrot.slane %v3882_v48, 2  ;;  %v3946_v61 = vadd.f32 %v3945_v49, %v3932_v46  ;;  %v3895_v4 = vrot.slane %v3894_v51, 2  ;;  %v3958_v6 = vadd.f32 %v3957_v53, %v3934_v28  ;;  %v7485_v28 = vld [vmem:[%s9135_s4 + $0x44] ss:$16 sps:$4 sm:$0xff]   ;;  %v7483_v49 = vld [vmem:[%s9135_s4 + $0x40] ss:$16 sps:$4 sm:$0xff]  }
 0x6d4   : > { %v3878_v11 = vadd.f32 %v3877_v54, %v3876_v29  ;;  %v3941_v12 = vrot.slane %v3940_v55, 2  ;;  %v3890_v15 = vadd.f32 %v3889_v56, %v3888_v32  ;;  %v3953_v16 = vrot.slane %v3952_v57, 2  ;;  %v7488_v29 = vld [vmem:[%s9135_s4 + $0x4c] ss:$16 sps:$4 sm:$0xff]   ;;  %5831 = vmatprep.subr.bf16.mxu0 %v7485_v28 }
 0x6d5   : > { %v3884_v17 = vadd.f32 %v3883_v60, %v3882_v48  ;;  %v3947_v18 = vrot.slane %v3946_v61, 2  ;;  %v3896_v5 = vadd.f32 %v3895_v4, %v3894_v51  ;;  %v3959_v3 = vrot.slane %v3958_v6, 2  ;;  %v7486_v51 = vld [vmem:[%s9135_s4 + $0x48] ss:$16 sps:$4 sm:$0xff]   ;;  %5995 = vmatprep.subr.bf16.mxu1 %v7488_v29  ;;  %5832 = vmatpush1.bf16.msra.mxu0 %v7483_v49  ;;  %v7524_v49 = vld [vmem:[%s9135_s4 + $0x10c] ss:$16 sps:$4 sm:$0xff]  }
 0x6d6   : > { %v3879_v7 = vrot.slane %v3878_v11, 1  ;;  %v3942_v0 = vadd.f32 %v3941_v12, %v3940_v55  ;;  %v3891_v62 = vrot.slane %v3890_v15, 1  ;;  %v3954_v1 = vadd.f32 %v3953_v16, %v3952_v57  ;;  %5996 = vmatpush1.bf16.msra.mxu1 %v7486_v51  ;;  %v7489_v12 = vld [vmem:[%s9135_s4 + $0x60] ss:$16 sps:$4 sm:$0xff]  }
 0x6d7   : > { %v3885_v34 = vrot.slane %v3884_v17, 1  ;;  %v3948_v19 = vadd.f32 %v3947_v18, %v3946_v61  ;;  %v3897_v20 = vrot.slane %v3896_v5, 1  ;;  %v3960_v13 = vadd.f32 %v3959_v3, %v3958_v6  ;;  %v7491_v6 = vld [vmem:[%s9135_s4 + $0x64] ss:$16 sps:$4 sm:$0xff]   ;;  %5997 = vmatprep.subr.bf16.mxu1 %v7494_v8  ;;  %v7534_v8 = vld [vmem:[%s9135_s4 + $0x148] ss:$16 sps:$4 sm:$0xff]  }
 0x6d8   : > { %v3880_v22 = vadd.f32 %v3879_v7, %v3878_v11  ;;  %v3943_v25 = vrot.slane %v3942_v0, 1  ;;  %v3892_v26 = vadd.f32 %v3891_v62, %v3890_v15  ;;  %v3955_v27 = vrot.slane %v3954_v1, 1  ;;  %v7492_v15 = vld [vmem:[%s9135_s4 + $0x68] ss:$16 sps:$4 sm:$0xff]   ;;  %5833 = vmatprep.subr.bf16.mxu0 %v7491_v6  ;;  %v7531_v6 = vld [vmem:[%s9135_s4 + $0x140] ss:$16 sps:$4 sm:$0xff]  }
 0x6d9   : > { %v3886_v31 = vadd.f32 %v3885_v34, %v3884_v17  ;;  %v3949_v41 = vrot.slane %v3948_v19, 1  ;;  %v3898_v42 = vadd.f32 %v3897_v20, %v3896_v5  ;;  %v3961_v43 = vrot.slane %v3960_v13, 1  ;;  %5834 = vmatpush1.bf16.msra.mxu0 %v7489_v12  ;;  %v7500_v34 = vld [vmem:[%s9135_s4 + $0x8c] ss:$16 sps:$4 sm:$0xff]   ;;  %v7537_v12 = vld [vmem:[%s9135_s4 + $0x160] ss:$16 sps:$4 sm:$0xff]  }
 0x6da   : > { %v9308_v44 = vmul.f32 0.125, %v3880_v22  ;;  %v3944_v45 = vadd.f32 %v3943_v25, %v3942_v0  ;;  %v9310_v46 = vmul.f32 0.125, %v3892_v26  ;;  %v3956_v47 = vadd.f32 %v3955_v27, %v3954_v1  ;;  %5998 = vmatpush1.bf16.msra.mxu1 %v7492_v15  ;;  %v7497_v0 = vld [vmem:[%s9135_s4 + $0x84] ss:$16 sps:$4 sm:$0xff]   ;;  %v7506_v20 = vld [vmem:[%s9135_s4 + $0xac] ss:$16 sps:$4 sm:$0xff]  }
 0x6db   : > { %v9314_v30 = vmul.f32 0.125, %v3886_v31  ;;  %v3950_v32 = vadd.f32 %v3949_v41, %v3948_v19  ;;  %v9316_v33 = vmul.f32 0.125, %v3898_v42  ;;  %v3962_v48 = vadd.f32 %v3961_v43, %v3960_v13  ;;  %5835 = vmatprep.subr.bf16.mxu0 %v7497_v0  ;;  %5999 = vmatprep.subr.bf16.mxu1 %v7500_v34  ;;  %v7503_v19 = vld [vmem:[%s9135_s4 + $0xa4] ss:$16 sps:$4 sm:$0xff]   ;;  %v7501_v13 = vld [vmem:[%s9135_s4 + $0xa0] ss:$16 sps:$4 sm:$0xff]  }
 0x6dc   : > { %v3987_v53 = vmul.f32 0.125, %v3944_v45  ;;  %v3995_v54 = vmul.f32 %v9308_v44, %v9308_v44  ;;  %v3989_v55 = vmul.f32 0.125, %v3956_v47  ;;  %v3997_v56 = vmul.f32 %v9310_v46, %v9310_v46  ;;  %v7512_v22 = vld [vmem:[%s9135_s4 + $0xcc] ss:$16 sps:$4 sm:$0xff]   ;;  %v7507_v25 = vld [vmem:[%s9135_s4 + $0xc0] ss:$16 sps:$4 sm:$0xff]  }
 0x6dd   : > { %v3988_v57 = vmul.f32 0.125, %v3950_v32  ;;  %v3996_v21 = vmul.f32 %v9314_v30, %v9314_v30  ;;  %v3990_v58 = vmul.f32 0.125, %v3962_v48  ;;  %v3998_v60 = vmul.f32 %v9316_v33, %v9316_v33  ;;  %5836 = vmatpush1.bf16.msra.mxu0 %v7495_v63  ;;  %v7510_v26 = vld [vmem:[%s9135_s4 + $0xc8] ss:$16 sps:$4 sm:$0xff]   ;;  %v7515_v31 = vld [vmem:[%s9135_s4 + $0xe4] ss:$16 sps:$4 sm:$0xff]  }
 0x6de   : > { %v4003_v61 = vsub.f32 %v3987_v53, %v3995_v54  ;;  %v4005_v4 = vsub.f32 %v3989_v55, %v3997_v56  ;;  %6000 = vmatpush1.bf16.msra.mxu1 %v7498_v9  ;;  %5837 = vmatprep.subr.bf16.mxu0 %v7503_v19  ;;  %v7518_v41 = vld [vmem:[%s9135_s4 + $0xec] ss:$16 sps:$4 sm:$0xff]   ;;  %v7513_v43 = vld [vmem:[%s9135_s4 + $0xe0] ss:$16 sps:$4 sm:$0xff]   ;;  %v7516_v45 = vld [vmem:[%s9135_s4 + $0xe8] ss:$16 sps:$4 sm:$0xff]  }
 0x6df   : > { %v4004_v10 = vsub.f32 %v3988_v57, %v3996_v21  ;;  %v4006_v11 = vsub.f32 %v3990_v58, %v3998_v60  ;;  %6001 = vmatprep.subr.bf16.mxu1 %v7506_v20  ;;  %v7521_v48 = vld [vmem:[%s9135_s4 + $0x104] ss:$16 sps:$4 sm:$0xff]   ;;  %v7519_v53 = vld [vmem:[%s9135_s4 + $0x100] ss:$16 sps:$4 sm:$0xff]   ;;  %v7522_v54 = vld [vmem:[%s9135_s4 + $0x108] ss:$16 sps:$4 sm:$0xff]  }
 0x6e0   : > { %v4011_v16 = vmax.f32 %v4003_v61, 0.0  ;;  %v4013_v17 = vmax.f32 %v4005_v4, 0.0  ;;  %v7527_v57 = vld [vmem:[%s9135_s4 + $0x124] ss:$16 sps:$4 sm:$0xff]   ;;  %v7530_v21 = vld [vmem:[%s9135_s4 + $0x12c] ss:$16 sps:$4 sm:$0xff]  }
 0x6e1   : > { %v4012_v18 = vmax.f32 %v4004_v10, 0.0  ;;  %v4014_v5 = vmax.f32 %v4006_v11, 0.0  ;;  %5838 = vmatpush1.bf16.msra.mxu0 %v7501_v13  ;;  %v7525_v58 = vld [vmem:[%s9135_s4 + $0x120] ss:$16 sps:$4 sm:$0xff]   ;;  %v7528_v60 = vld [vmem:[%s9135_s4 + $0x128] ss:$16 sps:$4 sm:$0xff]  }
 0x6e2   : > { %v4019_v3 = vadd.f32 1e-05, %v4011_v16  ;;  %v4021_v7 = vadd.f32 1e-05, %v4013_v17  ;;  %6002 = vmatpush1.bf16.msra.mxu1 %v7504_v24  ;;  %5839 = vmatprep.subr.bf16.mxu0 %v7509_v14  ;;  %v7533_v61 = vld [vmem:[%s9135_s4 + $0x144] ss:$16 sps:$4 sm:$0xff]  }
 0x6e3   : > { %v4020_v62 = vadd.f32 1e-05, %v4012_v18  ;;  %v4022_v1 = vadd.f32 1e-05, %v4014_v5  ;;  %6003 = vmatprep.subr.bf16.mxu1 %v7512_v22  ;;  %v7536_v4 = vld [vmem:[%s9135_s4 + $0x14c] ss:$16 sps:$4 sm:$0xff]  }
 0x6e4   : > { %7869 = vrsqrt.f32 %v4019_v3  ;;  %v7539_v10 = vld [vmem:[%s9135_s4 + $0x164] ss:$16 sps:$4 sm:$0xff]   ;;  %v7542_v11 = vld [vmem:[%s9135_s4 + $0x16c] ss:$16 sps:$4 sm:$0xff]   ;;  %v7540_v15 = vld [vmem:[%s9135_s4 + $0x168] ss:$16 sps:$4 sm:$0xff]  }
 0x6e5   : > { %7871 = vrsqrt.f32 %v4021_v7  ;;  %5840 = vmatpush1.bf16.msra.mxu0 %v7507_v25  ;;  %v7545_v16 = vld [vmem:[%s9135_s4 + $0x184] ss:$16 sps:$4 sm:$0xff]   ;;  %v7548_v17 = vld [vmem:[%s9135_s4 + $0x18c] ss:$16 sps:$4 sm:$0xff]   ;;  %v7543_v18 = vld [vmem:[%s9135_s4 + $0x180] ss:$16 sps:$4 sm:$0xff]  }
 0x6e6   : > { %7873 = vrsqrt.f32 %v4020_v62  ;;  %6004 = vmatpush1.bf16.msra.mxu1 %v7510_v26  ;;  %5841 = vmatprep.subr.bf16.mxu0 %v7515_v31  ;;  %v7546_v5 = vld [vmem:[%s9135_s4 + $0x188] ss:$16 sps:$4 sm:$0xff]   ;;  %v7551_v3 = vld [vmem:[%s9135_s4 + $0x1a4] ss:$16 sps:$4 sm:$0xff]   ;;  %v7554_v7 = vld [vmem:[%s9135_s4 + $0x1ac] ss:$16 sps:$4 sm:$0xff]  }
 0x6e7   : > { %7875 = vrsqrt.f32 %v4022_v1  ;;  %6005 = vmatprep.subr.bf16.mxu1 %v7518_v41  ;;  %v7549_v0 = vld [vmem:[%s9135_s4 + $0x1a0] ss:$16 sps:$4 sm:$0xff]   ;;  %v7552_v62 = vld [vmem:[%s9135_s4 + $0x1a8] ss:$16 sps:$4 sm:$0xff]   ;;  %v7557_v1 = vld [vmem:[%s9135_s4 + $0x1c4] ss:$16 sps:$4 sm:$0xff]  }
 0x6e8   : > { %v7555_v63 = vld [vmem:[%s9135_s4 + $0x1c0] ss:$16 sps:$4 sm:$0xff]   ;;  %v7560_v9 = vld [vmem:[%s9135_s4 + $0x1cc] ss:$16 sps:$4 sm:$0xff]   ;;  %v7563_v34 = vld [vmem:[%s9135_s4 + $0x1e4] ss:$16 sps:$4 sm:$0xff]  }
 0x6e9   : > { %5842 = vmatpush1.bf16.msra.mxu0 %v7513_v43  ;;  %v7558_v19 = vld [vmem:[%s9135_s4 + $0x1c8] ss:$16 sps:$4 sm:$0xff]   ;;  %v7566_v20 = vld [vmem:[%s9135_s4 + $0x1ec] ss:$16 sps:$4 sm:$0xff]   ;;  %v7561_v13 = vld [vmem:[%s9135_s4 + $0x1e0] ss:$16 sps:$4 sm:$0xff]  }
 0x6ea   : > { %6006 = vmatpush1.bf16.msra.mxu1 %v7516_v45  ;;  %5843 = vmatprep.subr.bf16.mxu0 %v7521_v48  ;;  %v7564_v24 = vld [vmem:[%s9135_s4 + $0x1e8] ss:$16 sps:$4 sm:$0xff]   ;;  %v7569_v14 = vld [vmem:[%s9135_s4 + $0x204] ss:$16 sps:$4 sm:$0xff]   ;;  %v7572_v22 = vld [vmem:[%s9135_s4 + $0x20c] ss:$16 sps:$4 sm:$0xff]  }
 0x6eb   : > { %6007 = vmatprep.subr.bf16.mxu1 %v7524_v49  ;;  %v9391_v25 = vsub.s32 4, %v9141_v50  ;;  %v9394_v26 = vsub.s32 6, %v9141_v50  ;;  %v9400_v31 = vsub.s32 7, %v9141_v50 }
 0x6ed   : > { %5844 = vmatpush1.bf16.msra.mxu0 %v7519_v53  ;;  %v2230_v41 = vrot.slane %v9266_v23, %v9391_v25  ;;  %v2242_v45 = vrot.slane %v9266_v23, %v9400_v31 }
 0x6ee   : > { %v7870_v27 = vpop.eup %7869  ;;  %6008 = vmatpush1.bf16.msra.mxu1 %v7522_v54  ;;  %5845 = vmatprep.subr.bf16.mxu0 %v7527_v57 }
 0x6ef   : > { %v7872_v42 = vpop.eup %7871  ;;  %6009 = vmatprep.subr.bf16.mxu1 %v7530_v21 }
 0x6f0   : > { %v7874_v47 = vpop.eup %7873 }
 0x6f1   : > { %v7876_v28 = vpop.eup %7875  ;;  %v4044_v29 = vcombine.low %v7870_v27, %v7874_v47  ;;  %5846 = vmatpush1.bf16.msra.mxu0 %v7525_v58  ;;  %v9397_v27 = vsub.s32 5, %v9141_v50 }
 0x6f2   : > { %v4045_v32 = vcombine.low %v7872_v42, %v7876_v28  ;;  %6010 = vmatpush1.bf16.msra.mxu1 %v7528_v60  ;;  %5847 = vmatprep.subr.bf16.mxu0 %v7533_v61  ;;  %v2238_v42 = vrot.slane %v9266_v23, %v9394_v26 }
 0x6f3   : > { %v9351_v51 = vrot.slane %v4044_v29, %v9154_v59  ;;  %6011 = vmatprep.subr.bf16.mxu1 %v7536_v4  ;;  %v2234_v43 = vrot.slane %v9266_v23, %v9397_v27 }
 0x6f4   : > { %v9356_v55 = vrot.slane %v4045_v32, %v9154_v59 }
 0x6f5   : > { %5848 = vmatpush1.bf16.msra.mxu0 %v7531_v6 }
 0x6f6   : > { %v4076_v56 = vcombine.low %v9351_v51, %v9356_v55  ;;  %6012 = vmatpush1.bf16.msra.mxu1 %v7534_v8  ;;  %5849 = vmatprep.subr.bf16.mxu0 %v7539_v10 }
 0x6f7   : > { %6013 = vmatprep.subr.bf16.mxu1 %v7542_v11 }
 0x6f9   : > { %5850 = vmatpush1.bf16.msra.mxu0 %v7537_v12 }
 0x6fa   : > { %6014 = vmatpush1.bf16.msra.mxu1 %v7540_v15  ;;  %5851 = vmatprep.subr.bf16.mxu0 %v7545_v16 }
 0x6fb   : > { %6015 = vmatprep.subr.bf16.mxu1 %v7548_v17 }
 0x6fd   : > { %5852 = vmatpush1.bf16.msra.mxu0 %v7543_v18 }
 0x6fe   : > { %6016 = vmatpush1.bf16.msra.mxu1 %v7546_v5  ;;  %5853 = vmatprep.subr.bf16.mxu0 %v7551_v3 }
 0x6ff   : > { %6017 = vmatprep.subr.bf16.mxu1 %v7554_v7 }
 0x701   : > { %5854 = vmatpush1.bf16.msra.mxu0 %v7549_v0 }
 0x702   : > { %5855 = vmatprep.subr.bf16.mxu0 %v7557_v1  ;;  %6018 = vmatpush1.bf16.msra.mxu1 %v7552_v62 }
 0x703   : > { %6019 = vmatprep.subr.bf16.mxu1 %v7560_v9 }
 0x705   : > { %5856 = vmatpush1.bf16.msra.mxu0 %v7555_v63 }
 0x706   : > { %5857 = vmatprep.subr.bf16.mxu0 %v7563_v34  ;;  %6020 = vmatpush1.bf16.msra.mxu1 %v7558_v19 }
 0x707   : > { %6021 = vmatprep.subr.bf16.mxu1 %v7566_v20 }
 0x709   : > { %5858 = vmatpush1.bf16.msra.mxu0 %v7561_v13 }
 0x70a   : > { %6022 = vmatpush1.bf16.msra.mxu1 %v7564_v24  ;;  %5868 = vmatprep.subr.bf16.mxu0 %v7569_v14 }
 0x70b   : > { %6032 = vmatprep.subr.bf16.mxu1 %v7572_v22 }
 0x747   : > { %v3770_v47 = vpop.f32.mrb[12].mxu0 }
 0x748   : > { %v7074_v28 = vadd.f32 %v3770_v47, %v2230_v41  ;;  %v3852_v29 = vpop.f32.mrb[12].mxu1  ;;  %v3772_v32 = vpop.f32.mrb[13].mxu0 }
 0x749   : > { %v7076_v48 = vadd.f32 %v3852_v29, %v2238_v42  ;;  %v7075_v49 = vadd.f32 %v3772_v32, %v2234_v43  ;;  %v3854_v50 = vpop.f32.mrb[13].mxu1  ;;  %v3774_v53 = vpop.f32.mrb[14].mxu0 }
 0x74a   : > { %v3863_v54 = vmul.f32 0.2, %v7074_v28  ;;  %v7077_v57 = vadd.f32 %v3854_v50, %v2242_v45  ;;  %v3856_v21 = vpop.f32.mrb[14].mxu1  ;;  %v3775_v58 = vpop.f32.mrb[15].mxu0 }
 0x74b   : > { %v3865_v60 = vmul.f32 0.2, %v7076_v48  ;;  %v3864_v61 = vmul.f32 0.2, %v7075_v49  ;;  %v3857_v4 = vpop.f32.mrb[15].mxu1 }
 0x74c   : > { %v9410_v6 = vmax.f32 %v7074_v28, %v3863_v54  ;;  %v3866_v8 = vmul.f32 0.2, %v7077_v57 }
 0x74d   : > { %v9412_v10 = vmax.f32 %v7076_v48, %v3865_v60  ;;  %v9414_v23 = vmax.f32 %v7075_v49, %v3864_v61 }
 0x74e   : > { %v3899_v11 = vrot.slane %v9410_v6, 4  ;;  %v3935_v12 = vmul.f32 %v9410_v6, %v9410_v6  ;;  %v9419_v15 = vmax.f32 %v7077_v57, %v3866_v8 }
 0x74f   : > { %v3911_v16 = vrot.slane %v9412_v10, 4  ;;  %v3937_v17 = vmul.f32 %v9412_v10, %v9412_v10  ;;  %v3905_v18 = vrot.slane %v9414_v23, 4  ;;  %v3936_v5 = vmul.f32 %v9414_v23, %v9414_v23 }
 0x750   : > { %v3900_v3 = vadd.f32 %v3899_v11, %v9410_v6  ;;  %v3963_v7 = vrot.slane %v3935_v12, 4  ;;  %v3917_v0 = vrot.slane %v9419_v15, 4  ;;  %v3938_v62 = vmul.f32 %v9419_v15, %v9419_v15 }
 0x751   : > { %v3912_v1 = vadd.f32 %v3911_v16, %v9412_v10  ;;  %v3975_v63 = vrot.slane %v3937_v17, 4  ;;  %v3906_v9 = vadd.f32 %v3905_v18, %v9414_v23  ;;  %v3969_v34 = vrot.slane %v3936_v5, 4 }
 0x752   : > { %v3901_v19 = vrot.slane %v3900_v3, 2  ;;  %v3964_v20 = vadd.f32 %v3963_v7, %v3935_v12  ;;  %v3918_v13 = vadd.f32 %v3917_v0, %v9419_v15  ;;  %v3981_v24 = vrot.slane %v3938_v62, 4 }
 0x753   : > { %v3913_v14 = vrot.slane %v3912_v1, 2  ;;  %v3976_v22 = vadd.f32 %v3975_v63, %v3937_v17  ;;  %v3907_v41 = vrot.slane %v3906_v9, 2  ;;  %v3970_v42 = vadd.f32 %v3969_v34, %v3936_v5 }
 0x754   : > { %v3902_v43 = vadd.f32 %v3901_v19, %v3900_v3  ;;  %v3965_v45 = vrot.slane %v3964_v20, 2  ;;  %v3919_v47 = vrot.slane %v3918_v13, 2  ;;  %v3982_v28 = vadd.f32 %v3981_v24, %v3938_v62 }
 0x755   : > { %v3914_v29 = vadd.f32 %v3913_v14, %v3912_v1  ;;  %v3977_v32 = vrot.slane %v3976_v22, 2  ;;  %v3908_v48 = vadd.f32 %v3907_v41, %v3906_v9  ;;  %v3971_v49 = vrot.slane %v3970_v42, 2 }
 0x756   : > { %v3903_v50 = vrot.slane %v3902_v43, 1  ;;  %v3966_v53 = vadd.f32 %v3965_v45, %v3964_v20  ;;  %v3920_v54 = vadd.f32 %v3919_v47, %v3918_v13  ;;  %v3983_v57 = vrot.slane %v3982_v28, 2 }
 0x757   : > { %v3915_v21 = vrot.slane %v3914_v29, 1  ;;  %v3978_v58 = vadd.f32 %v3977_v32, %v3976_v22  ;;  %v3909_v60 = vrot.slane %v3908_v48, 1  ;;  %v3972_v61 = vadd.f32 %v3971_v49, %v3970_v42 }
 0x758   : > { %v3904_v4 = vadd.f32 %v3903_v50, %v3902_v43  ;;  %v3967_v8 = vrot.slane %v3966_v53, 1  ;;  %v3921_v11 = vrot.slane %v3920_v54, 1  ;;  %v3984_v12 = vadd.f32 %v3983_v57, %v3982_v28 }
 0x759   : > { %v3916_v16 = vadd.f32 %v3915_v21, %v3914_v29  ;;  %v3979_v17 = vrot.slane %v3978_v58, 1  ;;  %v3910_v18 = vadd.f32 %v3909_v60, %v3908_v48  ;;  %v3973_v5 = vrot.slane %v3972_v61, 1 }
 0x75a   : > { %v3927_v3 = vmul.f32 0.125, %v3904_v4  ;;  %v3968_v7 = vadd.f32 %v3967_v8, %v3966_v53  ;;  %v3922_v0 = vadd.f32 %v3921_v11, %v3920_v54  ;;  %v3985_v62 = vrot.slane %v3984_v12, 1 }
 0x75b   : > { %v3929_v1 = vmul.f32 0.125, %v3916_v16  ;;  %v3980_v63 = vadd.f32 %v3979_v17, %v3978_v58  ;;  %v3928_v9 = vmul.f32 0.125, %v3910_v18  ;;  %v3974_v34 = vadd.f32 %v3973_v5, %v3972_v61 }
 0x75c   : > { %v3991_v19 = vmul.f32 0.125, %v3968_v7  ;;  %v3999_v20 = vmul.f32 %v3927_v3, %v3927_v3  ;;  %v3930_v13 = vmul.f32 0.125, %v3922_v0  ;;  %v3986_v24 = vadd.f32 %v3985_v62, %v3984_v12  ;;  %v4035_v0 = vld [vmem:[#allocation25] sm:$0xff] }
 0x75d   : > { %v3993_v14 = vmul.f32 0.125, %v3980_v63  ;;  %v4001_v22 = vmul.f32 %v3929_v1, %v3929_v1  ;;  %v3992_v41 = vmul.f32 0.125, %v3974_v34  ;;  %v4000_v42 = vmul.f32 %v3928_v9, %v3928_v9 }
 0x75e   : > { %v4007_v43 = vsub.f32 %v3991_v19, %v3999_v20  ;;  %v3994_v45 = vmul.f32 0.125, %v3986_v24  ;;  %v4002_v47 = vmul.f32 %v3930_v13, %v3930_v13  ;;  %v4084_v5 = vrot.slane %v4076_v56, %v9154_v59 }
 0x75f   : > { %v4009_v28 = vsub.f32 %v3993_v14, %v4001_v22  ;;  %v4008_v29 = vsub.f32 %v3992_v41, %v4000_v42 }
 0x760   : > { %v4015_v32 = vmax.f32 %v4007_v43, 0.0  ;;  %v4010_v48 = vsub.f32 %v3994_v45, %v4002_v47 }
 0x761   : > { %v4017_v49 = vmax.f32 %v4009_v28, 0.0  ;;  %v4016_v50 = vmax.f32 %v4008_v29, 0.0 }
 0x762   : > { %v4023_v53 = vadd.f32 1e-05, %v4015_v32  ;;  %v4018_v54 = vmax.f32 %v4010_v48, 0.0 }
 0x763   : > { %v4025_v57 = vadd.f32 1e-05, %v4017_v49  ;;  %v4024_v21 = vadd.f32 1e-05, %v4016_v50 }
 0x764   : > { %7877 = vrsqrt.f32 %v4023_v53  ;;  %v4026_v58 = vadd.f32 1e-05, %v4018_v54 }
 0x765   : > { %7879 = vrsqrt.f32 %v4025_v57 }
 0x766   : > { %7881 = vrsqrt.f32 %v4024_v21 }
 0x767   : > { %7883 = vrsqrt.f32 %v4026_v58  ;;  %v4095_v58 = vld [vmem:[#allocation27] sm:$0xff] }
 0x76e   : > { %v7878_v60 = vpop.eup %7877 }
 0x76f   : > { %v7880_v61 = vpop.eup %7879 }
 0x770   : > { %v7882_v4 = vpop.eup %7881 }
 0x771   : > { %v7884_v8 = vpop.eup %7883  ;;  %v4046_v11 = vcombine.low %v7878_v60, %v7882_v4 }
 0x772   : > { %v4047_v12 = vcombine.low %v7880_v61, %v7884_v8 }
 0x773   : > { %v4068_v16 = vrot.slane %v4046_v11, %v9154_v59 }
 0x774   : > { %v4075_v17 = vrot.slane %v4047_v12, %v9154_v59 }
 0x776   : > { %v4077_v18 = vcombine.low %v4068_v16, %v4075_v17 }
 0x778   : > { %v4091_v7 = vrot.slane %v4077_v18, %v9154_v59 }
 0x77a   : > { %v4092_v62 = vcombine.low %v4084_v5, %v4091_v7 }
 0x77c   : > { %v4094_v63 = vmul.f32 %v4092_v62, %v4035_v0 }
 0x77e   : > { %v4116_v34 = vrot.slane %v4094_v63, %v9391_v25  ;;  %v4120_v19 = vrot.slane %v4094_v63, %v9397_v27  ;;  %v4124_v20 = vrot.slane %v4094_v63, %v9394_v26  ;;  %v4128_v24 = vrot.slane %v4094_v63, %v9400_v31 }
 0x77f   : > { %v4100_v14 = vrot.slane %v4094_v63, %v9144_v52  ;;  %v4104_v22 = vrot.slane %v4094_v63, %v9149_v2  ;;  %v4108_v51 = vrot.slane %v4094_v63, %v9181_v36  ;;  %v4112_v55 = vrot.slane %v4094_v63, %v9184_v38  ;;  %v7575_v63 = vld [vmem:[%s9135_s4 + $0x224] ss:$16 sps:$4 sm:$0xff]  }
 0x780   : > { %v4141_v56 = vmul.f32 %v4116_v34, %v3927_v3  ;;  %v4142_v41 = vmul.f32 %v4120_v19, %v3928_v9  ;;  %v4143_v42 = vmul.f32 %v4124_v20, %v3929_v1  ;;  %v4144_v43 = vmul.f32 %v4128_v24, %v3930_v13 }
 0x781   : > { %v4137_v45 = vmul.f32 %v4100_v14, %v9308_v44  ;;  %v4138_v47 = vmul.f32 %v4104_v22, %v9314_v30  ;;  %v4139_v28 = vmul.f32 %v4108_v51, %v9310_v46  ;;  %v4140_v29 = vmul.f32 %v4112_v55, %v9316_v33 }
 0x782   : > { %v4155_v32 = vcombine.low %v4141_v56, %v4142_v41  ;;  %v4156_v48 = vcombine.low %v4143_v42, %v4144_v43  ;;  %v4205_v49 = vmul.f32 %v4104_v22, %v9280_v37  ;;  %v4204_v50 = vmul.f32 %v4100_v14, %v9276_v39  ;;  %v7581_v14 = vld [vmem:[%s9135_s4 + $0x244] ss:$16 sps:$4 sm:$0xff]   ;;  %v7584_v22 = vld [vmem:[%s9135_s4 + $0x24c] ss:$16 sps:$4 sm:$0xff]   ;;  %v7585_v42 = vld [vmem:[%s9135_s4 + $0x260] ss:$16 sps:$4 sm:$0xff]  }
 0x783   : > { %v4153_v53 = vcombine.low %v4137_v45, %v4138_v47  ;;  %v4154_v54 = vcombine.low %v4139_v28, %v4140_v29  ;;  %v4207_v3 = vmul.f32 %v4112_v55, %v9282_v40  ;;  %v4209_v30 = vmul.f32 %v4120_v19, %v9414_v23  ;;  %v7582_v55 = vld [vmem:[%s9135_s4 + $0x248] ss:$16 sps:$4 sm:$0xff]   ;;  %v7587_v56 = vld [vmem:[%s9135_s4 + $0x264] ss:$16 sps:$4 sm:$0xff]   ;;  %v7590_v41 = vld [vmem:[%s9135_s4 + $0x26c] ss:$16 sps:$4 sm:$0xff]  }
 0x784   : > { %v4177_v1 = vrot.slane %v4155_v32, %v9154_v59  ;;  %v4184_v44 = vrot.slane %v4156_v48, %v9154_v59  ;;  %v4208_v46 = vmul.f32 %v4116_v34, %v9410_v6  ;;  %v4211_v37 = vmul.f32 %v4128_v24, %v9419_v15  ;;  %v7578_v34 = vld [vmem:[%s9135_s4 + $0x22c] ss:$16 sps:$4 sm:$0xff]   ;;  %v7576_v24 = vld [vmem:[%s9135_s4 + $0x228] ss:$16 sps:$4 sm:$0xff]   ;;  %v7593_v45 = vld [vmem:[%s9135_s4 + $0x284] ss:$16 sps:$4 sm:$0xff]  }
 0x785   : > { %v4163_v33 = vrot.slane %v4153_v53, %v9154_v59  ;;  %v4170_v9 = vrot.slane %v4154_v54, %v9154_v59  ;;  %v4210_v39 = vmul.f32 %v4124_v20, %v9412_v10  ;;  %v4206_v23 = vmul.f32 %v4108_v51, %v9278_v35  ;;  %v7573_v20 = vld [vmem:[%s9135_s4 + $0x220] ss:$16 sps:$4 sm:$0xff]   ;;  %v7588_v43 = vld [vmem:[%s9135_s4 + $0x268] ss:$16 sps:$4 sm:$0xff]   ;;  %v7596_v47 = vld [vmem:[%s9135_s4 + $0x28c] ss:$16 sps:$4 sm:$0xff]  }
 0x786   : > { %v4186_v13 = vcombine.low %v4177_v1, %v4184_v44  ;;  %v7579_v51 = vld [vmem:[%s9135_s4 + $0x240] ss:$16 sps:$4 sm:$0xff]   ;;  %v7594_v29 = vld [vmem:[%s9135_s4 + $0x288] ss:$16 sps:$4 sm:$0xff]   ;;  %v7599_v32 = vld [vmem:[%s9135_s4 + $0x2a4] ss:$16 sps:$4 sm:$0xff]  }
 0x787   : > { %v4185_v57 = vcombine.low %v4163_v33, %v4170_v9  ;;  %v7591_v28 = vld [vmem:[%s9135_s4 + $0x280] ss:$16 sps:$4 sm:$0xff]   ;;  %v7602_v48 = vld [vmem:[%s9135_s4 + $0x2ac] ss:$16 sps:$4 sm:$0xff]   ;;  %v7605_v53 = vld [vmem:[%s9135_s4 + $0x2c4] ss:$16 sps:$4 sm:$0xff]  }
 0x788   : > { %v4200_v40 = vrot.slane %v4186_v13, %v9154_v59  ;;  %v7608_v54 = vld [vmem:[%s9135_s4 + $0x2cc] ss:$16 sps:$4 sm:$0xff]   ;;  %v7606_v1 = vld [vmem:[%s9135_s4 + $0x2c8] ss:$16 sps:$4 sm:$0xff]   ;;  %v7611_v44 = vld [vmem:[%s9135_s4 + $0x2e4] ss:$16 sps:$4 sm:$0xff]  }
 0x789   : > { %v4193_v21 = vrot.slane %v4185_v57, %v9154_v59  ;;  %v7612_v33 = vld [vmem:[%s9135_s4 + $0x2e8] ss:$16 sps:$4 sm:$0xff]   ;;  %v7617_v9 = vld [vmem:[%s9135_s4 + $0x304] ss:$16 sps:$4 sm:$0xff]  }
 0x78a   : > { %v7618_v13 = vld [vmem:[%s9135_s4 + $0x308] ss:$16 sps:$4 sm:$0xff]   ;;  %v7623_v57 = vld [vmem:[%s9135_s4 + $0x324] ss:$16 sps:$4 sm:$0xff]  }
 0x78b   : > { %v4201_v60 = vcombine.low %v4193_v21, %v4200_v40  ;;  %v7626_v40 = vld [vmem:[%s9135_s4 + $0x32c] ss:$16 sps:$4 sm:$0xff]   ;;  %v7621_v21 = vld [vmem:[%s9135_s4 + $0x320] ss:$16 sps:$4 sm:$0xff]  }
 0x78d   : > { %v4203_v61 = vsub.f32 %v4095_v58, %v4201_v60  ;;  %v7624_v58 = vld [vmem:[%s9135_s4 + $0x328] ss:$16 sps:$4 sm:$0xff]   ;;  %v7629_v60 = vld [vmem:[%s9135_s4 + $0x344] ss:$16 sps:$4 sm:$0xff]  }
 0x78f   : > { %v4220_v6 = vrot.slane %v4203_v61, %v9149_v2  ;;  %v4216_v4 = vrot.slane %v4203_v61, %v9144_v52  ;;  %v4228_v15 = vrot.slane %v4203_v61, %v9184_v38  ;;  %v4224_v10 = vrot.slane %v4203_v61, %v9181_v36 }
 0x790   : > { %v4236_v8 = vrot.slane %v4203_v61, %v9397_v27  ;;  %v4232_v11 = vrot.slane %v4203_v61, %v9391_v25  ;;  %v4244_v59 = vrot.slane %v4203_v61, %v9400_v31  ;;  %v4240_v12 = vrot.slane %v4203_v61, %v9394_v26  ;;  %v7567_v31 = vld [vmem:[%s9135_s4 + $0x200] ss:$16 sps:$4 sm:$0xff]   ;;  %v7570_v26 = vld [vmem:[%s9135_s4 + $0x208] ss:$16 sps:$4 sm:$0xff]   ;;  %v7632_v61 = vld [vmem:[%s9135_s4 + $0x34c] ss:$16 sps:$4 sm:$0xff]  }
 0x791   : > { %v4254_v35 = vadd.f32 %v4220_v6, %v4205_v49  ;;  %v4253_v16 = vadd.f32 %v4216_v4, %v4204_v50  ;;  %v4256_v17 = vadd.f32 %v4228_v15, %v4207_v3  ;;  %v9475_v18 = vadd.f32 %v4224_v10, %v4206_v23  ;;  %v7597_v49 = vld [vmem:[%s9135_s4 + $0x2a0] ss:$16 sps:$4 sm:$0xff]   ;;  %v7600_v50 = vld [vmem:[%s9135_s4 + $0x2a8] ss:$16 sps:$4 sm:$0xff]   ;;  %v7635_v4 = vld [vmem:[%s9135_s4 + $0x364] ss:$16 sps:$4 sm:$0xff]  }
 0x792   : > { %v9477_v5 = vadd.f32 %v4236_v8, %v4209_v30  ;;  %v9479_v7 = vadd.f32 %v4232_v11, %v4208_v46  ;;  %v9481_v0 = vadd.f32 %v4244_v59, %v4211_v37  ;;  %v9483_v25 = vadd.f32 %v4240_v12, %v4210_v39  ;;  %v7603_v3 = vld [vmem:[%s9135_s4 + $0x2c0] ss:$16 sps:$4 sm:$0xff]   ;;  %v7614_v30 = vld [vmem:[%s9135_s4 + $0x2ec] ss:$16 sps:$4 sm:$0xff]   ;;  %v7630_v6 = vld [vmem:[%s9135_s4 + $0x348] ss:$16 sps:$4 sm:$0xff]  }
 0x793   : > { %v4262_v27 = vpack.c.bf16 %v4254_v35, %v4254_v35  ;;  %v4261_v62 = vpack.c.bf16 %v4253_v16, %v4253_v16  ;;  %v4264_v19 = vpack.c.bf16 %v4256_v17, %v4256_v17  ;;  %v7609_v46 = vld [vmem:[%s9135_s4 + $0x2e0] ss:$16 sps:$4 sm:$0xff]   ;;  %v7620_v37 = vld [vmem:[%s9135_s4 + $0x30c] ss:$16 sps:$4 sm:$0xff]   ;;  %v7636_v8 = vld [vmem:[%s9135_s4 + $0x368] ss:$16 sps:$4 sm:$0xff]  }
 0x794   : > { %v7615_v39 = vld [vmem:[%s9135_s4 + $0x300] ss:$16 sps:$4 sm:$0xff]   ;;  %v7638_v15 = vld [vmem:[%s9135_s4 + $0x36c] ss:$16 sps:$4 sm:$0xff]   ;;  %v7641_v11 = vld [vmem:[%s9135_s4 + $0x384] ss:$16 sps:$4 sm:$0xff]  }
 0x795   : > { %5859 = vmatprep.mubr.bf16.mxu0 %v4262_v27  ;;  %6023 = vmatprep.mubr.bf16.mxu1 %v4262_v27  ;;  %v7627_v23 = vld [vmem:[%s9135_s4 + $0x340] ss:$16 sps:$4 sm:$0xff]   ;;  %v7644_v59 = vld [vmem:[%s9135_s4 + $0x38c] ss:$16 sps:$4 sm:$0xff]   ;;  %v7642_v35 = vld [vmem:[%s9135_s4 + $0x388] ss:$16 sps:$4 sm:$0xff]  }
 0x796   : > { %5860 = vmatmul.mubr.bf16.vlgmr.msra.gmra.mrb[16].mxu0 %v4261_v62  ;;  %6024 = vmatmul.mubr.bf16.vlgmr.msra.gmra.mrb[16].mxu1 %v4261_v62  ;;  %v7633_v10 = vld [vmem:[%s9135_s4 + $0x360] ss:$16 sps:$4 sm:$0xff]   ;;  %v7647_v16 = vld [vmem:[%s9135_s4 + $0x3a4] ss:$16 sps:$4 sm:$0xff]   ;;  %v7650_v17 = vld [vmem:[%s9135_s4 + $0x3ac] ss:$16 sps:$4 sm:$0xff]  }
 0x797   : > { %5869 = vmatpush1.bf16.msra.mxu0 %v7567_v31  ;;  %6033 = vmatpush1.bf16.msra.mxu1 %v7570_v26  ;;  %v7639_v12 = vld [vmem:[%s9135_s4 + $0x380] ss:$16 sps:$4 sm:$0xff]   ;;  %v7648_v31 = vld [vmem:[%s9135_s4 + $0x3a8] ss:$16 sps:$4 sm:$0xff]   ;;  %v7653_v26 = vld [vmem:[%s9135_s4 + $0x3c4] ss:$16 sps:$4 sm:$0xff]  }
 0x798   : > { %5900 = vmatprep.mubr.bf16.mxu0 %v4264_v19  ;;  %6064 = vmatprep.mubr.bf16.mxu1 %v4264_v19  ;;  %v7645_v27 = vld [vmem:[%s9135_s4 + $0x3a0] ss:$16 sps:$4 sm:$0xff]   ;;  %v7656_v62 = vld [vmem:[%s9135_s4 + $0x3cc] ss:$16 sps:$4 sm:$0xff]   ;;  %v7659_v19 = vld [vmem:[%s9135_s4 + $0x3e4] ss:$16 sps:$4 sm:$0xff]  }
 0x799   : > { %5870 = vmatprep.subr.bf16.mxu0 %v7575_v63  ;;  %6034 = vmatprep.subr.bf16.mxu1 %v7578_v34  ;;  %v7651_v63 = vld [vmem:[%s9135_s4 + $0x3c0] ss:$16 sps:$4 sm:$0xff]   ;;  %v7654_v34 = vld [vmem:[%s9135_s4 + $0x3c8] ss:$16 sps:$4 sm:$0xff]  }
 0x79b   : > { %5871 = vmatpush1.bf16.msra.mxu0 %v7573_v20  ;;  %6035 = vmatpush1.bf16.msra.mxu1 %v7576_v24  ;;  %v7662_v20 = vld [vmem:[%s9135_s4 + $0x3ec] ss:$16 sps:$4 sm:$0xff]   ;;  %v7657_v24 = vld [vmem:[%s9135_s4 + $0x3e0] ss:$16 sps:$4 sm:$0xff]  }
 0x79c   : > { %5872 = vmatprep.subr.bf16.mxu0 %v7581_v14  ;;  %6036 = vmatprep.subr.bf16.mxu1 %v7584_v22  ;;  %v7660_v14 = vld [vmem:[%s9135_s4 + $0x3e8] ss:$16 sps:$4 sm:$0xff]   ;;  %v7665_v22 = vld [vmem:[%s9135_s4 + $0x404] ss:$16 sps:$4 sm:$0xff]  }
 0x79f   : > { %5873 = vmatpush1.bf16.msra.mxu0 %v7579_v51  ;;  %6037 = vmatpush1.bf16.msra.mxu1 %v7582_v55  ;;  %v7668_v51 = vld [vmem:[%s9135_s4 + $0x40c] ss:$16 sps:$4 sm:$0xff]   ;;  %v7663_v55 = vld [vmem:[%s9135_s4 + $0x400] ss:$16 sps:$4 sm:$0xff]  }
 0x7a0   : > { %5874 = vmatprep.subr.bf16.mxu0 %v7587_v56  ;;  %6038 = vmatprep.subr.bf16.mxu1 %v7590_v41  ;;  %v4263_v56 = vpack.c.bf16 %v9475_v18, %v9475_v18  ;;  %v7666_v41 = vld [vmem:[%s9135_s4 + $0x408] ss:$16 sps:$4 sm:$0xff]  }
 0x7a1   : > { %v7672_v18 = vld [vmem:[%s9135_s4 + $0x428] ss:$16 sps:$4 sm:$0xff]  }
 0x7a3   : > { %5875 = vmatpush1.bf16.msra.mxu0 %v7585_v42  ;;  %6039 = vmatpush1.bf16.msra.mxu1 %v7588_v43  ;;  %v4266_v42 = vpack.c.bf16 %v9477_v5, %v9477_v5  ;;  %v7671_v43 = vld [vmem:[%s9135_s4 + $0x424] ss:$16 sps:$4 sm:$0xff]   ;;  %v7680_v5 = vld [vmem:[%s9135_s4 + $0x44c] ss:$16 sps:$4 sm:$0xff]  }
 0x7a4   : > { %5876 = vmatprep.subr.bf16.mxu0 %v7593_v45  ;;  %6040 = vmatprep.subr.bf16.mxu1 %v7596_v47  ;;  %v7674_v45 = vld [vmem:[%s9135_s4 + $0x42c] ss:$16 sps:$4 sm:$0xff]   ;;  %v7669_v47 = vld [vmem:[%s9135_s4 + $0x420] ss:$16 sps:$4 sm:$0xff]  }
 0x7a7   : > { %5877 = vmatpush1.bf16.msra.mxu0 %v7591_v28  ;;  %6041 = vmatpush1.bf16.msra.mxu1 %v7594_v29  ;;  %v7677_v28 = vld [vmem:[%s9135_s4 + $0x444] ss:$16 sps:$4 sm:$0xff]   ;;  %v7675_v29 = vld [vmem:[%s9135_s4 + $0x440] ss:$16 sps:$4 sm:$0xff]  }
 0x7a8   : > { %5878 = vmatprep.subr.bf16.mxu0 %v7599_v32  ;;  %6042 = vmatprep.subr.bf16.mxu1 %v7602_v48  ;;  %v7678_v32 = vld [vmem:[%s9135_s4 + $0x448] ss:$16 sps:$4 sm:$0xff]   ;;  %v7683_v48 = vld [vmem:[%s9135_s4 + $0x464] ss:$16 sps:$4 sm:$0xff]  }
 0x7ab   : > { %5879 = vmatpush1.bf16.msra.mxu0 %v7597_v49  ;;  %6043 = vmatpush1.bf16.msra.mxu1 %v7600_v50  ;;  %v7686_v49 = vld [vmem:[%s9135_s4 + $0x46c] ss:$16 sps:$4 sm:$0xff]   ;;  %v7681_v50 = vld [vmem:[%s9135_s4 + $0x460] ss:$16 sps:$4 sm:$0xff]  }
 0x7ac   : > { %5880 = vmatprep.subr.bf16.mxu0 %v7605_v53  ;;  %6044 = vmatprep.subr.bf16.mxu1 %v7608_v54  ;;  %v7684_v53 = vld [vmem:[%s9135_s4 + $0x468] ss:$16 sps:$4 sm:$0xff]   ;;  %v7689_v54 = vld [vmem:[%s9135_s4 + $0x484] ss:$16 sps:$4 sm:$0xff]  }
 0x7af   : > { %5881 = vmatpush1.bf16.msra.mxu0 %v7603_v3  ;;  %6045 = vmatpush1.bf16.msra.mxu1 %v7606_v1  ;;  %v7692_v3 = vld [vmem:[%s9135_s4 + $0x48c] ss:$16 sps:$4 sm:$0xff]   ;;  %v7687_v1 = vld [vmem:[%s9135_s4 + $0x480] ss:$16 sps:$4 sm:$0xff]  }
 0x7b0   : > { %5882 = vmatprep.subr.bf16.mxu0 %v7611_v44  ;;  %6046 = vmatprep.subr.bf16.mxu1 %v7614_v30  ;;  %v7690_v44 = vld [vmem:[%s9135_s4 + $0x488] ss:$16 sps:$4 sm:$0xff]   ;;  %v7695_v30 = vld [vmem:[%s9135_s4 + $0x4a4] ss:$16 sps:$4 sm:$0xff]  }
 0x7b3   : > { %5883 = vmatpush1.bf16.msra.mxu0 %v7609_v46  ;;  %6047 = vmatpush1.bf16.msra.mxu1 %v7612_v33  ;;  %v7698_v46 = vld [vmem:[%s9135_s4 + $0x4ac] ss:$16 sps:$4 sm:$0xff]   ;;  %v7693_v33 = vld [vmem:[%s9135_s4 + $0x4a0] ss:$16 sps:$4 sm:$0xff]  }
 0x7b4   : > { %5884 = vmatprep.subr.bf16.mxu0 %v7617_v9  ;;  %6048 = vmatprep.subr.bf16.mxu1 %v7620_v37  ;;  %v7696_v9 = vld [vmem:[%s9135_s4 + $0x4a8] ss:$16 sps:$4 sm:$0xff]   ;;  %v7701_v37 = vld [vmem:[%s9135_s4 + $0x4c4] ss:$16 sps:$4 sm:$0xff]  }
 0x7b7   : > { %5885 = vmatpush1.bf16.msra.mxu0 %v7615_v39  ;;  %6049 = vmatpush1.bf16.msra.mxu1 %v7618_v13  ;;  %v7704_v39 = vld [vmem:[%s9135_s4 + $0x4cc] ss:$16 sps:$4 sm:$0xff]   ;;  %v7699_v13 = vld [vmem:[%s9135_s4 + $0x4c0] ss:$16 sps:$4 sm:$0xff]  }
 0x7b8   : > { %5886 = vmatprep.subr.bf16.mxu0 %v7623_v57  ;;  %6050 = vmatprep.subr.bf16.mxu1 %v7626_v40  ;;  %v7702_v57 = vld [vmem:[%s9135_s4 + $0x4c8] ss:$16 sps:$4 sm:$0xff]   ;;  %v7707_v40 = vld [vmem:[%s9135_s4 + $0x4e4] ss:$16 sps:$4 sm:$0xff]  }
 0x7bb   : > { %5887 = vmatpush1.bf16.msra.mxu0 %v7621_v21  ;;  %6051 = vmatpush1.bf16.msra.mxu1 %v7624_v58  ;;  %v7710_v21 = vld [vmem:[%s9135_s4 + $0x4ec] ss:$16 sps:$4 sm:$0xff]   ;;  %v7705_v58 = vld [vmem:[%s9135_s4 + $0x4e0] ss:$16 sps:$4 sm:$0xff]  }
 0x7bc   : > { %5888 = vmatprep.subr.bf16.mxu0 %v7629_v60  ;;  %6052 = vmatprep.subr.bf16.mxu1 %v7632_v61  ;;  %v7708_v60 = vld [vmem:[%s9135_s4 + $0x4e8] ss:$16 sps:$4 sm:$0xff]   ;;  %v7713_v61 = vld [vmem:[%s9135_s4 + $0x504] ss:$16 sps:$4 sm:$0xff]  }
 0x7bf   : > { %5889 = vmatpush1.bf16.msra.mxu0 %v7627_v23  ;;  %6053 = vmatpush1.bf16.msra.mxu1 %v7630_v6  ;;  %v7716_v23 = vld [vmem:[%s9135_s4 + $0x50c] ss:$16 sps:$4 sm:$0xff]   ;;  %v7711_v6 = vld [vmem:[%s9135_s4 + $0x500] ss:$16 sps:$4 sm:$0xff]  }
 0x7c0   : > { %5890 = vmatprep.subr.bf16.mxu0 %v7635_v4  ;;  %6054 = vmatprep.subr.bf16.mxu1 %v7638_v15  ;;  %v7714_v4 = vld [vmem:[%s9135_s4 + $0x508] ss:$16 sps:$4 sm:$0xff]   ;;  %v7719_v15 = vld [vmem:[%s9135_s4 + $0x524] ss:$16 sps:$4 sm:$0xff]  }
 0x7c3   : > { %5891 = vmatpush1.bf16.msra.mxu0 %v7633_v10  ;;  %6055 = vmatpush1.bf16.msra.mxu1 %v7636_v8  ;;  %v7722_v10 = vld [vmem:[%s9135_s4 + $0x52c] ss:$16 sps:$4 sm:$0xff]   ;;  %v7717_v8 = vld [vmem:[%s9135_s4 + $0x520] ss:$16 sps:$4 sm:$0xff]  }
 0x7c4   : > { %5892 = vmatprep.subr.bf16.mxu0 %v7641_v11  ;;  %6056 = vmatprep.subr.bf16.mxu1 %v7644_v59  ;;  %v7720_v11 = vld [vmem:[%s9135_s4 + $0x528] ss:$16 sps:$4 sm:$0xff]   ;;  %v7725_v59 = vld [vmem:[%s9135_s4 + $0x544] ss:$16 sps:$4 sm:$0xff]  }
 0x7c7   : > { %5893 = vmatpush1.bf16.msra.mxu0 %v7639_v12  ;;  %6057 = vmatpush1.bf16.msra.mxu1 %v7642_v35  ;;  %v7728_v12 = vld [vmem:[%s9135_s4 + $0x54c] ss:$16 sps:$4 sm:$0xff]   ;;  %v7723_v35 = vld [vmem:[%s9135_s4 + $0x540] ss:$16 sps:$4 sm:$0xff]  }
 0x7c8   : > { %5894 = vmatprep.subr.bf16.mxu0 %v7647_v16  ;;  %6058 = vmatprep.subr.bf16.mxu1 %v7650_v17  ;;  %v7726_v16 = vld [vmem:[%s9135_s4 + $0x548] ss:$16 sps:$4 sm:$0xff]   ;;  %v7731_v17 = vld [vmem:[%s9135_s4 + $0x564] ss:$16 sps:$4 sm:$0xff]  }
 0x7cb   : > { %5895 = vmatpush1.bf16.msra.mxu0 %v7645_v27  ;;  %6059 = vmatpush1.bf16.msra.mxu1 %v7648_v31  ;;  %v7734_v27 = vld [vmem:[%s9135_s4 + $0x56c] ss:$16 sps:$4 sm:$0xff]   ;;  %v7729_v31 = vld [vmem:[%s9135_s4 + $0x560] ss:$16 sps:$4 sm:$0xff]  }
 0x7cc   : > { %5896 = vmatprep.subr.bf16.mxu0 %v7653_v26  ;;  %6060 = vmatprep.subr.bf16.mxu1 %v7656_v62  ;;  %v7732_v26 = vld [vmem:[%s9135_s4 + $0x568] ss:$16 sps:$4 sm:$0xff]   ;;  %v7737_v62 = vld [vmem:[%s9135_s4 + $0x584] ss:$16 sps:$4 sm:$0xff]  }
 0x7cf   : > { %5897 = vmatpush1.bf16.msra.mxu0 %v7651_v63  ;;  %6061 = vmatpush1.bf16.msra.mxu1 %v7654_v34  ;;  %v7740_v63 = vld [vmem:[%s9135_s4 + $0x58c] ss:$16 sps:$4 sm:$0xff]   ;;  %v7735_v34 = vld [vmem:[%s9135_s4 + $0x580] ss:$16 sps:$4 sm:$0xff]  }
 0x7d0   : > { %5898 = vmatprep.subr.bf16.mxu0 %v7659_v19  ;;  %6062 = vmatprep.subr.bf16.mxu1 %v7662_v20  ;;  %v7738_v19 = vld [vmem:[%s9135_s4 + $0x588] ss:$16 sps:$4 sm:$0xff]   ;;  %v7743_v20 = vld [vmem:[%s9135_s4 + $0x5a4] ss:$16 sps:$4 sm:$0xff]  }
 0x7d3   : > { %5899 = vmatpush1.bf16.msra.mxu0 %v7657_v24  ;;  %6063 = vmatpush1.bf16.msra.mxu1 %v7660_v14  ;;  %v7746_v24 = vld [vmem:[%s9135_s4 + $0x5ac] ss:$16 sps:$4 sm:$0xff]   ;;  %v7741_v14 = vld [vmem:[%s9135_s4 + $0x5a0] ss:$16 sps:$4 sm:$0xff]  }
 0x7d4   : > { %5909 = vmatprep.subr.bf16.mxu0 %v7665_v22  ;;  %6073 = vmatprep.subr.bf16.mxu1 %v7668_v51  ;;  %v7744_v22 = vld [vmem:[%s9135_s4 + $0x5a8] ss:$16 sps:$4 sm:$0xff]   ;;  %v7749_v51 = vld [vmem:[%s9135_s4 + $0x5c4] ss:$16 sps:$4 sm:$0xff]  }
 0x7d6   : > { %5901 = vmatmul.mubr.bf16.vlgmr.msra.gmra.mrb[16].mxu0 %v4263_v56  ;;  %6065 = vmatmul.mubr.bf16.vlgmr.msra.gmra.mrb[16].mxu1 %v4263_v56  ;;  %v7747_v56 = vld [vmem:[%s9135_s4 + $0x5c0] ss:$16 sps:$4 sm:$0xff]  }
 0x7d7   : > { %5910 = vmatpush1.bf16.msra.mxu0 %v7663_v55  ;;  %5941 = vmatprep.mubr.bf16.mxu0 %v4266_v42  ;;  %v7752_v55 = vld [vmem:[%s9135_s4 + $0x5cc] ss:$16 sps:$4 sm:$0xff]  }
 0x7d8   : > { %6074 = vmatpush1.bf16.msra.mxu1 %v7666_v41  ;;  %6105 = vmatprep.mubr.bf16.mxu1 %v4266_v42  ;;  %v7750_v41 = vld [vmem:[%s9135_s4 + $0x5c8] ss:$16 sps:$4 sm:$0xff]   ;;  %v7755_v42 = vld [vmem:[%s9135_s4 + $0x5e4] ss:$16 sps:$4 sm:$0xff]  }
 0x7d9   : > { %5911 = vmatprep.subr.bf16.mxu0 %v7671_v43  ;;  %6075 = vmatprep.subr.bf16.mxu1 %v7674_v45  ;;  %v7758_v43 = vld [vmem:[%s9135_s4 + $0x5ec] ss:$16 sps:$4 sm:$0xff]   ;;  %v7753_v45 = vld [vmem:[%s9135_s4 + $0x5e0] ss:$16 sps:$4 sm:$0xff]  }
 0x7db   : > { %5912 = vmatpush1.bf16.msra.mxu0 %v7669_v47  ;;  %v7756_v47 = vld [vmem:[%s9135_s4 + $0x5e8] ss:$16 sps:$4 sm:$0xff]  }
 0x7dc   : > { %6076 = vmatpush1.bf16.msra.mxu1 %v7672_v18  ;;  %5913 = vmatprep.subr.bf16.mxu0 %v7677_v28  ;;  %v7761_v18 = vld [vmem:[%s9135_s4 + $0x604] ss:$16 sps:$4 sm:$0xff]   ;;  %v7764_v28 = vld [vmem:[%s9135_s4 + $0x60c] ss:$16 sps:$4 sm:$0xff]  }
 0x7dd   : > { %6077 = vmatprep.subr.bf16.mxu1 %v7680_v5  ;;  %v7759_v5 = vld [vmem:[%s9135_s4 + $0x600] ss:$16 sps:$4 sm:$0xff]  }
 0x7df   : > { %5914 = vmatpush1.bf16.msra.mxu0 %v7675_v29  ;;  %v4265_v29 = vpack.c.bf16 %v9479_v7, %v9479_v7  ;;  %v7768_v7 = vld [vmem:[%s9135_s4 + $0x628] ss:$16 sps:$4 sm:$0xff]  }
 0x7e0   : > { %6078 = vmatpush1.bf16.msra.mxu1 %v7678_v32  ;;  %5915 = vmatprep.subr.bf16.mxu0 %v7683_v48  ;;  %v7762_v32 = vld [vmem:[%s9135_s4 + $0x608] ss:$16 sps:$4 sm:$0xff]   ;;  %v7767_v48 = vld [vmem:[%s9135_s4 + $0x624] ss:$16 sps:$4 sm:$0xff]  }
 0x7e1   : > { %6079 = vmatprep.subr.bf16.mxu1 %v7686_v49  ;;  %v4268_v49 = vpack.c.bf16 %v9481_v0, %v9481_v0  ;;  %v7771_v0 = vld [vmem:[%s9135_s4 + $0x640] ss:$16 sps:$4 sm:$0xff]  }
 0x7e3   : > { %5916 = vmatpush1.bf16.msra.mxu0 %v7681_v50  ;;  %v7770_v50 = vld [vmem:[%s9135_s4 + $0x62c] ss:$16 sps:$4 sm:$0xff]  }
 0x7e4   : > { %6080 = vmatpush1.bf16.msra.mxu1 %v7684_v53  ;;  %5917 = vmatprep.subr.bf16.mxu0 %v7689_v54  ;;  %v7765_v53 = vld [vmem:[%s9135_s4 + $0x620] ss:$16 sps:$4 sm:$0xff]   ;;  %v7773_v54 = vld [vmem:[%s9135_s4 + $0x644] ss:$16 sps:$4 sm:$0xff]  }
 0x7e5   : > { %6081 = vmatprep.subr.bf16.mxu1 %v7692_v3  ;;  %v7776_v3 = vld [vmem:[%s9135_s4 + $0x64c] ss:$16 sps:$4 sm:$0xff]  }
 0x7e7   : > { %5918 = vmatpush1.bf16.msra.mxu0 %v7687_v1  ;;  %v7774_v1 = vld [vmem:[%s9135_s4 + $0x648] ss:$16 sps:$4 sm:$0xff]  }
 0x7e8   : > { %6082 = vmatpush1.bf16.msra.mxu1 %v7690_v44  ;;  %5919 = vmatprep.subr.bf16.mxu0 %v7695_v30  ;;  %v7779_v44 = vld [vmem:[%s9135_s4 + $0x664] ss:$16 sps:$4 sm:$0xff]   ;;  %v7782_v30 = vld [vmem:[%s9135_s4 + $0x66c] ss:$16 sps:$4 sm:$0xff]  }
 0x7e9   : > { %6083 = vmatprep.subr.bf16.mxu1 %v7698_v46  ;;  %v7777_v46 = vld [vmem:[%s9135_s4 + $0x660] ss:$16 sps:$4 sm:$0xff]  }
 0x7eb   : > { %5920 = vmatpush1.bf16.msra.mxu0 %v7693_v33  ;;  %v7780_v33 = vld [vmem:[%s9135_s4 + $0x668] ss:$16 sps:$4 sm:$0xff]  }
 0x7ec   : > { %6084 = vmatpush1.bf16.msra.mxu1 %v7696_v9  ;;  %5921 = vmatprep.subr.bf16.mxu0 %v7701_v37  ;;  %v7785_v9 = vld [vmem:[%s9135_s4 + $0x684] ss:$16 sps:$4 sm:$0xff]   ;;  %v7788_v37 = vld [vmem:[%s9135_s4 + $0x68c] ss:$16 sps:$4 sm:$0xff]  }
 0x7ed   : > { %6085 = vmatprep.subr.bf16.mxu1 %v7704_v39  ;;  %v7783_v39 = vld [vmem:[%s9135_s4 + $0x680] ss:$16 sps:$4 sm:$0xff]  }
 0x7ef   : > { %5922 = vmatpush1.bf16.msra.mxu0 %v7699_v13  ;;  %v7786_v13 = vld [vmem:[%s9135_s4 + $0x688] ss:$16 sps:$4 sm:$0xff]  }
 0x7f0   : > { %6086 = vmatpush1.bf16.msra.mxu1 %v7702_v57  ;;  %5923 = vmatprep.subr.bf16.mxu0 %v7707_v40  ;;  %v7791_v57 = vld [vmem:[%s9135_s4 + $0x6a4] ss:$16 sps:$4 sm:$0xff]   ;;  %v7794_v40 = vld [vmem:[%s9135_s4 + $0x6ac] ss:$16 sps:$4 sm:$0xff]  }
 0x7f1   : > { %6087 = vmatprep.subr.bf16.mxu1 %v7710_v21  ;;  %v7789_v21 = vld [vmem:[%s9135_s4 + $0x6a0] ss:$16 sps:$4 sm:$0xff]  }
 0x7f3   : > { %5924 = vmatpush1.bf16.msra.mxu0 %v7705_v58  ;;  %v7792_v58 = vld [vmem:[%s9135_s4 + $0x6a8] ss:$16 sps:$4 sm:$0xff]  }
 0x7f4   : > { %6088 = vmatpush1.bf16.msra.mxu1 %v7708_v60  ;;  %5925 = vmatprep.subr.bf16.mxu0 %v7713_v61  ;;  %v7797_v60 = vld [vmem:[%s9135_s4 + $0x6c4] ss:$16 sps:$4 sm:$0xff]   ;;  %v7800_v61 = vld [vmem:[%s9135_s4 + $0x6cc] ss:$16 sps:$4 sm:$0xff]  }
 0x7f5   : > { %6089 = vmatprep.subr.bf16.mxu1 %v7716_v23  ;;  %v7795_v23 = vld [vmem:[%s9135_s4 + $0x6c0] ss:$16 sps:$4 sm:$0xff]  }
 0x7f7   : > { %5926 = vmatpush1.bf16.msra.mxu0 %v7711_v6  ;;  %v7798_v6 = vld [vmem:[%s9135_s4 + $0x6c8] ss:$16 sps:$4 sm:$0xff]  }
 0x7f8   : > { %6090 = vmatpush1.bf16.msra.mxu1 %v7714_v4  ;;  %5927 = vmatprep.subr.bf16.mxu0 %v7719_v15  ;;  %v7803_v4 = vld [vmem:[%s9135_s4 + $0x6e4] ss:$16 sps:$4 sm:$0xff]   ;;  %v7806_v15 = vld [vmem:[%s9135_s4 + $0x6ec] ss:$16 sps:$4 sm:$0xff]  }
 0x7f9   : > { %6091 = vmatprep.subr.bf16.mxu1 %v7722_v10  ;;  %v7801_v10 = vld [vmem:[%s9135_s4 + $0x6e0] ss:$16 sps:$4 sm:$0xff]  }
 0x7fb   : > { %5928 = vmatpush1.bf16.msra.mxu0 %v7717_v8  ;;  %v7804_v8 = vld [vmem:[%s9135_s4 + $0x6e8] ss:$16 sps:$4 sm:$0xff]  }
 0x7fc   : > { %6092 = vmatpush1.bf16.msra.mxu1 %v7720_v11  ;;  %5929 = vmatprep.subr.bf16.mxu0 %v7725_v59  ;;  %v7809_v11 = vld [vmem:[%s9135_s4 + $0x704] ss:$16 sps:$4 sm:$0xff]   ;;  %v7812_v59 = vld [vmem:[%s9135_s4 + $0x70c] ss:$16 sps:$4 sm:$0xff]  }
 0x7fd   : > { %6093 = vmatprep.subr.bf16.mxu1 %v7728_v12  ;;  %v7807_v12 = vld [vmem:[%s9135_s4 + $0x700] ss:$16 sps:$4 sm:$0xff]  }
 0x7ff   : > { %5930 = vmatpush1.bf16.msra.mxu0 %v7723_v35  ;;  %v7810_v35 = vld [vmem:[%s9135_s4 + $0x708] ss:$16 sps:$4 sm:$0xff]  }
 0x800   : > { %6094 = vmatpush1.bf16.msra.mxu1 %v7726_v16  ;;  %5931 = vmatprep.subr.bf16.mxu0 %v7731_v17  ;;  %v7815_v16 = vld [vmem:[%s9135_s4 + $0x724] ss:$16 sps:$4 sm:$0xff]   ;;  %v7818_v17 = vld [vmem:[%s9135_s4 + $0x72c] ss:$16 sps:$4 sm:$0xff]  }
 0x801   : > { %6095 = vmatprep.subr.bf16.mxu1 %v7734_v27  ;;  %v7813_v27 = vld [vmem:[%s9135_s4 + $0x720] ss:$16 sps:$4 sm:$0xff]  }
 0x803   : > { %5932 = vmatpush1.bf16.msra.mxu0 %v7729_v31  ;;  %v7816_v31 = vld [vmem:[%s9135_s4 + $0x728] ss:$16 sps:$4 sm:$0xff]  }
 0x804   : > { %6096 = vmatpush1.bf16.msra.mxu1 %v7732_v26  ;;  %5933 = vmatprep.subr.bf16.mxu0 %v7737_v62  ;;  %v7821_v26 = vld [vmem:[%s9135_s4 + $0x744] ss:$16 sps:$4 sm:$0xff]   ;;  %v7824_v62 = vld [vmem:[%s9135_s4 + $0x74c] ss:$16 sps:$4 sm:$0xff]  }
 0x805   : > { %6097 = vmatprep.subr.bf16.mxu1 %v7740_v63  ;;  %v7819_v63 = vld [vmem:[%s9135_s4 + $0x740] ss:$16 sps:$4 sm:$0xff]  }
 0x807   : > { %5934 = vmatpush1.bf16.msra.mxu0 %v7735_v34  ;;  %v7822_v34 = vld [vmem:[%s9135_s4 + $0x748] ss:$16 sps:$4 sm:$0xff]  }
 0x808   : > { %6098 = vmatpush1.bf16.msra.mxu1 %v7738_v19  ;;  %5935 = vmatprep.subr.bf16.mxu0 %v7743_v20  ;;  %v7827_v19 = vld [vmem:[%s9135_s4 + $0x764] ss:$16 sps:$4 sm:$0xff]   ;;  %v7830_v20 = vld [vmem:[%s9135_s4 + $0x76c] ss:$16 sps:$4 sm:$0xff]  }
 0x809   : > { %6099 = vmatprep.subr.bf16.mxu1 %v7746_v24  ;;  %v7825_v24 = vld [vmem:[%s9135_s4 + $0x760] ss:$16 sps:$4 sm:$0xff]  }
 0x80b   : > { %5936 = vmatpush1.bf16.msra.mxu0 %v7741_v14  ;;  %v7828_v14 = vld [vmem:[%s9135_s4 + $0x768] ss:$16 sps:$4 sm:$0xff]  }
 0x80c   : > { %6100 = vmatpush1.bf16.msra.mxu1 %v7744_v22  ;;  %5937 = vmatprep.subr.bf16.mxu0 %v7749_v51  ;;  %v7833_v22 = vld [vmem:[%s9135_s4 + $0x784] ss:$16 sps:$4 sm:$0xff]   ;;  %v7836_v51 = vld [vmem:[%s9135_s4 + $0x78c] ss:$16 sps:$4 sm:$0xff]  }
 0x80d   : > { %6101 = vmatprep.subr.bf16.mxu1 %v7752_v55  ;;  %v7831_v55 = vld [vmem:[%s9135_s4 + $0x780] ss:$16 sps:$4 sm:$0xff]  }
 0x80f   : > { %5938 = vmatpush1.bf16.msra.mxu0 %v7747_v56  ;;  %v7834_v56 = vld [vmem:[%s9135_s4 + $0x788] ss:$16 sps:$4 sm:$0xff]  }
 0x810   : > { %6102 = vmatpush1.bf16.msra.mxu1 %v7750_v41  ;;  %5939 = vmatprep.subr.bf16.mxu0 %v7755_v42  ;;  %v7839_v41 = vld [vmem:[%s9135_s4 + $0x7a4] ss:$16 sps:$4 sm:$0xff]   ;;  %v7842_v42 = vld [vmem:[%s9135_s4 + $0x7ac] ss:$16 sps:$4 sm:$0xff]  }
 0x811   : > { %6103 = vmatprep.subr.bf16.mxu1 %v7758_v43  ;;  %v7837_v43 = vld [vmem:[%s9135_s4 + $0x7a0] ss:$16 sps:$4 sm:$0xff]  }
 0x813   : > { %5940 = vmatpush1.bf16.msra.mxu0 %v7753_v45  ;;  %v7840_v45 = vld [vmem:[%s9135_s4 + $0x7a8] ss:$16 sps:$4 sm:$0xff]  }
 0x814   : > { %6104 = vmatpush1.bf16.msra.mxu1 %v7756_v47  ;;  %5950 = vmatprep.subr.bf16.mxu0 %v7761_v18  ;;  %v7845_v47 = vld [vmem:[%s9135_s4 + $0x7c4] ss:$16 sps:$4 sm:$0xff]   ;;  %v7848_v18 = vld [vmem:[%s9135_s4 + $0x7cc] ss:$16 sps:$4 sm:$0xff]  }
 0x815   : > { %6114 = vmatprep.subr.bf16.mxu1 %v7764_v28  ;;  %v7843_v28 = vld [vmem:[%s9135_s4 + $0x7c0] ss:$16 sps:$4 sm:$0xff]  }
 0x816   : > { %5942 = vmatmul.mubr.bf16.vlgmr.msra.gmra.mrb[16].mxu0 %v4265_v29 }
 0x817   : > { %6106 = vmatmul.mubr.bf16.vlgmr.msra.gmra.mrb[16].mxu1 %v4265_v29  ;;  %5951 = vmatpush1.bf16.msra.mxu0 %v7759_v5  ;;  %v7846_v5 = vld [vmem:[%s9135_s4 + $0x7c8] ss:$16 sps:$4 sm:$0xff]   ;;  %v7851_v29 = vld [vmem:[%s9135_s4 + $0x7e4] ss:$16 sps:$4 sm:$0xff]  }
 0x818   : > { %5982 = vmatprep.mubr.bf16.mxu0 %v4268_v49  ;;  %6115 = vmatpush1.bf16.msra.mxu1 %v7762_v32  ;;  %v7854_v32 = vld [vmem:[%s9135_s4 + $0x7ec] ss:$16 sps:$4 sm:$0xff]  }
 0x819   : > { %6146 = vmatprep.mubr.bf16.mxu1 %v4268_v49  ;;  %5952 = vmatprep.subr.bf16.mxu0 %v7767_v48  ;;  %v7849_v48 = vld [vmem:[%s9135_s4 + $0x7e0] ss:$16 sps:$4 sm:$0xff]   ;;  %v7852_v49 = vld [vmem:[%s9135_s4 + $0x7e8] ss:$16 sps:$4 sm:$0xff]  }
 0x81a   : > { %6116 = vmatprep.subr.bf16.mxu1 %v7770_v50  ;;  %v4267_v50 = vpack.c.bf16 %v9483_v25, %v9483_v25 }
 0x81b   : > { %5953 = vmatpush1.bf16.msra.mxu0 %v7765_v53  ;;  %v4525_v53 = vld [vmem:[%s814_s3] sm:$0xf] }
 0x81c   : > { %6117 = vmatpush1.bf16.msra.mxu1 %v7768_v7  ;;  %5954 = vmatprep.subr.bf16.mxu0 %v7773_v54  ;;  %v4530_v7 = vrot.slane %v4525_v53, %v9144_v52  ;;  %v4534_v54 = vrot.slane %v4525_v53, %v9149_v2 }
 0x81d   : > { %6118 = vmatprep.subr.bf16.mxu1 %v7776_v3  ;;  %v4538_v3 = vrot.slane %v4525_v53, %v9181_v36 }
 0x81f   : > { %5955 = vmatpush1.bf16.msra.mxu0 %v7771_v0  ;;  %v4542_v0 = vrot.slane %v4525_v53, %v9184_v38 }
 0x820   : > { %6119 = vmatpush1.bf16.msra.mxu1 %v7774_v1  ;;  %5956 = vmatprep.subr.bf16.mxu0 %v7779_v44 }
 0x821   : > { %6120 = vmatprep.subr.bf16.mxu1 %v7782_v30 }
 0x823   : > { %5957 = vmatpush1.bf16.msra.mxu0 %v7777_v46 }
 0x824   : > { %6121 = vmatpush1.bf16.msra.mxu1 %v7780_v33  ;;  %5958 = vmatprep.subr.bf16.mxu0 %v7785_v9 }
 0x825   : > { %6122 = vmatprep.subr.bf16.mxu1 %v7788_v37 }
 0x827   : > { %5959 = vmatpush1.bf16.msra.mxu0 %v7783_v39 }
 0x828   : > { %6123 = vmatpush1.bf16.msra.mxu1 %v7786_v13  ;;  %5960 = vmatprep.subr.bf16.mxu0 %v7791_v57 }
 0x829   : > { %6124 = vmatprep.subr.bf16.mxu1 %v7794_v40 }
 0x82b   : > { %5961 = vmatpush1.bf16.msra.mxu0 %v7789_v21 }
 0x82c   : > { %6125 = vmatpush1.bf16.msra.mxu1 %v7792_v58  ;;  %5962 = vmatprep.subr.bf16.mxu0 %v7797_v60 }
 0x82d   : > { %6126 = vmatprep.subr.bf16.mxu1 %v7800_v61 }
 0x82f   : > { %5963 = vmatpush1.bf16.msra.mxu0 %v7795_v23 }
 0x830   : > { %6127 = vmatpush1.bf16.msra.mxu1 %v7798_v6  ;;  %5964 = vmatprep.subr.bf16.mxu0 %v7803_v4 }
 0x831   : > { %6128 = vmatprep.subr.bf16.mxu1 %v7806_v15 }
 0x833   : > { %5965 = vmatpush1.bf16.msra.mxu0 %v7801_v10 }
 0x834   : > { %6129 = vmatpush1.bf16.msra.mxu1 %v7804_v8  ;;  %5966 = vmatprep.subr.bf16.mxu0 %v7809_v11 }
 0x835   : > { %6130 = vmatprep.subr.bf16.mxu1 %v7812_v59 }
 0x837   : > { %5967 = vmatpush1.bf16.msra.mxu0 %v7807_v12 }
 0x838   : > { %6131 = vmatpush1.bf16.msra.mxu1 %v7810_v35  ;;  %5968 = vmatprep.subr.bf16.mxu0 %v7815_v16 }
 0x839   : > { %6132 = vmatprep.subr.bf16.mxu1 %v7818_v17 }
 0x83b   : > { %5969 = vmatpush1.bf16.msra.mxu0 %v7813_v27 }
 0x83c   : > { %6133 = vmatpush1.bf16.msra.mxu1 %v7816_v31  ;;  %5970 = vmatprep.subr.bf16.mxu0 %v7821_v26 }
 0x83d   : > { %6134 = vmatprep.subr.bf16.mxu1 %v7824_v62 }
 0x83f   : > { %5971 = vmatpush1.bf16.msra.mxu0 %v7819_v63 }
 0x840   : > { %6135 = vmatpush1.bf16.msra.mxu1 %v7822_v34  ;;  %5972 = vmatprep.subr.bf16.mxu0 %v7827_v19 }
 0x841   : > { %6136 = vmatprep.subr.bf16.mxu1 %v7830_v20 }
 0x843   : > { %5973 = vmatpush1.bf16.msra.mxu0 %v7825_v24 }
 0x844   : > { %6137 = vmatpush1.bf16.msra.mxu1 %v7828_v14  ;;  %5974 = vmatprep.subr.bf16.mxu0 %v7833_v22 }
 0x845   : > { %6138 = vmatprep.subr.bf16.mxu1 %v7836_v51 }
 0x847   : > { %5975 = vmatpush1.bf16.msra.mxu0 %v7831_v55 }
 0x848   : > { %6139 = vmatpush1.bf16.msra.mxu1 %v7834_v56  ;;  %5976 = vmatprep.subr.bf16.mxu0 %v7839_v41 }
 0x849   : > { %6140 = vmatprep.subr.bf16.mxu1 %v7842_v42 }
 0x84b   : > { %5977 = vmatpush1.bf16.msra.mxu0 %v7837_v43 }
 0x84c   : > { %6141 = vmatpush1.bf16.msra.mxu1 %v7840_v45  ;;  %5978 = vmatprep.subr.bf16.mxu0 %v7845_v47 }
 0x84d   : > { %6142 = vmatprep.subr.bf16.mxu1 %v7848_v18 }
 0x84f   : > { %5979 = vmatpush1.bf16.msra.mxu0 %v7843_v28 }
 0x850   : > { %6143 = vmatpush1.bf16.msra.mxu1 %v7846_v5  ;;  %5980 = vmatprep.subr.bf16.mxu0 %v7851_v29 }
 0x851   : > { %6144 = vmatprep.subr.bf16.mxu1 %v7854_v32 }
 0x853   : > { %5981 = vmatpush1.bf16.msra.mxu0 %v7849_v48 }
 0x854   : > { %6145 = vmatpush1.bf16.msra.mxu1 %v7852_v49 }
 0x856   : > { %5983 = vmatmul.mubr.bf16.vlgmr.msra.gmra.mrb[16].mxu0 %v4267_v50 }
 0x857   : > { %6147 = vmatmul.mubr.bf16.vlgmr.msra.gmra.mrb[16].mxu1 %v4267_v50 }
 0x929   : > { %v5984_v25 = vpop.f32.mrb[16].mxu0 }
 0x92a   : > { %v7078_v1 = vadd.f32 %v5984_v25, %v4530_v7  ;;  %v6148_v44 = vpop.f32.mrb[16].mxu1  ;;  %v5986_v30 = vpop.f32.mrb[17].mxu0 }
 0x92b   : > { %v7079_v46 = vadd.f32 %v5986_v30, %v4534_v54  ;;  %v6150_v33 = vpop.f32.mrb[17].mxu1  ;;  %v5988_v9 = vpop.f32.mrb[18].mxu0  ;;  %v7080_v37 = vadd.f32 %v6148_v44, %v4538_v3 }
 0x92c   : > { %6155 = vst [vmem:[%s880_s21] sm:$0xff] %v7078_v1  ;;  %v6152_v52 = vpop.f32.mrb[18].mxu1  ;;  %v5989_v39 = vpop.f32.mrb[19].mxu0  ;;  %v7081_v2 = vadd.f32 %v6150_v33, %v4542_v0 }
 0x92d   : > { %6156 = vst [vmem:[%s880_s21 + $0x8] sm:$0xff] %v7079_v46  ;;  %v6153_v36 = vpop.f32.mrb[19].mxu1  ;;  %6157 = vst [vmem:[%s880_s21 + $0x10] sm:$0xff] %v7080_v37 }
 0x92e   : > { %6158 = vst [vmem:[%s880_s21 + $0x18] sm:$0xff] %v7081_v2 }
 0x92f PF: > { %p38_p1 = scmp.ge.s32.totalorder %s8840_s26, 4   ;;  %s9828_s0 = smov %s8483_s30 }
 0x930   : > { %s9829_s30 = smov %s8487_s20  ;;  %s9830_s20 = smov %s8852_s1 }
 0x931   : > { %s9831_s21 = smov %s8840_s26  ;;  %40 = sbr.rel (!%p38_p1) target bundleno = 32 (0x20), region = 216 }
 0x938   :  { %6181 = vsyncpa [#allocation3], 1 }
 0x939   :  { %6183 = vsyncpa [#allocation3 + $0x1], 1 }
 0x93a   :  { %6184 = vsyncpa [#allocation5], 1 }
 0x93b   :  { %6185 = vsyncpa [#allocation8], 1 }
 0x93c   :  { %6186 = vsyncpa [#allocation11], 1 }
 0x93d   :  { %6187 = vsyncpa [#allocation14], 1 }
 0x93e   :  { %6188 = vsyncpa [#allocation17], 1 }
 0x93f   :  { %6189 = vsyncpa [#allocation20], 1 }
 0x940   :  { %6190 = vsyncpa [#allocation23], 1 }
 0x941   :  { %6191 = vsyncpa [#allocation26], 1 }
 0x942   :  { %6192 = vsyncpa [#allocation29], 1 }
 0x943   :  { %6194 = vsyncpa [#allocation29 + $0x1], 1 }

</bundles_post_ra>
